<compile_context>
chip_gen: v7x
topology: tpu7x:2x2x1
jax: 0.10.0
libtpu: 0.0.40
codegen_flags: <defaults>
</compile_context>

<pallas_src>
import jax
import jax.numpy as jnp
import numpy as np
from jax import lax
from jax.experimental import pallas as pl
from jax.experimental.pallas import tpu as pltpu

IN1 = 40960            # features per half (layer1 / layer2 input width)
IN_TOTAL = 2 * IN1     # full input width = 81920
H = 8                  # concat width (4 + 4)


def chessnet_kernel(x1_ref, x2_ref, wT_ref, b12_ref, w3_ref, b3_ref,
                    w4_ref, b4_ref, out_ref, acc_ref):
    k = pl.program_id(0)

    @pl.when(k == 0)
    def _():
        acc_ref[...] = jnp.zeros_like(acc_ref)

    # Hot path: contract the lane-dense (8, TK) weight slab against the two
    # input halves.  Rows 0:4 of wT belong to layer1 (applied to x1), rows 4:8
    # to layer2 (applied to x2).  Contraction is over the last (lane) dim.
    dn = (((1,), (1,)), ((), ()))
    p1 = lax.dot_general(x1_ref[...], wT_ref[:4, :], dn,
                         preferred_element_type=jnp.float32)   # (B, 4)
    p2 = lax.dot_general(x2_ref[...], wT_ref[4:, :], dn,
                         preferred_element_type=jnp.float32)   # (B, 4)
    acc_ref[...] += jnp.concatenate([p1, p2], axis=1)          # (B, 8)

    @pl.when(k == pl.num_programs(0) - 1)
    def _():
        # output3 = clamp(cat(layer1(x1), layer2(x2)), 0, 1)
        h = jnp.clip(acc_ref[...] + b12_ref[...], 0.0, 1.0)
        # output4 = clamp(layer3(output3), 0, 1)
        h = jnp.dot(h, w3_ref[...], preferred_element_type=jnp.float32) + b3_ref[...]
        h = jnp.clip(h, 0.0, 1.0)
        # output5 = layer4(output4)
        out_ref[...] = (jnp.dot(h, w4_ref[...], preferred_element_type=jnp.float32)
                        + b4_ref[...])


def _choose_k_steps(batch, vmem_budget_bytes=8 << 20):
    """Pick the fewest reduction steps (>=2 for DMA/compute overlap) whose
    double-buffered per-step footprint (x1 + x2 + weight slab) fits VMEM."""
    for nk in (2, 4, 5, 8, 10, 16, 20, 32, 40, 80, 160, 320):
        tk = IN1 // nk                      # always a multiple of 128
        step_bytes = (2 * batch + H) * tk * 4
        if 2 * step_bytes <= vmem_budget_bytes:   # x2 for double buffering
            return nk, tk
    return 320, IN1 // 320


def chessnet_forward(x, params):
    wT, b12, w3, b3, w4, b4 = params
    B = x.shape[0]
    nk, tk = _choose_k_steps(B)             # B=2 -> nk=2, tk=20480

    cost = pl.CostEstimate(
        flops=2 * B * IN_TOTAL * 4 + 2 * B * H * H + 2 * B * H,
        transcendentals=0,
        bytes_accessed=(B * IN_TOTAL + H * IN1 + B) * 4 + (4 * H + H * H + 1) * 4,
    )

    out = pl.pallas_call(
        chessnet_kernel,
        out_shape=jax.ShapeDtypeStruct((B, 1), jnp.float32),
        grid_spec=pltpu.PrefetchScalarGridSpec(
            num_scalar_prefetch=0,
            grid=(nk,),
            in_specs=[
                pl.BlockSpec((B, tk), lambda k: (0, k)),        # x first-half slab
                pl.BlockSpec((B, tk), lambda k: (0, k + nk)),   # x second-half slab
                pl.BlockSpec((H, tk), lambda k: (0, k)),        # packed (8, K) weight
                pl.BlockSpec((1, H), lambda k: (0, 0)),         # bias b1|b2
                pl.BlockSpec((H, H), lambda k: (0, 0)),         # W3^T
                pl.BlockSpec((1, H), lambda k: (0, 0)),         # b3
                pl.BlockSpec((H, 1), lambda k: (0, 0)),         # W4^T
                pl.BlockSpec((1, 1), lambda k: (0, 0)),         # b4
            ],
            out_specs=pl.BlockSpec((B, 1), lambda k: (0, 0)),
            scratch_shapes=[pltpu.VMEM((B, H), jnp.float32)],
        ),
        compiler_params=pltpu.CompilerParams(
            dimension_semantics=("arbitrary",)),
        cost_estimate=cost,
    )(x, x, wT, b12, w3, b3, w4, b4)
    return jnp.squeeze(out)   # matches torch .squeeze() on the [B, 1] result


def init_params(key):
    """Deterministic params mimicking PyTorch default Linear init (uniform +-1/sqrt(fan_in))."""
    k1, k2, k3, k4, k5, k6, k7, k8 = jax.random.split(key, 8)

    def unif(k, shape, fan_in):
        bound = 1.0 / np.sqrt(fan_in)
        return jax.random.uniform(k, shape, jnp.float32, -bound, bound)

    # PyTorch parameter shapes: layer1/2: (4, 40960), layer3: (8, 8), layer4: (1, 8)
    w1 = unif(k1, (4, IN1), IN1); b1 = unif(k2, (4,), IN1)
    w2 = unif(k3, (4, IN1), IN1); b2 = unif(k4, (4,), IN1)
    w3 = unif(k5, (8, 8), 8);     b3 = unif(k6, (8,), 8)
    w4 = unif(k7, (1, 8), 8);     b4 = unif(k8, (1,), 8)

    # Pack layer1 / layer2 into one lane-dense (8, 40960) weight:
    #   rows 0:4 = layer1.weight (applied to x[:, :40960])
    #   rows 4:8 = layer2.weight (applied to x[:, 40960:])
    wT = jnp.concatenate([w1, w2], axis=0)               # (8, IN1)
    b12 = jnp.concatenate([b1, b2]).reshape(1, H)

    return (wT, b12, w3.T, b3.reshape(1, H), w4.T, b4.reshape(1, 1))


def reference_forward(x, params):
    wT, b12, w3, b3, w4, b4 = params
    h1 = x[:, :IN1] @ wT[:4, :].T
    h2 = x[:, IN1:] @ wT[4:, :].T
    h = jnp.clip(jnp.concatenate([h1, h2], axis=1) + b12, 0.0, 1.0)
    h = jnp.clip(h @ w3 + b3, 0.0, 1.0)
    return jnp.squeeze(h @ w4 + b4)


if __name__ == "__main__":
    key = jax.random.PRNGKey(0)
    kx, kp = jax.random.split(key)
    B = 2
    x = jax.random.uniform(kx, (B, IN_TOTAL), dtype=jnp.float32)
    params = init_params(kp)

    out = jax.block_until_ready(chessnet_forward(x, params))

    ref = reference_forward(x, params)
    assert out.shape == (B,)
    np.testing.assert_allclose(np.asarray(out), np.asarray(ref), rtol=1e-4, atol=1e-4)
    print("KERNEL_OK")
</pallas_src>

<mosaic_0001>
module attributes {stable_mosaic.version = 11 : i64} {
  func.func @chessnet_kernel(%arg0: i32, %arg1: memref<2x20480xf32, #tpu.memory_space<vmem>>, %arg2: memref<2x20480xf32, #tpu.memory_space<vmem>>, %arg3: memref<8x20480xf32, #tpu.memory_space<vmem>>, %arg4: memref<1x8xf32, #tpu.memory_space<vmem>>, %arg5: memref<8x8xf32, #tpu.memory_space<vmem>>, %arg6: memref<1x8xf32, #tpu.memory_space<vmem>>, %arg7: memref<8x1xf32, #tpu.memory_space<vmem>>, %arg8: memref<1x1xf32, #tpu.memory_space<vmem>>, %arg9: memref<2x1xf32, #tpu.memory_space<vmem>>, %arg10: memref<2x8xf32, #tpu.memory_space<vmem>>) attributes {dimension_semantics = [#tpu.dimension_semantics<arbitrary>], iteration_bounds = array<i64: 2>, scalar_prefetch = 0 : i64, scratch_operands = 1 : i64, tpu.core_type = #tpu.core_type<tc>, window_params = [{transform_indices = @transform_0, window_bounds = array<i64: 2, 20480>}, {transform_indices = @transform_1, window_bounds = array<i64: 2, 20480>}, {transform_indices = @transform_2, window_bounds = array<i64: 8, 20480>}, {pipeline_mode = #tpu.pipeline_mode<synchronous>, transform_indices = @transform_3, window_bounds = array<i64: 1, 8>}, {pipeline_mode = #tpu.pipeline_mode<synchronous>, transform_indices = @transform_4, window_bounds = array<i64: 8, 8>}, {pipeline_mode = #tpu.pipeline_mode<synchronous>, transform_indices = @transform_5, window_bounds = array<i64: 1, 8>}, {pipeline_mode = #tpu.pipeline_mode<synchronous>, transform_indices = @transform_6, window_bounds = array<i64: 8, 1>}, {pipeline_mode = #tpu.pipeline_mode<synchronous>, transform_indices = @transform_7, window_bounds = array<i64: 1, 1>}, {pipeline_mode = #tpu.pipeline_mode<synchronous>, transform_indices = @transform_8, window_bounds = array<i64: 2, 1>}]} {
    %c0_i32 = arith.constant 0 : i32
    %0 = arith.cmpi eq, %arg0, %c0_i32 : i32
    %1 = arith.extui %0 : i1 to i32
    %c0_i32_0 = arith.constant 0 : i32
    %2 = arith.cmpi ne, %1, %c0_i32_0 : i32
    scf.if %2 {
      %cst_13 = arith.constant 0.000000e+00 : f32
      %16 = vector.broadcast %cst_13 : f32 to vector<2x8xf32>
      %c0_14 = arith.constant 0 : index
      %c0_15 = arith.constant 0 : index
      %17 = vector.load %arg10[%c0_14, %c0_15] : memref<2x8xf32, #tpu.memory_space<vmem>>, vector<2x8xf32>
      tpu.vector_store %arg10[%c0_14, %c0_15], %16 {strides = array<i32>} : memref<2x8xf32, #tpu.memory_space<vmem>>, vector<2x8xf32>,
    } else {
    }
    %c0 = arith.constant 0 : index
    %c0_1 = arith.constant 0 : index
    %3 = vector.load %arg1[%c0, %c0_1] : memref<2x20480xf32, #tpu.memory_space<vmem>>, vector<2x20480xf32>
    %c0_2 = arith.constant 0 : index
    %c0_3 = arith.constant 0 : index
    %4 = vector.load %arg3[%c0_2, %c0_3] : memref<8x20480xf32, #tpu.memory_space<vmem>>, vector<4x20480xf32>
    %cst = arith.constant dense<0.000000e+00> : vector<2x4xf32>
    %5 = tpu.matmul %3, %4, %cst {dimension_numbers = #tpu.dot_dimension_numbers<[1], [1], [0], [0], [0, 0, 1, 0], [], []>} : vector<2x20480xf32>, vector<4x20480xf32>, vector<2x4xf32> -> vector<2x4xf32>
    %c0_4 = arith.constant 0 : index
    %c0_5 = arith.constant 0 : index
    %6 = vector.load %arg2[%c0_4, %c0_5] : memref<2x20480xf32, #tpu.memory_space<vmem>>, vector<2x20480xf32>
    %c4 = arith.constant 4 : index
    %c0_6 = arith.constant 0 : index
    %7 = vector.load %arg3[%c4, %c0_6] : memref<8x20480xf32, #tpu.memory_space<vmem>>, vector<4x20480xf32>
    %cst_7 = arith.constant dense<0.000000e+00> : vector<2x4xf32>
    %8 = tpu.matmul %6, %7, %cst_7 {dimension_numbers = #tpu.dot_dimension_numbers<[1], [1], [0], [0], [0, 0, 1, 0], [], []>} : vector<2x20480xf32>, vector<4x20480xf32>, vector<2x4xf32> -> vector<2x4xf32>
    %c0_8 = arith.constant 0 : index
    %c0_9 = arith.constant 0 : index
    %9 = vector.load %arg10[%c0_8, %c0_9] : memref<2x8xf32, #tpu.memory_space<vmem>>, vector<2x8xf32>
    %10 = tpu.concatenate %5, %8 in 1 : vector<2x4xf32>, vector<2x4xf32> -> vector<2x8xf32>
    %11 = arith.addf %9, %10 : vector<2x8xf32>
    %c0_10 = arith.constant 0 : index
    %c0_11 = arith.constant 0 : index
    %12 = vector.load %arg10[%c0_10, %c0_11] : memref<2x8xf32, #tpu.memory_space<vmem>>, vector<2x8xf32>
    tpu.vector_store %arg10[%c0_10, %c0_11], %11 {strides = array<i32>} : memref<2x8xf32, #tpu.memory_space<vmem>>, vector<2x8xf32>,
    %c1_i32 = arith.constant 1 : i32
    %13 = arith.cmpi eq, %arg0, %c1_i32 : i32
    %14 = arith.extui %13 : i1 to i32
    %c0_i32_12 = arith.constant 0 : i32
    %15 = arith.cmpi ne, %14, %c0_i32_12 : i32
    scf.if %15 {
      %c0_13 = arith.constant 0 : index
      %c0_14 = arith.constant 0 : index
      %16 = vector.load %arg10[%c0_13, %c0_14] : memref<2x8xf32, #tpu.memory_space<vmem>>, vector<2x8xf32>
      %c0_15 = arith.constant 0 : index
      %c0_16 = arith.constant 0 : index
      %17 = vector.load %arg4[%c0_15, %c0_16] : memref<1x8xf32, #tpu.memory_space<vmem>>, vector<1x8xf32>
      %18 = vector.broadcast %17 : vector<1x8xf32> to vector<2x8xf32>
      %19 = arith.addf %16, %18 : vector<2x8xf32>
      %cst_17 = arith.constant 0.000000e+00 : f32
      %cst_18 = arith.constant 1.000000e+00 : f32
      %20 = vector.broadcast %cst_17 : f32 to vector<2x8xf32>
      %21 = arith.maximumf %20, %19 : vector<2x8xf32>
      %22 = vector.broadcast %cst_18 : f32 to vector<2x8xf32>
      %23 = arith.minimumf %22, %21 : vector<2x8xf32>
      %c0_19 = arith.constant 0 : index
      %c0_20 = arith.constant 0 : index
      %24 = vector.load %arg5[%c0_19, %c0_20] : memref<8x8xf32, #tpu.memory_space<vmem>>, vector<8x8xf32>
      %cst_21 = arith.constant dense<0.000000e+00> : vector<2x8xf32>
      %25 = tpu.matmul %23, %24, %cst_21 {dimension_numbers = #tpu.dot_dimension_numbers<[1], [0], [0], [1], [0, 0, 1, 1], [], []>} : vector<2x8xf32>, vector<8x8xf32>, vector<2x8xf32> -> vector<2x8xf32>
      %c0_22 = arith.constant 0 : index
      %c0_23 = arith.constant 0 : index
      %26 = vector.load %arg6[%c0_22, %c0_23] : memref<1x8xf32, #tpu.memory_space<vmem>>, vector<1x8xf32>
      %27 = vector.broadcast %26 : vector<1x8xf32> to vector<2x8xf32>
      %28 = arith.addf %25, %27 : vector<2x8xf32>
      %cst_24 = arith.constant 0.000000e+00 : f32
      %cst_25 = arith.constant 1.000000e+00 : f32
      %29 = vector.broadcast %cst_24 : f32 to vector<2x8xf32>
      %30 = arith.maximumf %29, %28 : vector<2x8xf32>
      %31 = vector.broadcast %cst_25 : f32 to vector<2x8xf32>
      %32 = arith.minimumf %31, %30 : vector<2x8xf32>
      %c0_26 = arith.constant 0 : index
      %c0_27 = arith.constant 0 : index
      %33 = vector.load %arg7[%c0_26, %c0_27] : memref<8x1xf32, #tpu.memory_space<vmem>>, vector<8x1xf32>
      %cst_28 = arith.constant dense<0.000000e+00> : vector<2x1xf32>
      %34 = tpu.matmul %32, %33, %cst_28 {dimension_numbers = #tpu.dot_dimension_numbers<[1], [0], [0], [1], [0, 0, 1, 1], [], []>} : vector<2x8xf32>, vector<8x1xf32>, vector<2x1xf32> -> vector<2x1xf32>
      %c0_29 = arith.constant 0 : index
      %c0_30 = arith.constant 0 : index
      %35 = vector.load %arg8[%c0_29, %c0_30] : memref<1x1xf32, #tpu.memory_space<vmem>>, vector<1x1xf32>
      %36 = vector.broadcast %35 : vector<1x1xf32> to vector<2x1xf32>
      %37 = arith.addf %34, %36 : vector<2x1xf32>
      %c0_31 = arith.constant 0 : index
      %c0_32 = arith.constant 0 : index
      %38 = vector.load %arg9[%c0_31, %c0_32] : memref<2x1xf32, #tpu.memory_space<vmem>>, vector<2x1xf32>
      tpu.vector_store %arg9[%c0_31, %c0_32], %37 {strides = array<i32>} : memref<2x1xf32, #tpu.memory_space<vmem>>, vector<2x1xf32>,
    } else {
    }
    return
  }
  func.func @transform_0(%arg0: i32) -> (i32, i32) {
    %c0_i32 = arith.constant 0 : i32
    %c0_i32_0 = arith.constant 0 : i32
    return %c0_i32, %arg0 : i32, i32
  }
  func.func @transform_1(%arg0: i32) -> (i32, i32) {
    %c2_i32 = arith.constant 2 : i32
    %0 = arith.addi %arg0, %c2_i32 : i32
    %c0_i32 = arith.constant 0 : i32
    %c0_i32_0 = arith.constant 0 : i32
    return %c0_i32, %0 : i32, i32
  }
  func.func @transform_2(%arg0: i32) -> (i32, i32) {
    %c0_i32 = arith.constant 0 : i32
    %c0_i32_0 = arith.constant 0 : i32
    return %c0_i32, %arg0 : i32, i32
  }
  func.func @transform_3(%arg0: i32) -> (i32, i32) {
    %c0_i32 = arith.constant 0 : i32
    %c0_i32_0 = arith.constant 0 : i32
    %c0_i32_1 = arith.constant 0 : i32
    return %c0_i32, %c0_i32_0 : i32, i32
  }
  func.func @transform_4(%arg0: i32) -> (i32, i32) {
    %c0_i32 = arith.constant 0 : i32
    %c0_i32_0 = arith.constant 0 : i32
    %c0_i32_1 = arith.constant 0 : i32
    return %c0_i32, %c0_i32_0 : i32, i32
  }
  func.func @transform_5(%arg0: i32) -> (i32, i32) {
    %c0_i32 = arith.constant 0 : i32
    %c0_i32_0 = arith.constant 0 : i32
    %c0_i32_1 = arith.constant 0 : i32
    return %c0_i32, %c0_i32_0 : i32, i32
  }
  func.func @transform_6(%arg0: i32) -> (i32, i32) {
    %c0_i32 = arith.constant 0 : i32
    %c0_i32_0 = arith.constant 0 : i32
    %c0_i32_1 = arith.constant 0 : i32
    return %c0_i32, %c0_i32_0 : i32, i32
  }
  func.func @transform_7(%arg0: i32) -> (i32, i32) {
    %c0_i32 = arith.constant 0 : i32
    %c0_i32_0 = arith.constant 0 : i32
    %c0_i32_1 = arith.constant 0 : i32
    return %c0_i32, %c0_i32_0 : i32, i32
  }
  func.func @transform_8(%arg0: i32) -> (i32, i32) {
    %c0_i32 = arith.constant 0 : i32
    %c0_i32_0 = arith.constant 0 : i32
    %c0_i32_1 = arith.constant 0 : i32
    return %c0_i32, %c0_i32_0 : i32, i32
  }
}

</mosaic_0001>

<bundles_post_ra>
// kernel: tpu_custom_call.1
= control target key start
LH: loop header
LB: loop body
LE: loop exit
PB: predicated region body
PF: predicated region fallthrough
CT: control target
= control target key end

     0   :  { %s16337_s0 = inlined_call_operand.hbm [shape: f32[2,81920], index: 0, kind: input, shape index: {}]   ;;  %s16338_s1 = inlined_call_operand.hbm [shape: f32[2,81920], index: 1, kind: input, shape index: {}]   ;;  %s16339_s2 = inlined_call_operand.hbm [shape: f32[8,40960], index: 2, kind: input, shape index: {}]   ;;  %s16340_s3 = inlined_call_operand.hbm [shape: f32[1,8], index: 3, kind: input, shape index: {}]   ;;  %s16341_s4 = inlined_call_operand.hbm [shape: f32[8,8], index: 4, kind: input, shape index: {}]   ;;  %s16342_s5 = inlined_call_operand.hbm [shape: f32[1,8], index: 5, kind: input, shape index: {}]   ;;  %s16343_s6 = inlined_call_operand.vmem [shape: f32[8,1], index: 6, kind: input, shape index: {}]   ;;  %s16344_s7 = inlined_call_operand.<no memory space> [shape: f32[1,1], index: 7, kind: input, shape index: {}]   ;;  %s16345_s8 = inlined_call_operand.vmem [shape: f32[2,1], index: 8, kind: output, shape index: {}]  }
   0x1   :  { %16355 = sst [smem:[#allocation21_spill]] %s16340_s3  ;;  %v13_v0 = vstv %s16344_s7 }
   0x2   :  { %16356 = sst [smem:[#allocation22_spill]] %s16345_s8  ;;  %14 = vst [vmem:[#allocation3] sm:$0x1] %v13_v0 }
   0x3   :  { %15 = vsyncpa [#allocation5], 0 }
   0x4   :  { %17 = vsyncpa [#allocation5 + $0x1], 0 }
   0x5   :  { %18 = vsyncpa [#allocation7], 0 }
   0x6   :  { %20 = vsyncpa [#allocation7 + $0x1], 0 }
   0x7   :  { %21 = vsyncpa [#allocation10], 0 }
   0x8   :  { %22 = vsyncpa [#allocation13], 0  ;;  %s15437_s29 = smov 0   ;;  %s15439_s30 = smov 0  }
   0x9   :  { %s15441_s9 = smov 0   ;;  %s15443_s10 = smov 0  }
   0xa   :  { %s15445_s11 = smov 0   ;;  %s15447_s12 = smov 0  }
   0xb   :  { %s15449_s7 = smov 0  }
   0xc LB: > { %16357 = sst [smem:[#allocation19_spill]] %s15360_s9  ;;  %s15378_s13 = smov [#allocation9]   ;;  %s15376_s7 = sphi %s15449_s7, %s16393_s7   ;;  %s15372_s12 = sphi %s15447_s12, %s16392_s12   ;;  %s15368_s11 = sphi %s15445_s11, %s16391_s11   ;;  %s15364_s10 = sphi %s15443_s10, %s16390_s10   ;;  %s15360_s9 = sphi %s15441_s9, %s16389_s9   ;;  %s15356_s30 = sphi %s15439_s30, %s16388_s30   ;;  %s15352_s29 = sphi %s15437_s29, %s16387_s29  }
   0xd   : > { %s252_s14 = sshll.u32 %s15378_s13, 4  ;;  %s15473_s15 = sadd.s32 4294967295, %s15376_s7   ;;  %s253_s14 = int_to_ptr.vmem [resolvable:$true] %s252_s14 }
   0xe   : > { %p14580_p0 = scmp.ge.s32.totalorder %s15376_s7, 1  ;;  %p16346_p1 = scmp.eq.s32.totalorder %s15473_s15, 0 }
   0xf   : > { %p239_p2 = scmp.lt.s32.totalorder %s15376_s7, 3  ;;  %s15492_s18 = sadd.s32 1, %s15376_s7  }
  0x10   : > { %s58_s19 = sadd.s32 2, %s15376_s7  ;;  %s16360_s3 = sld [smem:[#allocation21_spill]] }
  0x11   : > { %p15479_p4 = pnand %p14580_p0, %p239_p2 }
  0x13   : > { %s16358_s16 = scalar_select %p15479_p4, 1, 0 }
  0x14   : > { %p14956_p5 = pneg %p15479_p4 }
  0x16   : > { %p15487_p6 = pnand %p14956_p5, %p16346_p1  ;;  %s15127_s22 = scalar_lea.hbm %s16360_s3, 16 }
  0x17   : > { %p15128_p8 = scmp.ne.s32.totalorder %s16360_s3, %s15127_s22  ;;  %p15134_p12 = scmp.lt.u32.totalorder %s15127_s22, %s16360_s3 }
  0x18   : > { %s16359_s17 = scalar_select %p15487_p6, 1, 0 }
  0x19   : > { %p15504_p9 = pneg %p15487_p6 }
  0x1b   : > { %p15130_p10 = pnand %p15504_p9, %p15128_p8 }
  0x1d   : > { %p15131_p11 = pneg %p15130_p10 }
  0x1f   : > { %p15136_p13 = pnand %p15134_p12, %p15131_p11 }
  0x21   : > { %15139 = shalt.err (!%p15136_p13)
}
  0x22   : > { %s15140_s28 = scalar_lea.vmem %s253_s14, 16  ;;  %s15147_s13 = scalar_lea.vmem %s253_s14, 32 }
  0x23   : > { %p15141_p0 = scmp.ne.s32.totalorder %s253_s14, %s15140_s28  ;;  %p15148_p3 = scmp.lt.s32.totalorder %s253_s14, %s253_s14 }
  0x24   : > { %p15149_p1 = scmp.lt.s32.totalorder %s15147_s13, %s15140_s28 }
  0x25   : > { %p15143_p2 = pnand %p15141_p0, %p15504_p9 }
  0x26   : > { %p15150_p7 = por %p15149_p1, %p15148_p3 }
  0x27   : > { %p15144_p5 = pneg %p15143_p2 }
  0x29   : > { %p15151_p4 = pnand %p15150_p7, %p15144_p5 }
  0x2b   : > { %15154 = shalt.err (!%p15151_p4)
}
  0x2c   : > { %14959 = dma.hbm_to_vmem [thread:$0]  (!%p15487_p6), %s16360_s3, 16, %s253_s14, [#allocation10]  }
  0x2d   : > { %s59_s22 = sadd.s32 2, %s15492_s18  ;;  %s63_s23 = sadd.s32 1, %s15360_s9 }
  0x2e   : > { %s60_s24 = ssub.s32 %s58_s19, %s59_s22  ;;  %p70_p1 = scmp.ne.s32.totalorder %s15360_s9, %s15356_s30 }
  0x2f   : > { %p61_p3 = scmp.eq.s32.totalorder %s60_s24, 0  ;;  %p76_p4 = scmp.ne.s32.totalorder %s15356_s30, %s15352_s29 }
  0x30   : > { %p16362_p7 = scmp.eq.s32.totalorder %s15376_s7, 0  ;;  %p16350_p10 = scmp.lt.s32.totalorder %s15376_s7, 2 }
  0x31   : > { %s15530_s26 = scalar_select %p61_p3, %s15360_s9, %s63_s23  }
  0x32   : > { %p72_p8 = por %p70_p1, %p16362_p7  ;;  %p16364_p11 = scmp.eq.s32.totalorder %s15473_s15, 0 }
  0x33   : > { %16363 = sst [smem:[#allocation20_spill]] %s15530_s26  ;;  %s16348_s28 = smul.u32 5120, %s15376_s7 }
  0x34   : > { %p15534_p12 = por %p76_p4, %p16364_p11  ;;  %s310_s13 = sand.u32 1, %s15376_s7  }
  0x35   : > { %s312_s14 = sand.u32 1, %s15360_s9   ;;  %s14495_s22 = scalar_lea.hbm %s16338_s1, %s16348_s28 }
  0x36   : > { %s16365_s27 = scalar_select %p15534_p12, 1, 0 }
  0x37   : > { %s14933_s20 = smul.u32 320, %s312_s14  ;;  %p15548_p13 = pnand %p16350_p10, %p72_p8 }
  0x38   : > { %s15552_s23 = scalar_lea.hbm %s14495_s22, 10240  ;;  %s15556_s14 = scalar_lea.sflag [#allocation7], %s310_s13 }
  0x39   : > { %s314_s24 = scalar_lea.vmem [#allocation6], %s14933_s20  ;;  %s15185_s21 = scalar_lea.hbm %s14495_s22, 15360 }
  0x3a   : > { %s323_s3 = sshll.u32 %s314_s24, 4  ;;  %p15156_p0 = scmp.ne.s32.totalorder %s15552_s23, %s15185_s21  ;;  %s15554_s3 = int_to_ptr.vmem [resolvable:$true] %s323_s3 }
  0x3b   : > { %p15157_p2 = pneg %p15548_p13  ;;  %s15160_s26 = scalar_lea.hbm %s16338_s1, 20480 }
  0x3c   : > { %p15161_p3 = scmp.lt.u32.totalorder %s15552_s23, %s16338_s1  ;;  %p15162_p4 = scmp.lt.u32.totalorder %s15160_s26, %s15185_s21 }
  0x3d   : > { %p15158_p5 = pnand %p15157_p2, %p15156_p0  ;;  %p15164_p8 = scmp.lt.u32.totalorder %s15185_s21, %s15552_s23 }
  0x3e   : > { %p15163_p7 = por %p15162_p4, %p15161_p3 }
  0x3f   : > { %p15159_p1 = pneg %p15158_p5 }
  0x40   : > { %p15165_p11 = por %p15164_p8, %p15163_p7 }
  0x42   : > { %p15166_p10 = pnand %p15165_p11, %p15159_p1 }
  0x44   : > { %15169 = shalt.err (!%p15166_p10)
}
  0x45   : > { %s15170_s13 = scalar_lea.vmem %s15554_s3, 5120  ;;  %s15379_s28 = smov [#allocation6]  }
  0x46   : > { %p15171_p0 = scmp.ne.s32.totalorder %s15554_s3, %s15170_s13  ;;  %s15175_s20 = sshll.u32 %s15379_s28, 4  ;;  %s15176_s20 = int_to_ptr.vmem [resolvable:$false] %s15175_s20 }
  0x47   : > { %s15177_s8 = scalar_lea.vmem %s15176_s20, 10240  ;;  %p15178_p6 = scmp.lt.s32.totalorder %s15554_s3, %s15176_s20 }
  0x48   : > { %p15173_p5 = pnand %p15171_p0, %p15157_p2  ;;  %p15179_p3 = scmp.lt.s32.totalorder %s15177_s8, %s15170_s13 }
  0x4a   : > { %p15174_p12 = pneg %p15173_p5  ;;  %p15180_p4 = por %p15179_p3, %p15178_p6 }
  0x4c   : > { %p15181_p7 = pnand %p15180_p4, %p15174_p12 }
  0x4e   : > { %15184 = shalt.err (!%p15181_p7)
}
  0x4f   : > { %14972 = dma.hbm_to_vmem [thread:$0]  (!%p15548_p13), %s15552_s23, 5120, %s15554_s3, %s15556_s14  }
  0x50   : > { %s15380_s9 = smov [#allocation11]   ;;  %s15381_s22 = smov [#allocation12]  }
  0x51   : > { %s263_s26 = sshll.u32 %s15380_s9, 4  ;;  %s274_s24 = sshll.u32 %s15381_s22, 4  ;;  %s264_s26 = int_to_ptr.vmem [resolvable:$true] %s263_s26  ;;  %s275_s24 = int_to_ptr.vmem [resolvable:$true] %s274_s24 }
  0x52   : > { %s15186_s28 = scalar_lea.hbm %s16341_s4, 128 }
  0x53   : > { %p15187_p6 = scmp.ne.s32.totalorder %s16341_s4, %s15186_s28  ;;  %p15193_p13 = scmp.lt.u32.totalorder %s15186_s28, %s16341_s4 }
  0x55   : > { %p15189_p10 = pnand %p15187_p6, %p15504_p9 }
  0x57   : > { %p15190_p12 = pneg %p15189_p10 }
  0x59   : > { %p15195_p2 = pnand %p15193_p13, %p15190_p12 }
  0x5b   : > { %15198 = shalt.err (!%p15195_p2)
}
  0x5c   : > { %s15199_s3 = scalar_lea.vmem %s264_s26, 128  ;;  %p15207_p0 = scmp.lt.s32.totalorder %s264_s26, %s264_s26 }
  0x5d   : > { %p15200_p1 = scmp.ne.s32.totalorder %s264_s26, %s15199_s3  ;;  %p15208_p5 = scmp.lt.s32.totalorder %s15199_s3, %s15199_s3 }
  0x5f   : > { %p15202_p8 = pnand %p15200_p1, %p15504_p9  ;;  %p15209_p3 = por %p15208_p5, %p15207_p0 }
  0x61   : > { %p15203_p11 = pneg %p15202_p8 }
  0x63   : > { %p15210_p4 = pnand %p15209_p3, %p15203_p11 }
  0x65   : > { %15213 = shalt.err (!%p15210_p4)
}
  0x66   : > { %p16367_p7 = scmp.ne.s32.totalorder %s16359_s17, 0  ;;  %s15214_s19 = scalar_lea.hbm %s16342_s5, 16 }
  0x67   : > { %p15215_p6 = scmp.ne.s32.totalorder %s16342_s5, %s15214_s19  ;;  %p15221_p13 = scmp.lt.u32.totalorder %s15214_s19, %s16342_s5 }
  0x68   : > { %14962 = dma.hbm_to_vmem [thread:$0]  (!%p16367_p7), %s16341_s4, 128, %s264_s26, [#allocation10]  }
  0x69   : > { %p15217_p10 = pnand %p15215_p6, %p15504_p9 }
  0x6b   : > { %p15218_p12 = pneg %p15217_p10 }
  0x6d   : > { %p15223_p2 = pnand %p15221_p13, %p15218_p12 }
  0x6f   : > { %15226 = shalt.err (!%p15223_p2)
}
  0x70   : > { %s15227_s8 = scalar_lea.vmem %s275_s24, 16  ;;  %s15234_s26 = scalar_lea.vmem %s275_s24, 32 }
  0x71   : > { %p15228_p1 = scmp.ne.s32.totalorder %s275_s24, %s15227_s8  ;;  %p15235_p0 = scmp.lt.s32.totalorder %s275_s24, %s275_s24 }
  0x72   : > { %p15236_p5 = scmp.lt.s32.totalorder %s15234_s26, %s15227_s8 }
  0x73   : > { %p15230_p8 = pnand %p15228_p1, %p15504_p9 }
  0x74   : > { %p15237_p3 = por %p15236_p5, %p15235_p0 }
  0x75   : > { %p15231_p11 = pneg %p15230_p8 }
  0x77   : > { %p15238_p4 = pnand %p15237_p3, %p15231_p11 }
  0x79   : > { %15241 = shalt.err (!%p15238_p4)
}
  0x7a   : > { %14965 = dma.hbm_to_vmem [thread:$0]  (!%p16367_p7), %s16342_s5, 16, %s275_s24, [#allocation13]  }
  0x7b   : > { %s32_s25 = ssub.s32 %s15376_s7, %s15492_s18  ;;  %s35_s17 = sadd.s32 1, %s15372_s12 }
  0x7c   : > { %p33_p9 = scmp.eq.s32.totalorder %s32_s25, 0  ;;  %p42_p6 = scmp.ne.s32.totalorder %s15372_s12, %s15368_s11 }
  0x7d   : > { %p48_p10 = scmp.ne.s32.totalorder %s15368_s11, %s15364_s10  ;;  %p16368_p12 = scmp.eq.s32.totalorder %s15376_s7, 0 }
  0x7e   : > { %s15627_s9 = scalar_select %p33_p9, %s15372_s12, %s35_s17  }
  0x7f   : > { %p44_p13 = por %p16368_p12, %p42_p6  ;;  %p16369_p2 = scmp.eq.s32.totalorder %s15473_s15, 0 }
  0x80   : > { %s15638_s21 = sand.u32 1, %s15372_s12   ;;  %s16371_s19 = smul.u32 5120, %s15376_s7 }
  0x81   : > { %p15633_p1 = por %p16369_p2, %p48_p10  ;;  %s14932_s10 = smul.u32 320, %s15638_s21 }
  0x82   : > { %s15645_s24 = scalar_lea.hbm %s16337_s0, %s16371_s19  ;;  %p16372_p7 = scmp.lt.s32.totalorder %s15376_s7, 2 }
  0x83   : > { %s16370_s22 = scalar_select %p15633_p1, 1, 0 }
  0x84   : > { %p15650_p8 = pnand %p16372_p7, %p44_p13  ;;  %s14601_s8 = smul.u32 20480, %s15376_s7 }
  0x85   : > { %s295_s26 = scalar_lea.vmem [#allocation4], %s14932_s10  ;;  %s292_s23 = scalar_lea.sflag [#allocation5], %s15638_s21 }
  0x86   : > { %s303_s3 = sshll.u32 %s295_s26, 4  ;;  %s15242_s25 = scalar_lea.hbm %s15645_s24, 5120  ;;  %s15656_s3 = int_to_ptr.vmem [resolvable:$true] %s303_s3 }
  0x87   : > { %p15243_p11 = scmp.ne.s32.totalorder %s15645_s24, %s15242_s25  ;;  %p15244_p0 = pneg %p15650_p8 }
  0x88   : > { %s15247_s28 = scalar_lea.hbm %s16337_s0, 20480  ;;  %p15248_p4 = scmp.lt.u32.totalorder %s15645_s24, %s16337_s0 }
  0x89   : > { %p15245_p5 = pnand %p15244_p0, %p15243_p11  ;;  %p15249_p9 = scmp.lt.u32.totalorder %s15247_s28, %s15242_s25 }
  0x8a   : > { %p15251_p10 = scmp.lt.u32.totalorder %s15242_s25, %s15645_s24 }
  0x8b   : > { %p15246_p3 = pneg %p15245_p5  ;;  %p15250_p6 = por %p15249_p9, %p15248_p4 }
  0x8d   : > { %p15252_p12 = por %p15251_p10, %p15250_p6 }
  0x8f   : > { %p15253_p13 = pnand %p15252_p12, %p15246_p3 }
  0x91   : > { %15256 = shalt.err (!%p15253_p13)
}
  0x92   : > { %s15257_s10 = scalar_lea.vmem %s15656_s3, 5120  ;;  %s15382_s26 = smov [#allocation4]  }
  0x93   : > { %p15258_p2 = scmp.ne.s32.totalorder %s15656_s3, %s15257_s10  ;;  %s15262_s17 = sshll.u32 %s15382_s26, 4  ;;  %s15263_s17 = int_to_ptr.vmem [resolvable:$false] %s15262_s17 }
  0x94   : > { %s15264_s29 = scalar_lea.vmem %s15263_s17, 10240  ;;  %p15265_p5 = scmp.lt.s32.totalorder %s15656_s3, %s15263_s17 }
  0x95   : > { %p15260_p7 = pnand %p15258_p2, %p15244_p0  ;;  %p15266_p4 = scmp.lt.s32.totalorder %s15264_s29, %s15257_s10 }
  0x97   : > { %p15261_p11 = pneg %p15260_p7  ;;  %p15267_p9 = por %p15266_p4, %p15265_p5 }
  0x99   : > { %p15268_p6 = pnand %p15267_p9, %p15261_p11 }
  0x9b   : > { %15271 = shalt.err (!%p15268_p6)
}
  0x9c   : > { %14969 = dma.hbm_to_vmem [thread:$0]  (!%p15650_p8), %s15645_s24, 5120, %s15656_s3, %s292_s23  }
  0x9d   : > { %s15689_s28 = scalar_lea.hbm %s16339_s2, %s14601_s8  ;;  %s16374_s13 = smul.u32 1280, %s15638_s21 }
  0x9e   : > { %s15272_s17 = scalar_lea.hbm %s15689_s28, 20480  ;;  %s15277_s3 = scalar_lea.hbm %s16339_s2, 40960 }
  0x9f   : > { %s334_s10 = scalar_lea.vmem [#allocation8], %s16374_s13  ;;  %p15273_p3 = scmp.ne.s32.totalorder %s15689_s28, %s15272_s17 }
  0xa0   : > { %s342_s26 = sshll.u32 %s334_s10, 4  ;;  %p15278_p13 = scmp.lt.u32.totalorder %s15689_s28, %s16339_s2  ;;  %s343_s26 = int_to_ptr.vmem [resolvable:$true] %s342_s26 }
  0xa1   : > { %p15275_p10 = pnand %p15273_p3, %p15244_p0  ;;  %p15279_p2 = scmp.lt.u32.totalorder %s15277_s3, %s15272_s17 }
  0xa2   : > { %p15281_p11 = scmp.lt.u32.totalorder %s15272_s17, %s15689_s28 }
  0xa3   : > { %p15276_p12 = pneg %p15275_p10  ;;  %p15280_p7 = por %p15279_p2, %p15278_p13 }
  0xa5   : > { %p15282_p5 = por %p15281_p11, %p15280_p7 }
  0xa7   : > { %p15283_p4 = pnand %p15282_p5, %p15276_p12 }
  0xa9   : > { %15286 = shalt.err (!%p15283_p4)
}
  0xaa   : > { %s15287_s21 = scalar_lea.vmem %s343_s26, 20480  ;;  %s15383_s29 = smov [#allocation8]  }
  0xab   : > { %p15288_p9 = scmp.ne.s32.totalorder %s343_s26, %s15287_s21  ;;  %s15292_s25 = sshll.u32 %s15383_s29, 4  ;;  %s15293_s25 = int_to_ptr.vmem [resolvable:$false] %s15292_s25 }
  0xac   : > { %s15294_s19 = scalar_lea.vmem %s15293_s25, 40960  ;;  %p15295_p10 = scmp.lt.s32.totalorder %s343_s26, %s15293_s25 }
  0xad   : > { %p15290_p6 = pnand %p15288_p9, %p15244_p0  ;;  %p15296_p1 = scmp.lt.s32.totalorder %s15294_s19, %s15287_s21 }
  0xaf   : > { %p15291_p3 = pneg %p15290_p6  ;;  %p15297_p2 = por %p15296_p1, %p15295_p10 }
  0xb1   : > { %p15298_p13 = pnand %p15297_p2, %p15291_p3 }
  0xb3   : > { %15301 = shalt.err (!%p15298_p13)
}
  0xb4   : > { %14975 = dma.hbm_to_vmem [thread:$0]  (!%p15650_p8), %s15689_s28, 20480, %s343_s26, %s15556_s14  }
  0xb5   : > { %p16375_p12 = scmp.ne.s32.totalorder %s16358_s16, 0 }
  0xb6   : > { %s353_s13 = sand.u32 (!%p16375_p12), 1, %s15368_s11   ;;  %p16376_p0 = scmp.ne.s32.totalorder (!%p16375_p12), %s16370_s22, 0 }
  0xb7   : > { %351 = sbr.rel (%p16375_p12) target bundleno = 1639 (0x667), region = 52  ;;  %s354_s17 = scalar_lea.sflag (!%p16375_p12), [#allocation5], %s353_s13 }
  0xb8   : > { %s14935_s10 = smul.u32 (!%p16375_p12), 320, %s353_s13 }
  0xba   : > { %s15716_s7 = scalar_lea.vmem (!%p16375_p12), [#allocation4], %s14935_s10 }
  0xbe   : > { %15331 = dma.done.wait (%p16376_p0), %s354_s17, 5120  }
  0xbf   : > { %15333 = vsyncadd (%p16376_p0), %s354_s17, 4294962176  ;;  %s362_s20 = sand.u32 1, %s15473_s15   ;;  %s364_s14 = sand.u32 1, %s15356_s30  }
  0xc0   : > { %s14936_s28 = smul.u32 320, %s364_s14  ;;  %s363_s16 = scalar_lea.sflag [#allocation7], %s362_s20 }
  0xc1   : > { %p16377_p1 = scmp.ne.s32.totalorder %s16365_s27, 0 }
  0xc2   : > { %s15724_s26 = scalar_lea.vmem [#allocation6], %s14936_s28 }
  0xc3   : > { %15335 = dma.done.wait (%p16377_p1), %s363_s16, 5120  }
  0xc4   : > { %15337 = vsyncadd (%p16377_p1), %s363_s16, 4294962176  ;;  %s14937_s24 = smul.u32 1280, %s353_s13 }
  0xc6   : > { %s15730_s3 = scalar_lea.vmem [#allocation8], %s14937_s24 }
  0xc7   : > { %15339 = dma.done.wait (%p16376_p0), %s363_s16, 20480  }
  0xc8   : > { %15341 = vsyncadd (%p16376_p0), %s363_s16, 4294946816  ;;  %p16378_p8 = scmp.eq.s32.totalorder %s15473_s15, 0 }
  0xca   : > { %15343 = dma.done.wait (%p16378_p8), [#allocation10], 144   ;;  %p16379_p7 = pmov %p16378_p8 }
  0xcc   : > { %15345 = vsyncadd (%p16379_p7), [#allocation10], 4294967152  ;;  %p16380_p11 = pmov %p16379_p7 }
  0xcd   : > { %p16381_p5 = pmov %p16379_p7 }
  0xce   : > { %15347 = dma.done.wait (%p16380_p11), [#allocation13], 16  }
  0xcf   : > { %15349 = vsyncadd (%p16381_p5), [#allocation13], 4294967280  ;;  %p16382_p4 = scmp.ne.s32.totalorder %s15473_s15, 0 }
  0xd0   : > { %vm433_vm0 = vcmask (!%p16382_p4), 58368   ;;  %v15384_v1 = vmov (!%p16382_p4), 0.0  }
  0xd1   : > { %432 = sbr.rel (%p16382_p4) target bundleno = 216 (0xd8), region = 80  ;;  %434 = vst.msk [vmem:[#allocation2] sm:$0x3] (!%p16382_p4), %vm433_vm0, %v15384_v1 }
  0xd8 PF: > { %v7156_v2 = vld [vmem:[%s15730_s3 + $0x8] sm:$0xf0]  ;;  %v476_v3 = vld [vmem:[%s15730_s3 + $0x8] sm:$0xf]  ;;  %v7155_v4 = vld [vmem:[%s15730_s3] sm:$0xf0]  ;;  %v679_v5 = vlaneseq }
  0xd9   : > { %v8356_v6 = vrot.slane %v7156_v2, 4  ;;  %1515 = vmatprep.subr.mxu0 %v476_v3  ;;  %v8355_v7 = vrot.slane %v7155_v4, 4  ;;  %v475_v8 = vld [vmem:[%s15730_s3] sm:$0xf]  ;;  %v7158_v9 = vld [vmem:[%s15730_s3 + $0x18] sm:$0xf0] }
  0xda   : > { %1516 = vmatpush1.xpose.msra.mxu0 %v475_v8  ;;  %v15385_v10 = vmov 1983009808   ;;  %v680_v12 = vshrl.u32 %v679_v5, 7  ;;  %v8358_v13 = vrot.slane %v7158_v9, 4  ;;  %v478_v14 = vld [vmem:[%s15730_s3 + $0x18] sm:$0xf] }
  0xdb   : > { %8675 = vmatprep.subr.mxu1 %v8356_v6  ;;  %v677_v11 = vunpack.c.l.s4 %v15385_v10  ;;  %v435_v15 = vld [vmem:[%s15716_s7] sm:$0xff]  ;;  %1585 = vmatprep.subr.mxu0 %v478_v14  ;;  %v7157_v21 = vld [vmem:[%s15730_s3 + $0x10] sm:$0xf0]  ;;  %v7160_v26 = vld [vmem:[%s15730_s3 + $0x28] sm:$0xf0]  ;;  %s15386_s27 = smov 4  }
  0xdc   : > { %8676 = vmatpush1.xpose.msra.mxu1 %v8355_v7  ;;  %v7115_v16 = vld [vmem:[%s15724_s26] sm:$0xff]  ;;  %v675_v17 = vcombine.high %v435_v15, %v435_v15  ;;  %v8357_v29 = vrot.slane %v7157_v21, 4  ;;  %v477_v30 = vld [vmem:[%s15730_s3 + $0x10] sm:$0xf]  ;;  %v8360_v33 = vrot.slane %v7160_v26, 4  ;;  %v436_v34 = vld [vmem:[%s15716_s7 + $0x8] sm:$0xff] }
  0xdd   : > { %v678_v18 = vunpack.c.0.s8 %v677_v11  ;;  %v7355_v19 = vcombine.high %v7115_v16, %v7115_v16  ;;  %8745 = vmatprep.subr.mxu1 %v8358_v13  ;;  %v7116_v35 = vld [vmem:[%s15724_s26 + $0x8] sm:$0xff]  ;;  %v7159_v37 = vld [vmem:[%s15730_s3 + $0x20] sm:$0xf0]  ;;  %v7162_v40 = vld [vmem:[%s15730_s3 + $0x38] sm:$0xf0]  ;;  %v692_v45 = vcombine.high %v436_v34, %v436_v34  ;;  %vm14280_vm1 = vcmask 31744  }
  0xde   : > { %v480_v36 = vld [vmem:[%s15730_s3 + $0x28] sm:$0xf]  ;;  %v8359_v41 = vrot.slane %v7159_v37, 4  ;;  %v479_v42 = vld [vmem:[%s15730_s3 + $0x20] sm:$0xf]  ;;  %v7372_v46 = vcombine.high %v7116_v35, %v7116_v35  ;;  %v8362_v47 = vrot.slane %v7162_v40, 4 }
  0xdf   : > { %v15754_v20 = vsub.s32 %v678_v18, %v680_v12  ;;  %v482_v48 = vld [vmem:[%s15730_s3 + $0x38] sm:$0xf]  ;;  %v7161_v49 = vld [vmem:[%s15730_s3 + $0x30] sm:$0xf0]  ;;  %v7164_v52 = vld [vmem:[%s15730_s3 + $0x48] sm:$0xf0] }
  0xe0   : > { %v8361_v53 = vrot.slane %v7161_v49, 4  ;;  %v481_v54 = vld [vmem:[%s15730_s3 + $0x30] sm:$0xf]  ;;  %v8364_v57 = vrot.slane %v7164_v52, 4  ;;  %v484_v60 = vld [vmem:[%s15730_s3 + $0x48] sm:$0xf] }
  0xe1   : > { %v682_v22 = vrot.slane %v435_v15, %v15754_v20  ;;  %v7362_v23 = vrot.slane %v7115_v16, %v15754_v20  ;;  %v689_v24 = vrot.slane %v675_v17, %v15754_v20  ;;  %v7369_v25 = vrot.slane %v7355_v19, %v15754_v20  ;;  %v437_v58 = vld [vmem:[%s15716_s7 + $0x10] sm:$0xff]  ;;  %v7163_v61 = vld [vmem:[%s15730_s3 + $0x40] sm:$0xf0]  ;;  %v7166_v0 = vld [vmem:[%s15730_s3 + $0x58] sm:$0xf0]  ;;  %p14592_p9 = scmp.ne.s32.totalorder %s15473_s15, 1 }
  0xe2   : > { %v699_v38 = vrot.slane %v436_v34, %v15754_v20  ;;  %v7379_v39 = vrot.slane %v7116_v35, %v15754_v20  ;;  %v706_v50 = vrot.slane %v692_v45, %v15754_v20  ;;  %v7386_v51 = vrot.slane %v7372_v46, %v15754_v20  ;;  %v7117_v59 = vld [vmem:[%s15724_s26 + $0x10] sm:$0xff]  ;;  %v483_v2 = vld [vmem:[%s15730_s3 + $0x40] sm:$0xf]  ;;  %v486_v8 = vld [vmem:[%s15730_s3 + $0x58] sm:$0xf]  ;;  %s16383_s21 = sld [smem:[#allocation22_spill]] (!%p14592_p9) }
  0xe3   : > { %v690_v27 = vcombine.high %v682_v22, %v682_v22  ;;  %v7370_v28 = vcombine.high %v7362_v23, %v7362_v23  ;;  %v691_v31 = vcombine.high %v689_v24, %v689_v24  ;;  %v7371_v32 = vcombine.high %v7369_v25, %v7369_v25  ;;  %v7165_v9 = vld [vmem:[%s15730_s3 + $0x50] sm:$0xf0]  ;;  %v7168_v12 = vld [vmem:[%s15730_s3 + $0x68] sm:$0xf0]  ;;  %v485_v14 = vld [vmem:[%s15730_s3 + $0x50] sm:$0xf] }
  0xe4   : > { %v707_v43 = vcombine.high %v699_v38, %v699_v38  ;;  %v7387_v44 = vcombine.high %v7379_v39, %v7379_v39  ;;  %v708_v55 = vcombine.high %v706_v50, %v706_v50  ;;  %v7388_v56 = vcombine.high %v7386_v51, %v7386_v51  ;;  %v438_v18 = vld [vmem:[%s15716_s7 + $0x18] sm:$0xff]  ;;  %v488_v21 = vld [vmem:[%s15730_s3 + $0x68] sm:$0xf]  ;;  %v7169_v34 = vld [vmem:[%s15730_s3 + $0x70] sm:$0xf0] }
  0xe5   : > { %1579 = vmatprep.mubr.f32.mxu0 %v690_v27  ;;  %8739 = vmatprep.mubr.f32.mxu1 %v7370_v28  ;;  %v716_v62 = vrot.slane %v437_v58, %v15754_v20  ;;  %v7396_v63 = vrot.slane %v7117_v59, %v15754_v20  ;;  %v8363_v1 = vrot.slane %v7163_v61, 4  ;;  %v709_v5 = vcombine.high %v437_v58, %v437_v58  ;;  %v7118_v19 = vld [vmem:[%s15724_s26 + $0x18] sm:$0xff]  ;;  %v487_v27 = vld [vmem:[%s15730_s3 + $0x60] sm:$0xf]  ;;  %v7172_v37 = vld [vmem:[%s15730_s3 + $0x88] sm:$0xf0] }
  0xe6   : > { %1580 = vmatmul.mubr.f32.vlgmr.msra.gmra.mrb[0].mxu0 %v682_v22  ;;  %8740 = vmatmul.mubr.f32.vlgmr.msra.gmra.mrb[0].mxu1 %v7362_v23  ;;  %v7389_v6 = vcombine.high %v7117_v59, %v7117_v59  ;;  %v8366_v7 = vrot.slane %v7166_v0, 4  ;;  %v8365_v13 = vrot.slane %v7165_v9, 4  ;;  %v8368_v17 = vrot.slane %v7168_v12, 4  ;;  %v7167_v22 = vld [vmem:[%s15730_s3 + $0x60] sm:$0xf0] }
  0xe7   : > { %8746 = vmatpush1.xpose.msra.mxu1 %v8357_v29  ;;  %1586 = vmatpush1.xpose.msra.mxu0 %v477_v30  ;;  %v724_v3 = vcombine.high %v716_v62, %v716_v62  ;;  %v7404_v4 = vcombine.high %v7396_v63, %v7396_v63  ;;  %v723_v10 = vrot.slane %v709_v5, %v15754_v20  ;;  %v8367_v26 = vrot.slane %v7167_v22, 4  ;;  %v492_v45 = vld [vmem:[%s15730_s3 + $0x88] sm:$0xf]  ;;  %v7171_v46 = vld [vmem:[%s15730_s3 + $0x80] sm:$0xf0] }
  0xe8   : > { %1649 = vmatprep.mubr.f32.mxu0 %v691_v31  ;;  %8809 = vmatprep.mubr.f32.mxu1 %v7371_v32  ;;  %v7403_v11 = vrot.slane %v7389_v6, %v15754_v20  ;;  %v733_v23 = vrot.slane %v438_v18, %v15754_v20  ;;  %v726_v30 = vcombine.high %v438_v18, %v438_v18  ;;  %v7174_v49 = vld [vmem:[%s15730_s3 + $0x98] sm:$0xf0]  ;;  %v7173_v58 = vld [vmem:[%s15730_s3 + $0x90] sm:$0xf0]  ;;  %v7176_v61 = vld [vmem:[%s15730_s3 + $0xa8] sm:$0xf0] }
  0xe9   : > { %8815 = vmatprep.subr.mxu1 %v8360_v33  ;;  %1655 = vmatprep.subr.mxu0 %v480_v36  ;;  %v725_v15 = vcombine.high %v723_v10, %v723_v10  ;;  %v7406_v31 = vcombine.high %v7118_v19, %v7118_v19  ;;  %v490_v33 = vld [vmem:[%s15730_s3 + $0x78] sm:$0xf]  ;;  %v496_v5 = vld [vmem:[%s15730_s3 + $0xa8] sm:$0xf]  ;;  %v7175_v6 = vld [vmem:[%s15730_s3 + $0xa0] sm:$0xf0] }
  0xea   : > { %v7405_v16 = vcombine.high %v7403_v11, %v7403_v11  ;;  %v741_v28 = vcombine.high %v733_v23, %v733_v23  ;;  %v740_v35 = vrot.slane %v726_v30, %v15754_v20  ;;  %v7178_v9 = vld [vmem:[%s15730_s3 + $0xb8] sm:$0xf0]  ;;  %v7177_v18 = vld [vmem:[%s15730_s3 + $0xb0] sm:$0xf0]  ;;  %v7180_v22 = vld [vmem:[%s15730_s3 + $0xc8] sm:$0xf0] }
  0xeb   : > { %v7420_v36 = vrot.slane %v7406_v31, %v15754_v20  ;;  %v500_v30 = vld [vmem:[%s15730_s3 + $0xc8] sm:$0xf]  ;;  %v7179_v31 = vld [vmem:[%s15730_s3 + $0xc0] sm:$0xf0]  ;;  %vm14283_vm2 = vcmask 58368   ;;  %vm15388_vm3 = vmmov (!%p14592_p9), 0  }
  0xec   : > { %v742_v40 = vcombine.high %v740_v35, %v740_v35  ;;  %vm14308_vm4 = vcmask (!%p14592_p9), 64512   ;;  %vm14465_vm5 = vcmask (!%p14592_p9), 1024  }
  0xee   : > { %1650 = vmatmul.mubr.f32.vlgmr.msra.gmra.mrb[0].mxu0 %v689_v24  ;;  %8810 = vmatmul.mubr.f32.vlgmr.msra.gmra.mrb[0].mxu1 %v7369_v25  ;;  %v7413_v24 = vrot.slane %v7118_v19, %v15754_v20  ;;  %v7170_v25 = vld [vmem:[%s15730_s3 + $0x78] sm:$0xf0] }
  0xef   : > { %8816 = vmatpush1.xpose.msra.mxu1 %v8359_v41  ;;  %1656 = vmatpush1.xpose.msra.mxu0 %v479_v42  ;;  %v8370_v32 = vrot.slane %v7170_v25, 4  ;;  %v7422_v41 = vcombine.high %v7420_v36, %v7420_v36  ;;  %v8372_v42 = vrot.slane %v7172_v37, 4 }
  0xf0   : > { %1719 = vmatprep.mubr.f32.mxu0 %v707_v43  ;;  %8879 = vmatprep.mubr.f32.mxu1 %v7387_v44  ;;  %v7421_v29 = vcombine.high %v7413_v24, %v7413_v24  ;;  %v439_v43 = vld [vmem:[%s15716_s7 + $0x20] sm:$0xff] }
  0xf1   : > { %8885 = vmatprep.subr.mxu1 %v8362_v47  ;;  %1725 = vmatprep.subr.mxu0 %v482_v48  ;;  %v7119_v44 = vld [vmem:[%s15724_s26 + $0x20] sm:$0xff]  ;;  %v750_v47 = vrot.slane %v439_v43, %v15754_v20 }
  0xf2   : > { %v7430_v48 = vrot.slane %v7119_v44, %v15754_v20 }
  0xf3   : > { %v758_v52 = vcombine.high %v750_v47, %v750_v47 }
  0xf6   : > { %1720 = vmatmul.mubr.f32.vlgmr.msra.gmra.mrb[0].mxu0 %v699_v38  ;;  %8880 = vmatmul.mubr.f32.vlgmr.msra.gmra.mrb[0].mxu1 %v7379_v39  ;;  %v8369_v38 = vrot.slane %v7169_v34, 4  ;;  %v489_v39 = vld [vmem:[%s15730_s3 + $0x70] sm:$0xf]  ;;  %v7182_v34 = vld [vmem:[%s15730_s3 + $0xd8] sm:$0xf0] }
  0xf7   : > { %8886 = vmatpush1.xpose.msra.mxu1 %v8361_v53  ;;  %1726 = vmatpush1.xpose.msra.mxu0 %v481_v54  ;;  %v7438_v53 = vcombine.high %v7430_v48, %v7430_v48  ;;  %v743_v54 = vcombine.high %v439_v43, %v439_v43  ;;  %v7181_v43 = vld [vmem:[%s15730_s3 + $0xd0] sm:$0xf0] }
  0xf8   : > { %1789 = vmatprep.mubr.f32.mxu0 %v708_v55  ;;  %8949 = vmatprep.mubr.f32.mxu1 %v7388_v56  ;;  %v7423_v55 = vcombine.high %v7119_v44, %v7119_v44  ;;  %v8374_v56 = vrot.slane %v7174_v49, 4 }
  0xf9   : > { %8955 = vmatprep.subr.mxu1 %v8364_v57  ;;  %1795 = vmatprep.subr.mxu0 %v484_v60  ;;  %v494_v57 = vld [vmem:[%s15730_s3 + $0x98] sm:$0xf]  ;;  %v757_v59 = vrot.slane %v743_v54, %v15754_v20  ;;  %v504_v54 = vld [vmem:[%s15730_s3 + $0xe8] sm:$0xf] }
  0xfa   : > { %v7437_v60 = vrot.slane %v7423_v55, %v15754_v20  ;;  %v7183_v55 = vld [vmem:[%s15730_s3 + $0xe0] sm:$0xf0] }
  0xfb   : > { %v759_v0 = vcombine.high %v757_v59, %v757_v59 }
  0xfe   : > { %1790 = vmatmul.mubr.f32.vlgmr.msra.gmra.mrb[0].mxu0 %v706_v50  ;;  %8950 = vmatmul.mubr.f32.vlgmr.msra.gmra.mrb[0].mxu1 %v7386_v51  ;;  %v8371_v50 = vrot.slane %v7171_v46, 4  ;;  %v491_v51 = vld [vmem:[%s15730_s3 + $0x80] sm:$0xf]  ;;  %v7184_v46 = vld [vmem:[%s15730_s3 + $0xe8] sm:$0xf0] }
  0xff   : > { %8956 = vmatpush1.xpose.msra.mxu1 %v8363_v1  ;;  %1796 = vmatpush1.xpose.msra.mxu0 %v483_v2  ;;  %v7439_v1 = vcombine.high %v7437_v60, %v7437_v60  ;;  %v8376_v2 = vrot.slane %v7176_v61, 4 }
 0x100   : > { %1859 = vmatprep.mubr.f32.mxu0 %v724_v3  ;;  %9019 = vmatprep.mubr.f32.mxu1 %v7404_v4  ;;  %v440_v3 = vld [vmem:[%s15716_s7 + $0x28] sm:$0xff] }
 0x101   : > { %9025 = vmatprep.subr.mxu1 %v8366_v7  ;;  %1865 = vmatprep.subr.mxu0 %v486_v8  ;;  %v7120_v4 = vld [vmem:[%s15724_s26 + $0x28] sm:$0xff]  ;;  %v767_v7 = vrot.slane %v440_v3, %v15754_v20 }
 0x102   : > { %v7447_v8 = vrot.slane %v7120_v4, %v15754_v20 }
 0x103   : > { %v775_v12 = vcombine.high %v767_v7, %v767_v7 }
 0x106   : > { %1860 = vmatmul.mubr.f32.vlgmr.msra.gmra.mrb[0].mxu0 %v716_v62  ;;  %9020 = vmatmul.mubr.f32.vlgmr.msra.gmra.mrb[0].mxu1 %v7396_v63  ;;  %v8373_v62 = vrot.slane %v7173_v58, 4  ;;  %v493_v63 = vld [vmem:[%s15730_s3 + $0x90] sm:$0xf]  ;;  %v7186_v58 = vld [vmem:[%s15730_s3 + $0xf8] sm:$0xf0] }
 0x107   : > { %9026 = vmatpush1.xpose.msra.mxu1 %v8365_v13  ;;  %1866 = vmatpush1.xpose.msra.mxu0 %v485_v14  ;;  %v7455_v13 = vcombine.high %v7447_v8, %v7447_v8  ;;  %v760_v14 = vcombine.high %v440_v3, %v440_v3  ;;  %v7185_v3 = vld [vmem:[%s15730_s3 + $0xf0] sm:$0xf0] }
 0x108   : > { %1929 = vmatprep.mubr.f32.mxu0 %v725_v15  ;;  %9089 = vmatprep.mubr.f32.mxu1 %v7405_v16  ;;  %v7440_v15 = vcombine.high %v7120_v4, %v7120_v4  ;;  %v8378_v16 = vrot.slane %v7178_v9, 4 }
 0x109   : > { %9095 = vmatprep.subr.mxu1 %v8368_v17  ;;  %1935 = vmatprep.subr.mxu0 %v488_v21  ;;  %v498_v17 = vld [vmem:[%s15730_s3 + $0xb8] sm:$0xf]  ;;  %v774_v19 = vrot.slane %v760_v14, %v15754_v20  ;;  %v508_v14 = vld [vmem:[%s15730_s3 + $0x108] sm:$0xf] }
 0x10a   : > { %v7454_v21 = vrot.slane %v7440_v15, %v15754_v20  ;;  %v7187_v15 = vld [vmem:[%s15730_s3 + $0x100] sm:$0xf0] }
 0x10b   : > { %v776_v25 = vcombine.high %v774_v19, %v774_v19 }
 0x10e   : > { %1930 = vmatmul.mubr.f32.vlgmr.msra.gmra.mrb[0].mxu0 %v723_v10  ;;  %9090 = vmatmul.mubr.f32.vlgmr.msra.gmra.mrb[0].mxu1 %v7403_v11  ;;  %v8375_v10 = vrot.slane %v7175_v6, 4  ;;  %v495_v11 = vld [vmem:[%s15730_s3 + $0xa0] sm:$0xf]  ;;  %v7188_v6 = vld [vmem:[%s15730_s3 + $0x108] sm:$0xf0] }
 0x10f   : > { %9096 = vmatpush1.xpose.msra.mxu1 %v8367_v26  ;;  %1936 = vmatpush1.xpose.msra.mxu0 %v487_v27  ;;  %v7456_v26 = vcombine.high %v7454_v21, %v7454_v21  ;;  %v8380_v27 = vrot.slane %v7180_v22, 4 }
 0x110   : > { %1999 = vmatprep.mubr.f32.mxu0 %v741_v28  ;;  %9159 = vmatprep.mubr.f32.mxu1 %v7421_v29  ;;  %v441_v28 = vld [vmem:[%s15716_s7 + $0x30] sm:$0xff] }
 0x111   : > { %9165 = vmatprep.subr.mxu1 %v8370_v32  ;;  %2005 = vmatprep.subr.mxu0 %v490_v33  ;;  %v7121_v29 = vld [vmem:[%s15724_s26 + $0x30] sm:$0xff]  ;;  %v784_v32 = vrot.slane %v441_v28, %v15754_v20 }
 0x112   : > { %v7464_v33 = vrot.slane %v7121_v29, %v15754_v20 }
 0x113   : > { %v792_v37 = vcombine.high %v784_v32, %v784_v32 }
 0x116   : > { %2000 = vmatmul.mubr.f32.vlgmr.msra.gmra.mrb[0].mxu0 %v733_v23  ;;  %9160 = vmatmul.mubr.f32.vlgmr.msra.gmra.mrb[0].mxu1 %v7413_v24  ;;  %v8377_v23 = vrot.slane %v7177_v18, 4  ;;  %v497_v24 = vld [vmem:[%s15730_s3 + $0xb0] sm:$0xf]  ;;  %v7190_v18 = vld [vmem:[%s15730_s3 + $0x118] sm:$0xf0] }
 0x117   : > { %9166 = vmatpush1.xpose.msra.mxu1 %v8369_v38  ;;  %2006 = vmatpush1.xpose.msra.mxu0 %v489_v39  ;;  %v7472_v38 = vcombine.high %v7464_v33, %v7464_v33  ;;  %v777_v39 = vcombine.high %v441_v28, %v441_v28  ;;  %v7189_v28 = vld [vmem:[%s15730_s3 + $0x110] sm:$0xf0] }
 0x118   : > { %2069 = vmatprep.mubr.f32.mxu0 %v742_v40  ;;  %9229 = vmatprep.mubr.f32.mxu1 %v7422_v41  ;;  %v7457_v40 = vcombine.high %v7121_v29, %v7121_v29  ;;  %v8382_v41 = vrot.slane %v7182_v34, 4 }
 0x119   : > { %9235 = vmatprep.subr.mxu1 %v8372_v42  ;;  %2075 = vmatprep.subr.mxu0 %v492_v45  ;;  %v502_v42 = vld [vmem:[%s15730_s3 + $0xd8] sm:$0xf]  ;;  %v791_v44 = vrot.slane %v777_v39, %v15754_v20  ;;  %v512_v39 = vld [vmem:[%s15730_s3 + $0x128] sm:$0xf] }
 0x11a   : > { %v7471_v45 = vrot.slane %v7457_v40, %v15754_v20  ;;  %v7191_v40 = vld [vmem:[%s15730_s3 + $0x120] sm:$0xf0] }
 0x11b   : > { %v793_v49 = vcombine.high %v791_v44, %v791_v44 }
 0x11e   : > { %2070 = vmatmul.mubr.f32.vlgmr.msra.gmra.mrb[0].mxu0 %v740_v35  ;;  %9230 = vmatmul.mubr.f32.vlgmr.msra.gmra.mrb[0].mxu1 %v7420_v36  ;;  %v8379_v35 = vrot.slane %v7179_v31, 4  ;;  %v499_v36 = vld [vmem:[%s15730_s3 + $0xc0] sm:$0xf]  ;;  %v7192_v31 = vld [vmem:[%s15730_s3 + $0x128] sm:$0xf0] }
 0x11f   : > { %9236 = vmatpush1.xpose.msra.mxu1 %v8371_v50  ;;  %2076 = vmatpush1.xpose.msra.mxu0 %v491_v51  ;;  %v7473_v50 = vcombine.high %v7471_v45, %v7471_v45  ;;  %v8384_v51 = vrot.slane %v7184_v46, 4 }
 0x120   : > { %2139 = vmatprep.mubr.f32.mxu0 %v758_v52  ;;  %9299 = vmatprep.mubr.f32.mxu1 %v7438_v53  ;;  %v442_v52 = vld [vmem:[%s15716_s7 + $0x38] sm:$0xff] }
 0x121   : > { %9305 = vmatprep.subr.mxu1 %v8374_v56  ;;  %2145 = vmatprep.subr.mxu0 %v494_v57  ;;  %v7122_v53 = vld [vmem:[%s15724_s26 + $0x38] sm:$0xff]  ;;  %v801_v56 = vrot.slane %v442_v52, %v15754_v20 }
 0x122   : > { %v7481_v57 = vrot.slane %v7122_v53, %v15754_v20 }
 0x123   : > { %v809_v61 = vcombine.high %v801_v56, %v801_v56 }
 0x126   : > { %2140 = vmatmul.mubr.f32.vlgmr.msra.gmra.mrb[0].mxu0 %v750_v47  ;;  %9300 = vmatmul.mubr.f32.vlgmr.msra.gmra.mrb[0].mxu1 %v7430_v48  ;;  %v8381_v47 = vrot.slane %v7181_v43, 4  ;;  %v501_v48 = vld [vmem:[%s15730_s3 + $0xd0] sm:$0xf]  ;;  %v7194_v43 = vld [vmem:[%s15730_s3 + $0x138] sm:$0xf0] }
 0x127   : > { %9306 = vmatpush1.xpose.msra.mxu1 %v8373_v62  ;;  %2146 = vmatpush1.xpose.msra.mxu0 %v493_v63  ;;  %v7489_v62 = vcombine.high %v7481_v57, %v7481_v57  ;;  %v794_v63 = vcombine.high %v442_v52, %v442_v52  ;;  %v7193_v52 = vld [vmem:[%s15730_s3 + $0x130] sm:$0xf0] }
 0x128   : > { %2209 = vmatprep.mubr.f32.mxu0 %v759_v0  ;;  %9369 = vmatprep.mubr.f32.mxu1 %v7439_v1  ;;  %v7474_v0 = vcombine.high %v7122_v53, %v7122_v53  ;;  %v8386_v1 = vrot.slane %v7186_v58, 4 }
 0x129   : > { %9375 = vmatprep.subr.mxu1 %v8376_v2  ;;  %2215 = vmatprep.subr.mxu0 %v496_v5  ;;  %v506_v2 = vld [vmem:[%s15730_s3 + $0xf8] sm:$0xf]  ;;  %v808_v4 = vrot.slane %v794_v63, %v15754_v20  ;;  %v516_v63 = vld [vmem:[%s15730_s3 + $0x148] sm:$0xf] }
 0x12a   : > { %v7488_v5 = vrot.slane %v7474_v0, %v15754_v20  ;;  %v7195_v0 = vld [vmem:[%s15730_s3 + $0x140] sm:$0xf0] }
 0x12b   : > { %v810_v9 = vcombine.high %v808_v4, %v808_v4 }
 0x12e   : > { %2210 = vmatmul.mubr.f32.vlgmr.msra.gmra.mrb[0].mxu0 %v757_v59  ;;  %9370 = vmatmul.mubr.f32.vlgmr.msra.gmra.mrb[0].mxu1 %v7437_v60  ;;  %v8383_v59 = vrot.slane %v7183_v55, 4  ;;  %v503_v60 = vld [vmem:[%s15730_s3 + $0xe0] sm:$0xf]  ;;  %v7196_v55 = vld [vmem:[%s15730_s3 + $0x148] sm:$0xf0] }
 0x12f   : > { %9376 = vmatpush1.xpose.msra.mxu1 %v8375_v10  ;;  %2216 = vmatpush1.xpose.msra.mxu0 %v495_v11  ;;  %v7490_v10 = vcombine.high %v7488_v5, %v7488_v5  ;;  %v8388_v11 = vrot.slane %v7188_v6, 4 }
 0x130   : > { %2279 = vmatprep.mubr.f32.mxu0 %v775_v12  ;;  %9439 = vmatprep.mubr.f32.mxu1 %v7455_v13  ;;  %v443_v12 = vld [vmem:[%s15716_s7 + $0x40] sm:$0xff] }
 0x131   : > { %9445 = vmatprep.subr.mxu1 %v8378_v16  ;;  %2285 = vmatprep.subr.mxu0 %v498_v17  ;;  %v7123_v13 = vld [vmem:[%s15724_s26 + $0x40] sm:$0xff]  ;;  %v818_v16 = vrot.slane %v443_v12, %v15754_v20 }
 0x132   : > { %v7498_v17 = vrot.slane %v7123_v13, %v15754_v20 }
 0x133   : > { %v826_v22 = vcombine.high %v818_v16, %v818_v16 }
 0x136   : > { %2280 = vmatmul.mubr.f32.vlgmr.msra.gmra.mrb[0].mxu0 %v767_v7  ;;  %9440 = vmatmul.mubr.f32.vlgmr.msra.gmra.mrb[0].mxu1 %v7447_v8  ;;  %v8385_v7 = vrot.slane %v7185_v3, 4  ;;  %v505_v8 = vld [vmem:[%s15730_s3 + $0xf0] sm:$0xf]  ;;  %v7198_v3 = vld [vmem:[%s15730_s3 + $0x158] sm:$0xf0] }
 0x137   : > { %9446 = vmatpush1.xpose.msra.mxu1 %v8377_v23  ;;  %2286 = vmatpush1.xpose.msra.mxu0 %v497_v24  ;;  %v7506_v23 = vcombine.high %v7498_v17, %v7498_v17  ;;  %v811_v24 = vcombine.high %v443_v12, %v443_v12  ;;  %v7197_v12 = vld [vmem:[%s15730_s3 + $0x150] sm:$0xf0] }
 0x138   : > { %2349 = vmatprep.mubr.f32.mxu0 %v776_v25  ;;  %9509 = vmatprep.mubr.f32.mxu1 %v7456_v26  ;;  %v7491_v25 = vcombine.high %v7123_v13, %v7123_v13  ;;  %v8390_v26 = vrot.slane %v7190_v18, 4 }
 0x139   : > { %9515 = vmatprep.subr.mxu1 %v8380_v27  ;;  %2355 = vmatprep.subr.mxu0 %v500_v30  ;;  %v510_v27 = vld [vmem:[%s15730_s3 + $0x118] sm:$0xf]  ;;  %v825_v29 = vrot.slane %v811_v24, %v15754_v20  ;;  %v520_v24 = vld [vmem:[%s15730_s3 + $0x168] sm:$0xf] }
 0x13a   : > { %v7505_v30 = vrot.slane %v7491_v25, %v15754_v20  ;;  %v7199_v25 = vld [vmem:[%s15730_s3 + $0x160] sm:$0xf0] }
 0x13b   : > { %v827_v34 = vcombine.high %v825_v29, %v825_v29 }
 0x13e   : > { %2350 = vmatmul.mubr.f32.vlgmr.msra.gmra.mrb[0].mxu0 %v774_v19  ;;  %9510 = vmatmul.mubr.f32.vlgmr.msra.gmra.mrb[0].mxu1 %v7454_v21  ;;  %v8387_v19 = vrot.slane %v7187_v15, 4  ;;  %v507_v21 = vld [vmem:[%s15730_s3 + $0x100] sm:$0xf]  ;;  %v7200_v15 = vld [vmem:[%s15730_s3 + $0x168] sm:$0xf0] }
 0x13f   : > { %9516 = vmatpush1.xpose.msra.mxu1 %v8379_v35  ;;  %2356 = vmatpush1.xpose.msra.mxu0 %v499_v36  ;;  %v7507_v35 = vcombine.high %v7505_v30, %v7505_v30  ;;  %v8392_v36 = vrot.slane %v7192_v31, 4 }
 0x140   : > { %2419 = vmatprep.mubr.f32.mxu0 %v792_v37  ;;  %9579 = vmatprep.mubr.f32.mxu1 %v7472_v38  ;;  %v444_v37 = vld [vmem:[%s15716_s7 + $0x48] sm:$0xff] }
 0x141   : > { %9585 = vmatprep.subr.mxu1 %v8382_v41  ;;  %2425 = vmatprep.subr.mxu0 %v502_v42  ;;  %v7124_v38 = vld [vmem:[%s15724_s26 + $0x48] sm:$0xff]  ;;  %v835_v41 = vrot.slane %v444_v37, %v15754_v20 }
 0x142   : > { %v7515_v42 = vrot.slane %v7124_v38, %v15754_v20 }
 0x143   : > { %v843_v46 = vcombine.high %v835_v41, %v835_v41 }
 0x146   : > { %2420 = vmatmul.mubr.f32.vlgmr.msra.gmra.mrb[0].mxu0 %v784_v32  ;;  %9580 = vmatmul.mubr.f32.vlgmr.msra.gmra.mrb[0].mxu1 %v7464_v33  ;;  %v8389_v32 = vrot.slane %v7189_v28, 4  ;;  %v509_v33 = vld [vmem:[%s15730_s3 + $0x110] sm:$0xf]  ;;  %v7202_v28 = vld [vmem:[%s15730_s3 + $0x178] sm:$0xf0] }
 0x147   : > { %9586 = vmatpush1.xpose.msra.mxu1 %v8381_v47  ;;  %2426 = vmatpush1.xpose.msra.mxu0 %v501_v48  ;;  %v7523_v47 = vcombine.high %v7515_v42, %v7515_v42  ;;  %v828_v48 = vcombine.high %v444_v37, %v444_v37  ;;  %v7201_v37 = vld [vmem:[%s15730_s3 + $0x170] sm:$0xf0] }
 0x148   : > { %2489 = vmatprep.mubr.f32.mxu0 %v793_v49  ;;  %9649 = vmatprep.mubr.f32.mxu1 %v7473_v50  ;;  %v7508_v49 = vcombine.high %v7124_v38, %v7124_v38  ;;  %v8394_v50 = vrot.slane %v7194_v43, 4 }
 0x149   : > { %9655 = vmatprep.subr.mxu1 %v8384_v51  ;;  %2495 = vmatprep.subr.mxu0 %v504_v54  ;;  %v514_v51 = vld [vmem:[%s15730_s3 + $0x138] sm:$0xf]  ;;  %v842_v53 = vrot.slane %v828_v48, %v15754_v20  ;;  %v524_v48 = vld [vmem:[%s15730_s3 + $0x188] sm:$0xf] }
 0x14a   : > { %v7522_v54 = vrot.slane %v7508_v49, %v15754_v20  ;;  %v7203_v49 = vld [vmem:[%s15730_s3 + $0x180] sm:$0xf0] }
 0x14b   : > { %v844_v58 = vcombine.high %v842_v53, %v842_v53 }
 0x14e   : > { %2490 = vmatmul.mubr.f32.vlgmr.msra.gmra.mrb[0].mxu0 %v791_v44  ;;  %9650 = vmatmul.mubr.f32.vlgmr.msra.gmra.mrb[0].mxu1 %v7471_v45  ;;  %v8391_v44 = vrot.slane %v7191_v40, 4  ;;  %v511_v45 = vld [vmem:[%s15730_s3 + $0x120] sm:$0xf]  ;;  %v7204_v40 = vld [vmem:[%s15730_s3 + $0x188] sm:$0xf0] }
 0x14f   : > { %9656 = vmatpush1.xpose.msra.mxu1 %v8383_v59  ;;  %2496 = vmatpush1.xpose.msra.mxu0 %v503_v60  ;;  %v7524_v59 = vcombine.high %v7522_v54, %v7522_v54  ;;  %v8396_v60 = vrot.slane %v7196_v55, 4 }
 0x150   : > { %2559 = vmatprep.mubr.f32.mxu0 %v809_v61  ;;  %9719 = vmatprep.mubr.f32.mxu1 %v7489_v62  ;;  %v445_v61 = vld [vmem:[%s15716_s7 + $0x50] sm:$0xff] }
 0x151   : > { %9725 = vmatprep.subr.mxu1 %v8386_v1  ;;  %2565 = vmatprep.subr.mxu0 %v506_v2  ;;  %v7125_v62 = vld [vmem:[%s15724_s26 + $0x50] sm:$0xff]  ;;  %v852_v1 = vrot.slane %v445_v61, %v15754_v20 }
 0x152   : > { %v7532_v2 = vrot.slane %v7125_v62, %v15754_v20 }
 0x153   : > { %v860_v6 = vcombine.high %v852_v1, %v852_v1 }
 0x156   : > { %2560 = vmatmul.mubr.f32.vlgmr.msra.gmra.mrb[0].mxu0 %v801_v56  ;;  %9720 = vmatmul.mubr.f32.vlgmr.msra.gmra.mrb[0].mxu1 %v7481_v57  ;;  %v8393_v56 = vrot.slane %v7193_v52, 4  ;;  %v513_v57 = vld [vmem:[%s15730_s3 + $0x130] sm:$0xf]  ;;  %v7206_v52 = vld [vmem:[%s15730_s3 + $0x198] sm:$0xf0] }
 0x157   : > { %9726 = vmatpush1.xpose.msra.mxu1 %v8385_v7  ;;  %2566 = vmatpush1.xpose.msra.mxu0 %v505_v8  ;;  %v7540_v7 = vcombine.high %v7532_v2, %v7532_v2  ;;  %v845_v8 = vcombine.high %v445_v61, %v445_v61  ;;  %v7205_v61 = vld [vmem:[%s15730_s3 + $0x190] sm:$0xf0] }
 0x158   : > { %2629 = vmatprep.mubr.f32.mxu0 %v810_v9  ;;  %9789 = vmatprep.mubr.f32.mxu1 %v7490_v10  ;;  %v7525_v9 = vcombine.high %v7125_v62, %v7125_v62  ;;  %v8398_v10 = vrot.slane %v7198_v3, 4 }
 0x159   : > { %9795 = vmatprep.subr.mxu1 %v8388_v11  ;;  %2635 = vmatprep.subr.mxu0 %v508_v14  ;;  %v518_v11 = vld [vmem:[%s15730_s3 + $0x158] sm:$0xf]  ;;  %v859_v13 = vrot.slane %v845_v8, %v15754_v20  ;;  %v528_v8 = vld [vmem:[%s15730_s3 + $0x1a8] sm:$0xf] }
 0x15a   : > { %v7539_v14 = vrot.slane %v7525_v9, %v15754_v20  ;;  %v7207_v9 = vld [vmem:[%s15730_s3 + $0x1a0] sm:$0xf0] }
 0x15b   : > { %v861_v18 = vcombine.high %v859_v13, %v859_v13 }
 0x15e   : > { %2630 = vmatmul.mubr.f32.vlgmr.msra.gmra.mrb[0].mxu0 %v808_v4  ;;  %9790 = vmatmul.mubr.f32.vlgmr.msra.gmra.mrb[0].mxu1 %v7488_v5  ;;  %v8395_v4 = vrot.slane %v7195_v0, 4  ;;  %v515_v5 = vld [vmem:[%s15730_s3 + $0x140] sm:$0xf]  ;;  %v7208_v0 = vld [vmem:[%s15730_s3 + $0x1a8] sm:$0xf0] }
 0x15f   : > { %9796 = vmatpush1.xpose.msra.mxu1 %v8387_v19  ;;  %2636 = vmatpush1.xpose.msra.mxu0 %v507_v21  ;;  %v7541_v19 = vcombine.high %v7539_v14, %v7539_v14  ;;  %v8400_v21 = vrot.slane %v7200_v15, 4 }
 0x160   : > { %2699 = vmatprep.mubr.f32.mxu0 %v826_v22  ;;  %9859 = vmatprep.mubr.f32.mxu1 %v7506_v23  ;;  %v446_v22 = vld [vmem:[%s15716_s7 + $0x58] sm:$0xff] }
 0x161   : > { %9865 = vmatprep.subr.mxu1 %v8390_v26  ;;  %2705 = vmatprep.subr.mxu0 %v510_v27  ;;  %v7126_v23 = vld [vmem:[%s15724_s26 + $0x58] sm:$0xff]  ;;  %v869_v26 = vrot.slane %v446_v22, %v15754_v20 }
 0x162   : > { %v7549_v27 = vrot.slane %v7126_v23, %v15754_v20 }
 0x163   : > { %v877_v31 = vcombine.high %v869_v26, %v869_v26 }
 0x166   : > { %2700 = vmatmul.mubr.f32.vlgmr.msra.gmra.mrb[0].mxu0 %v818_v16  ;;  %9860 = vmatmul.mubr.f32.vlgmr.msra.gmra.mrb[0].mxu1 %v7498_v17  ;;  %v8397_v16 = vrot.slane %v7197_v12, 4  ;;  %v517_v17 = vld [vmem:[%s15730_s3 + $0x150] sm:$0xf]  ;;  %v7210_v12 = vld [vmem:[%s15730_s3 + $0x1b8] sm:$0xf0] }
 0x167   : > { %9866 = vmatpush1.xpose.msra.mxu1 %v8389_v32  ;;  %2706 = vmatpush1.xpose.msra.mxu0 %v509_v33  ;;  %v7557_v32 = vcombine.high %v7549_v27, %v7549_v27  ;;  %v862_v33 = vcombine.high %v446_v22, %v446_v22  ;;  %v7209_v22 = vld [vmem:[%s15730_s3 + $0x1b0] sm:$0xf0] }
 0x168   : > { %2769 = vmatprep.mubr.f32.mxu0 %v827_v34  ;;  %9929 = vmatprep.mubr.f32.mxu1 %v7507_v35  ;;  %v7542_v34 = vcombine.high %v7126_v23, %v7126_v23  ;;  %v8402_v35 = vrot.slane %v7202_v28, 4 }
 0x169   : > { %9935 = vmatprep.subr.mxu1 %v8392_v36  ;;  %2775 = vmatprep.subr.mxu0 %v512_v39  ;;  %v522_v36 = vld [vmem:[%s15730_s3 + $0x178] sm:$0xf]  ;;  %v876_v38 = vrot.slane %v862_v33, %v15754_v20  ;;  %v532_v33 = vld [vmem:[%s15730_s3 + $0x1c8] sm:$0xf] }
 0x16a   : > { %v7556_v39 = vrot.slane %v7542_v34, %v15754_v20  ;;  %v7211_v34 = vld [vmem:[%s15730_s3 + $0x1c0] sm:$0xf0] }
 0x16b   : > { %v878_v43 = vcombine.high %v876_v38, %v876_v38 }
 0x16e   : > { %2770 = vmatmul.mubr.f32.vlgmr.msra.gmra.mrb[0].mxu0 %v825_v29  ;;  %9930 = vmatmul.mubr.f32.vlgmr.msra.gmra.mrb[0].mxu1 %v7505_v30  ;;  %v8399_v29 = vrot.slane %v7199_v25, 4  ;;  %v519_v30 = vld [vmem:[%s15730_s3 + $0x160] sm:$0xf]  ;;  %v7212_v25 = vld [vmem:[%s15730_s3 + $0x1c8] sm:$0xf0] }
 0x16f   : > { %9936 = vmatpush1.xpose.msra.mxu1 %v8391_v44  ;;  %2776 = vmatpush1.xpose.msra.mxu0 %v511_v45  ;;  %v7558_v44 = vcombine.high %v7556_v39, %v7556_v39  ;;  %v8404_v45 = vrot.slane %v7204_v40, 4 }
 0x170   : > { %2839 = vmatprep.mubr.f32.mxu0 %v843_v46  ;;  %9999 = vmatprep.mubr.f32.mxu1 %v7523_v47  ;;  %v447_v46 = vld [vmem:[%s15716_s7 + $0x60] sm:$0xff] }
 0x171   : > { %10005 = vmatprep.subr.mxu1 %v8394_v50  ;;  %2845 = vmatprep.subr.mxu0 %v514_v51  ;;  %v7127_v47 = vld [vmem:[%s15724_s26 + $0x60] sm:$0xff]  ;;  %v886_v50 = vrot.slane %v447_v46, %v15754_v20 }
 0x172   : > { %v7566_v51 = vrot.slane %v7127_v47, %v15754_v20 }
 0x173   : > { %v894_v55 = vcombine.high %v886_v50, %v886_v50 }
 0x176   : > { %2840 = vmatmul.mubr.f32.vlgmr.msra.gmra.mrb[0].mxu0 %v835_v41  ;;  %10000 = vmatmul.mubr.f32.vlgmr.msra.gmra.mrb[0].mxu1 %v7515_v42  ;;  %v8401_v41 = vrot.slane %v7201_v37, 4  ;;  %v521_v42 = vld [vmem:[%s15730_s3 + $0x170] sm:$0xf]  ;;  %v7214_v37 = vld [vmem:[%s15730_s3 + $0x1d8] sm:$0xf0] }
 0x177   : > { %10006 = vmatpush1.xpose.msra.mxu1 %v8393_v56  ;;  %2846 = vmatpush1.xpose.msra.mxu0 %v513_v57  ;;  %v7574_v56 = vcombine.high %v7566_v51, %v7566_v51  ;;  %v879_v57 = vcombine.high %v447_v46, %v447_v46  ;;  %v7213_v46 = vld [vmem:[%s15730_s3 + $0x1d0] sm:$0xf0] }
 0x178   : > { %2909 = vmatprep.mubr.f32.mxu0 %v844_v58  ;;  %10069 = vmatprep.mubr.f32.mxu1 %v7524_v59  ;;  %v7559_v58 = vcombine.high %v7127_v47, %v7127_v47  ;;  %v8406_v59 = vrot.slane %v7206_v52, 4 }
 0x179   : > { %10075 = vmatprep.subr.mxu1 %v8396_v60  ;;  %2915 = vmatprep.subr.mxu0 %v516_v63  ;;  %v526_v60 = vld [vmem:[%s15730_s3 + $0x198] sm:$0xf]  ;;  %v893_v62 = vrot.slane %v879_v57, %v15754_v20  ;;  %v536_v57 = vld [vmem:[%s15730_s3 + $0x1e8] sm:$0xf] }
 0x17a   : > { %v7573_v63 = vrot.slane %v7559_v58, %v15754_v20  ;;  %v7215_v58 = vld [vmem:[%s15730_s3 + $0x1e0] sm:$0xf0] }
 0x17b   : > { %v895_v3 = vcombine.high %v893_v62, %v893_v62 }
 0x17e   : > { %2910 = vmatmul.mubr.f32.vlgmr.msra.gmra.mrb[0].mxu0 %v842_v53  ;;  %10070 = vmatmul.mubr.f32.vlgmr.msra.gmra.mrb[0].mxu1 %v7522_v54  ;;  %v8403_v53 = vrot.slane %v7203_v49, 4  ;;  %v523_v54 = vld [vmem:[%s15730_s3 + $0x180] sm:$0xf]  ;;  %v7216_v49 = vld [vmem:[%s15730_s3 + $0x1e8] sm:$0xf0] }
 0x17f   : > { %10076 = vmatpush1.xpose.msra.mxu1 %v8395_v4  ;;  %2916 = vmatpush1.xpose.msra.mxu0 %v515_v5  ;;  %v7575_v4 = vcombine.high %v7573_v63, %v7573_v63  ;;  %v8408_v5 = vrot.slane %v7208_v0, 4 }
 0x180   : > { %2979 = vmatprep.mubr.f32.mxu0 %v860_v6  ;;  %10139 = vmatprep.mubr.f32.mxu1 %v7540_v7  ;;  %v448_v6 = vld [vmem:[%s15716_s7 + $0x68] sm:$0xff] }
 0x181   : > { %10145 = vmatprep.subr.mxu1 %v8398_v10  ;;  %2985 = vmatprep.subr.mxu0 %v518_v11  ;;  %v7128_v7 = vld [vmem:[%s15724_s26 + $0x68] sm:$0xff]  ;;  %v903_v10 = vrot.slane %v448_v6, %v15754_v20 }
 0x182   : > { %v7583_v11 = vrot.slane %v7128_v7, %v15754_v20 }
 0x183   : > { %v911_v15 = vcombine.high %v903_v10, %v903_v10 }
 0x186   : > { %2980 = vmatmul.mubr.f32.vlgmr.msra.gmra.mrb[0].mxu0 %v852_v1  ;;  %10140 = vmatmul.mubr.f32.vlgmr.msra.gmra.mrb[0].mxu1 %v7532_v2  ;;  %v8405_v1 = vrot.slane %v7205_v61, 4  ;;  %v525_v2 = vld [vmem:[%s15730_s3 + $0x190] sm:$0xf]  ;;  %v7218_v61 = vld [vmem:[%s15730_s3 + $0x1f8] sm:$0xf0] }
 0x187   : > { %10146 = vmatpush1.xpose.msra.mxu1 %v8397_v16  ;;  %2986 = vmatpush1.xpose.msra.mxu0 %v517_v17  ;;  %v7591_v16 = vcombine.high %v7583_v11, %v7583_v11  ;;  %v896_v17 = vcombine.high %v448_v6, %v448_v6  ;;  %v7217_v6 = vld [vmem:[%s15730_s3 + $0x1f0] sm:$0xf0] }
 0x188   : > { %3049 = vmatprep.mubr.f32.mxu0 %v861_v18  ;;  %10209 = vmatprep.mubr.f32.mxu1 %v7541_v19  ;;  %v7576_v18 = vcombine.high %v7128_v7, %v7128_v7  ;;  %v8410_v19 = vrot.slane %v7210_v12, 4 }
 0x189   : > { %10215 = vmatprep.subr.mxu1 %v8400_v21  ;;  %3055 = vmatprep.subr.mxu0 %v520_v24  ;;  %v530_v21 = vld [vmem:[%s15730_s3 + $0x1b8] sm:$0xf]  ;;  %v910_v23 = vrot.slane %v896_v17, %v15754_v20  ;;  %v540_v17 = vld [vmem:[%s15730_s3 + $0x208] sm:$0xf] }
 0x18a   : > { %v7590_v24 = vrot.slane %v7576_v18, %v15754_v20  ;;  %v7219_v18 = vld [vmem:[%s15730_s3 + $0x200] sm:$0xf0] }
 0x18b   : > { %v912_v28 = vcombine.high %v910_v23, %v910_v23 }
 0x18e   : > { %3050 = vmatmul.mubr.f32.vlgmr.msra.gmra.mrb[0].mxu0 %v859_v13  ;;  %10210 = vmatmul.mubr.f32.vlgmr.msra.gmra.mrb[0].mxu1 %v7539_v14  ;;  %v8407_v13 = vrot.slane %v7207_v9, 4  ;;  %v527_v14 = vld [vmem:[%s15730_s3 + $0x1a0] sm:$0xf]  ;;  %v7220_v9 = vld [vmem:[%s15730_s3 + $0x208] sm:$0xf0] }
 0x18f   : > { %10216 = vmatpush1.xpose.msra.mxu1 %v8399_v29  ;;  %3056 = vmatpush1.xpose.msra.mxu0 %v519_v30  ;;  %v7592_v29 = vcombine.high %v7590_v24, %v7590_v24  ;;  %v8412_v30 = vrot.slane %v7212_v25, 4 }
 0x190   : > { %3119 = vmatprep.mubr.f32.mxu0 %v877_v31  ;;  %10279 = vmatprep.mubr.f32.mxu1 %v7557_v32  ;;  %v449_v31 = vld [vmem:[%s15716_s7 + $0x70] sm:$0xff] }
 0x191   : > { %10285 = vmatprep.subr.mxu1 %v8402_v35  ;;  %3125 = vmatprep.subr.mxu0 %v522_v36  ;;  %v7129_v32 = vld [vmem:[%s15724_s26 + $0x70] sm:$0xff]  ;;  %v920_v35 = vrot.slane %v449_v31, %v15754_v20 }
 0x192   : > { %v7600_v36 = vrot.slane %v7129_v32, %v15754_v20 }
 0x193   : > { %v928_v40 = vcombine.high %v920_v35, %v920_v35 }
 0x196   : > { %3120 = vmatmul.mubr.f32.vlgmr.msra.gmra.mrb[0].mxu0 %v869_v26  ;;  %10280 = vmatmul.mubr.f32.vlgmr.msra.gmra.mrb[0].mxu1 %v7549_v27  ;;  %v8409_v26 = vrot.slane %v7209_v22, 4  ;;  %v529_v27 = vld [vmem:[%s15730_s3 + $0x1b0] sm:$0xf]  ;;  %v7222_v22 = vld [vmem:[%s15730_s3 + $0x218] sm:$0xf0] }
 0x197   : > { %10286 = vmatpush1.xpose.msra.mxu1 %v8401_v41  ;;  %3126 = vmatpush1.xpose.msra.mxu0 %v521_v42  ;;  %v7608_v41 = vcombine.high %v7600_v36, %v7600_v36  ;;  %v913_v42 = vcombine.high %v449_v31, %v449_v31  ;;  %v7221_v31 = vld [vmem:[%s15730_s3 + $0x210] sm:$0xf0] }
 0x198   : > { %3189 = vmatprep.mubr.f32.mxu0 %v878_v43  ;;  %10349 = vmatprep.mubr.f32.mxu1 %v7558_v44  ;;  %v7593_v43 = vcombine.high %v7129_v32, %v7129_v32  ;;  %v8414_v44 = vrot.slane %v7214_v37, 4 }
 0x199   : > { %10355 = vmatprep.subr.mxu1 %v8404_v45  ;;  %3195 = vmatprep.subr.mxu0 %v524_v48  ;;  %v534_v45 = vld [vmem:[%s15730_s3 + $0x1d8] sm:$0xf]  ;;  %v927_v47 = vrot.slane %v913_v42, %v15754_v20  ;;  %v544_v42 = vld [vmem:[%s15730_s3 + $0x228] sm:$0xf] }
 0x19a   : > { %v7607_v48 = vrot.slane %v7593_v43, %v15754_v20  ;;  %v7223_v43 = vld [vmem:[%s15730_s3 + $0x220] sm:$0xf0] }
 0x19b   : > { %v929_v52 = vcombine.high %v927_v47, %v927_v47 }
 0x19e   : > { %3190 = vmatmul.mubr.f32.vlgmr.msra.gmra.mrb[0].mxu0 %v876_v38  ;;  %10350 = vmatmul.mubr.f32.vlgmr.msra.gmra.mrb[0].mxu1 %v7556_v39  ;;  %v8411_v38 = vrot.slane %v7211_v34, 4  ;;  %v531_v39 = vld [vmem:[%s15730_s3 + $0x1c0] sm:$0xf]  ;;  %v7224_v34 = vld [vmem:[%s15730_s3 + $0x228] sm:$0xf0] }
 0x19f   : > { %10356 = vmatpush1.xpose.msra.mxu1 %v8403_v53  ;;  %3196 = vmatpush1.xpose.msra.mxu0 %v523_v54  ;;  %v7609_v53 = vcombine.high %v7607_v48, %v7607_v48  ;;  %v8416_v54 = vrot.slane %v7216_v49, 4 }
 0x1a0   : > { %3259 = vmatprep.mubr.f32.mxu0 %v894_v55  ;;  %10419 = vmatprep.mubr.f32.mxu1 %v7574_v56  ;;  %v450_v55 = vld [vmem:[%s15716_s7 + $0x78] sm:$0xff] }
 0x1a1   : > { %10425 = vmatprep.subr.mxu1 %v8406_v59  ;;  %3265 = vmatprep.subr.mxu0 %v526_v60  ;;  %v7130_v56 = vld [vmem:[%s15724_s26 + $0x78] sm:$0xff]  ;;  %v937_v59 = vrot.slane %v450_v55, %v15754_v20 }
 0x1a2   : > { %v7617_v60 = vrot.slane %v7130_v56, %v15754_v20 }
 0x1a3   : > { %v945_v0 = vcombine.high %v937_v59, %v937_v59 }
 0x1a6   : > { %3260 = vmatmul.mubr.f32.vlgmr.msra.gmra.mrb[0].mxu0 %v886_v50  ;;  %10420 = vmatmul.mubr.f32.vlgmr.msra.gmra.mrb[0].mxu1 %v7566_v51  ;;  %v8413_v50 = vrot.slane %v7213_v46, 4  ;;  %v533_v51 = vld [vmem:[%s15730_s3 + $0x1d0] sm:$0xf]  ;;  %v7226_v46 = vld [vmem:[%s15730_s3 + $0x238] sm:$0xf0] }
 0x1a7   : > { %10426 = vmatpush1.xpose.msra.mxu1 %v8405_v1  ;;  %3266 = vmatpush1.xpose.msra.mxu0 %v525_v2  ;;  %v7625_v1 = vcombine.high %v7617_v60, %v7617_v60  ;;  %v930_v2 = vcombine.high %v450_v55, %v450_v55  ;;  %v7225_v55 = vld [vmem:[%s15730_s3 + $0x230] sm:$0xf0] }
 0x1a8   : > { %3329 = vmatprep.mubr.f32.mxu0 %v895_v3  ;;  %10489 = vmatprep.mubr.f32.mxu1 %v7575_v4  ;;  %v7610_v3 = vcombine.high %v7130_v56, %v7130_v56  ;;  %v8418_v4 = vrot.slane %v7218_v61, 4 }
 0x1a9   : > { %10495 = vmatprep.subr.mxu1 %v8408_v5  ;;  %3335 = vmatprep.subr.mxu0 %v528_v8  ;;  %v538_v5 = vld [vmem:[%s15730_s3 + $0x1f8] sm:$0xf]  ;;  %v944_v7 = vrot.slane %v930_v2, %v15754_v20  ;;  %v548_v2 = vld [vmem:[%s15730_s3 + $0x248] sm:$0xf] }
 0x1aa   : > { %v7624_v8 = vrot.slane %v7610_v3, %v15754_v20  ;;  %v7227_v3 = vld [vmem:[%s15730_s3 + $0x240] sm:$0xf0] }
 0x1ab   : > { %v946_v12 = vcombine.high %v944_v7, %v944_v7 }
 0x1ae   : > { %3330 = vmatmul.mubr.f32.vlgmr.msra.gmra.mrb[0].mxu0 %v893_v62  ;;  %10490 = vmatmul.mubr.f32.vlgmr.msra.gmra.mrb[0].mxu1 %v7573_v63  ;;  %v8415_v62 = vrot.slane %v7215_v58, 4  ;;  %v535_v63 = vld [vmem:[%s15730_s3 + $0x1e0] sm:$0xf]  ;;  %v7228_v58 = vld [vmem:[%s15730_s3 + $0x248] sm:$0xf0] }
 0x1af   : > { %10496 = vmatpush1.xpose.msra.mxu1 %v8407_v13  ;;  %3336 = vmatpush1.xpose.msra.mxu0 %v527_v14  ;;  %v7626_v13 = vcombine.high %v7624_v8, %v7624_v8  ;;  %v8420_v14 = vrot.slane %v7220_v9, 4 }
 0x1b0   : > { %3399 = vmatprep.mubr.f32.mxu0 %v911_v15  ;;  %10559 = vmatprep.mubr.f32.mxu1 %v7591_v16  ;;  %v451_v15 = vld [vmem:[%s15716_s7 + $0x80] sm:$0xff] }
 0x1b1   : > { %10565 = vmatprep.subr.mxu1 %v8410_v19  ;;  %3405 = vmatprep.subr.mxu0 %v530_v21  ;;  %v7131_v16 = vld [vmem:[%s15724_s26 + $0x80] sm:$0xff]  ;;  %v954_v19 = vrot.slane %v451_v15, %v15754_v20 }
 0x1b2   : > { %v7634_v21 = vrot.slane %v7131_v16, %v15754_v20 }
 0x1b3   : > { %v962_v25 = vcombine.high %v954_v19, %v954_v19 }
 0x1b6   : > { %3400 = vmatmul.mubr.f32.vlgmr.msra.gmra.mrb[0].mxu0 %v903_v10  ;;  %10560 = vmatmul.mubr.f32.vlgmr.msra.gmra.mrb[0].mxu1 %v7583_v11  ;;  %v8417_v10 = vrot.slane %v7217_v6, 4  ;;  %v537_v11 = vld [vmem:[%s15730_s3 + $0x1f0] sm:$0xf]  ;;  %v7230_v6 = vld [vmem:[%s15730_s3 + $0x258] sm:$0xf0] }
 0x1b7   : > { %10566 = vmatpush1.xpose.msra.mxu1 %v8409_v26  ;;  %3406 = vmatpush1.xpose.msra.mxu0 %v529_v27  ;;  %v7642_v26 = vcombine.high %v7634_v21, %v7634_v21  ;;  %v947_v27 = vcombine.high %v451_v15, %v451_v15  ;;  %v7229_v15 = vld [vmem:[%s15730_s3 + $0x250] sm:$0xf0] }
 0x1b8   : > { %3469 = vmatprep.mubr.f32.mxu0 %v912_v28  ;;  %10629 = vmatprep.mubr.f32.mxu1 %v7592_v29  ;;  %v7627_v28 = vcombine.high %v7131_v16, %v7131_v16  ;;  %v8422_v29 = vrot.slane %v7222_v22, 4 }
 0x1b9   : > { %10635 = vmatprep.subr.mxu1 %v8412_v30  ;;  %3475 = vmatprep.subr.mxu0 %v532_v33  ;;  %v542_v30 = vld [vmem:[%s15730_s3 + $0x218] sm:$0xf]  ;;  %v961_v32 = vrot.slane %v947_v27, %v15754_v20  ;;  %v552_v27 = vld [vmem:[%s15730_s3 + $0x268] sm:$0xf] }
 0x1ba   : > { %v7641_v33 = vrot.slane %v7627_v28, %v15754_v20  ;;  %v7231_v28 = vld [vmem:[%s15730_s3 + $0x260] sm:$0xf0] }
 0x1bb   : > { %v963_v37 = vcombine.high %v961_v32, %v961_v32 }
 0x1be   : > { %3470 = vmatmul.mubr.f32.vlgmr.msra.gmra.mrb[0].mxu0 %v910_v23  ;;  %10630 = vmatmul.mubr.f32.vlgmr.msra.gmra.mrb[0].mxu1 %v7590_v24  ;;  %v8419_v23 = vrot.slane %v7219_v18, 4  ;;  %v539_v24 = vld [vmem:[%s15730_s3 + $0x200] sm:$0xf]  ;;  %v7232_v18 = vld [vmem:[%s15730_s3 + $0x268] sm:$0xf0] }
 0x1bf   : > { %10636 = vmatpush1.xpose.msra.mxu1 %v8411_v38  ;;  %3476 = vmatpush1.xpose.msra.mxu0 %v531_v39  ;;  %v7643_v38 = vcombine.high %v7641_v33, %v7641_v33  ;;  %v8424_v39 = vrot.slane %v7224_v34, 4 }
 0x1c0   : > { %3539 = vmatprep.mubr.f32.mxu0 %v928_v40  ;;  %10699 = vmatprep.mubr.f32.mxu1 %v7608_v41  ;;  %v452_v40 = vld [vmem:[%s15716_s7 + $0x88] sm:$0xff] }
 0x1c1   : > { %10705 = vmatprep.subr.mxu1 %v8414_v44  ;;  %3545 = vmatprep.subr.mxu0 %v534_v45  ;;  %v7132_v41 = vld [vmem:[%s15724_s26 + $0x88] sm:$0xff]  ;;  %v971_v44 = vrot.slane %v452_v40, %v15754_v20 }
 0x1c2   : > { %v7651_v45 = vrot.slane %v7132_v41, %v15754_v20 }
 0x1c3   : > { %v979_v49 = vcombine.high %v971_v44, %v971_v44 }
 0x1c6   : > { %3540 = vmatmul.mubr.f32.vlgmr.msra.gmra.mrb[0].mxu0 %v920_v35  ;;  %10700 = vmatmul.mubr.f32.vlgmr.msra.gmra.mrb[0].mxu1 %v7600_v36  ;;  %v8421_v35 = vrot.slane %v7221_v31, 4  ;;  %v541_v36 = vld [vmem:[%s15730_s3 + $0x210] sm:$0xf]  ;;  %v7234_v31 = vld [vmem:[%s15730_s3 + $0x278] sm:$0xf0] }
 0x1c7   : > { %10706 = vmatpush1.xpose.msra.mxu1 %v8413_v50  ;;  %3546 = vmatpush1.xpose.msra.mxu0 %v533_v51  ;;  %v7659_v50 = vcombine.high %v7651_v45, %v7651_v45  ;;  %v964_v51 = vcombine.high %v452_v40, %v452_v40  ;;  %v7233_v40 = vld [vmem:[%s15730_s3 + $0x270] sm:$0xf0] }
 0x1c8   : > { %3609 = vmatprep.mubr.f32.mxu0 %v929_v52  ;;  %10769 = vmatprep.mubr.f32.mxu1 %v7609_v53  ;;  %v7644_v52 = vcombine.high %v7132_v41, %v7132_v41  ;;  %v8426_v53 = vrot.slane %v7226_v46, 4 }
 0x1c9   : > { %10775 = vmatprep.subr.mxu1 %v8416_v54  ;;  %3615 = vmatprep.subr.mxu0 %v536_v57  ;;  %v546_v54 = vld [vmem:[%s15730_s3 + $0x238] sm:$0xf]  ;;  %v978_v56 = vrot.slane %v964_v51, %v15754_v20  ;;  %v556_v51 = vld [vmem:[%s15730_s3 + $0x288] sm:$0xf] }
 0x1ca   : > { %v7658_v57 = vrot.slane %v7644_v52, %v15754_v20  ;;  %v7235_v52 = vld [vmem:[%s15730_s3 + $0x280] sm:$0xf0] }
 0x1cb   : > { %v980_v61 = vcombine.high %v978_v56, %v978_v56 }
 0x1ce   : > { %3610 = vmatmul.mubr.f32.vlgmr.msra.gmra.mrb[0].mxu0 %v927_v47  ;;  %10770 = vmatmul.mubr.f32.vlgmr.msra.gmra.mrb[0].mxu1 %v7607_v48  ;;  %v8423_v47 = vrot.slane %v7223_v43, 4  ;;  %v543_v48 = vld [vmem:[%s15730_s3 + $0x220] sm:$0xf]  ;;  %v7236_v43 = vld [vmem:[%s15730_s3 + $0x288] sm:$0xf0] }
 0x1cf   : > { %10776 = vmatpush1.xpose.msra.mxu1 %v8415_v62  ;;  %3616 = vmatpush1.xpose.msra.mxu0 %v535_v63  ;;  %v7660_v62 = vcombine.high %v7658_v57, %v7658_v57  ;;  %v8428_v63 = vrot.slane %v7228_v58, 4 }
 0x1d0   : > { %3679 = vmatprep.mubr.f32.mxu0 %v945_v0  ;;  %10839 = vmatprep.mubr.f32.mxu1 %v7625_v1  ;;  %v453_v0 = vld [vmem:[%s15716_s7 + $0x90] sm:$0xff] }
 0x1d1   : > { %10845 = vmatprep.subr.mxu1 %v8418_v4  ;;  %3685 = vmatprep.subr.mxu0 %v538_v5  ;;  %v7133_v1 = vld [vmem:[%s15724_s26 + $0x90] sm:$0xff]  ;;  %v988_v4 = vrot.slane %v453_v0, %v15754_v20 }
 0x1d2   : > { %v7668_v5 = vrot.slane %v7133_v1, %v15754_v20 }
 0x1d3   : > { %v996_v9 = vcombine.high %v988_v4, %v988_v4 }
 0x1d6   : > { %3680 = vmatmul.mubr.f32.vlgmr.msra.gmra.mrb[0].mxu0 %v937_v59  ;;  %10840 = vmatmul.mubr.f32.vlgmr.msra.gmra.mrb[0].mxu1 %v7617_v60  ;;  %v8425_v59 = vrot.slane %v7225_v55, 4  ;;  %v545_v60 = vld [vmem:[%s15730_s3 + $0x230] sm:$0xf]  ;;  %v7238_v55 = vld [vmem:[%s15730_s3 + $0x298] sm:$0xf0] }
 0x1d7   : > { %10846 = vmatpush1.xpose.msra.mxu1 %v8417_v10  ;;  %3686 = vmatpush1.xpose.msra.mxu0 %v537_v11  ;;  %v7676_v10 = vcombine.high %v7668_v5, %v7668_v5  ;;  %v981_v11 = vcombine.high %v453_v0, %v453_v0  ;;  %v7237_v0 = vld [vmem:[%s15730_s3 + $0x290] sm:$0xf0] }
 0x1d8   : > { %3749 = vmatprep.mubr.f32.mxu0 %v946_v12  ;;  %10909 = vmatprep.mubr.f32.mxu1 %v7626_v13  ;;  %v7661_v12 = vcombine.high %v7133_v1, %v7133_v1  ;;  %v8430_v13 = vrot.slane %v7230_v6, 4 }
 0x1d9   : > { %10915 = vmatprep.subr.mxu1 %v8420_v14  ;;  %3755 = vmatprep.subr.mxu0 %v540_v17  ;;  %v550_v14 = vld [vmem:[%s15730_s3 + $0x258] sm:$0xf]  ;;  %v995_v16 = vrot.slane %v981_v11, %v15754_v20  ;;  %v560_v11 = vld [vmem:[%s15730_s3 + $0x2a8] sm:$0xf] }
 0x1da   : > { %v7675_v17 = vrot.slane %v7661_v12, %v15754_v20  ;;  %v7239_v12 = vld [vmem:[%s15730_s3 + $0x2a0] sm:$0xf0] }
 0x1db   : > { %v997_v22 = vcombine.high %v995_v16, %v995_v16 }
 0x1de   : > { %3750 = vmatmul.mubr.f32.vlgmr.msra.gmra.mrb[0].mxu0 %v944_v7  ;;  %10910 = vmatmul.mubr.f32.vlgmr.msra.gmra.mrb[0].mxu1 %v7624_v8  ;;  %v8427_v7 = vrot.slane %v7227_v3, 4  ;;  %v547_v8 = vld [vmem:[%s15730_s3 + $0x240] sm:$0xf]  ;;  %v7240_v3 = vld [vmem:[%s15730_s3 + $0x2a8] sm:$0xf0] }
 0x1df   : > { %10916 = vmatpush1.xpose.msra.mxu1 %v8419_v23  ;;  %3756 = vmatpush1.xpose.msra.mxu0 %v539_v24  ;;  %v7677_v23 = vcombine.high %v7675_v17, %v7675_v17  ;;  %v8432_v24 = vrot.slane %v7232_v18, 4 }
 0x1e0   : > { %3819 = vmatprep.mubr.f32.mxu0 %v962_v25  ;;  %10979 = vmatprep.mubr.f32.mxu1 %v7642_v26  ;;  %v454_v25 = vld [vmem:[%s15716_s7 + $0x98] sm:$0xff] }
 0x1e1   : > { %10985 = vmatprep.subr.mxu1 %v8422_v29  ;;  %3825 = vmatprep.subr.mxu0 %v542_v30  ;;  %v7134_v26 = vld [vmem:[%s15724_s26 + $0x98] sm:$0xff]  ;;  %v1005_v29 = vrot.slane %v454_v25, %v15754_v20 }
 0x1e2   : > { %v7685_v30 = vrot.slane %v7134_v26, %v15754_v20 }
 0x1e3   : > { %v1013_v34 = vcombine.high %v1005_v29, %v1005_v29 }
 0x1e6   : > { %3820 = vmatmul.mubr.f32.vlgmr.msra.gmra.mrb[0].mxu0 %v954_v19  ;;  %10980 = vmatmul.mubr.f32.vlgmr.msra.gmra.mrb[0].mxu1 %v7634_v21  ;;  %v8429_v19 = vrot.slane %v7229_v15, 4  ;;  %v549_v21 = vld [vmem:[%s15730_s3 + $0x250] sm:$0xf]  ;;  %v7242_v15 = vld [vmem:[%s15730_s3 + $0x2b8] sm:$0xf0] }
 0x1e7   : > { %10986 = vmatpush1.xpose.msra.mxu1 %v8421_v35  ;;  %3826 = vmatpush1.xpose.msra.mxu0 %v541_v36  ;;  %v7693_v35 = vcombine.high %v7685_v30, %v7685_v30  ;;  %v998_v36 = vcombine.high %v454_v25, %v454_v25  ;;  %v7241_v25 = vld [vmem:[%s15730_s3 + $0x2b0] sm:$0xf0] }
 0x1e8   : > { %3889 = vmatprep.mubr.f32.mxu0 %v963_v37  ;;  %11049 = vmatprep.mubr.f32.mxu1 %v7643_v38  ;;  %v7678_v37 = vcombine.high %v7134_v26, %v7134_v26  ;;  %v8434_v38 = vrot.slane %v7234_v31, 4 }
 0x1e9   : > { %11055 = vmatprep.subr.mxu1 %v8424_v39  ;;  %3895 = vmatprep.subr.mxu0 %v544_v42  ;;  %v554_v39 = vld [vmem:[%s15730_s3 + $0x278] sm:$0xf]  ;;  %v1012_v41 = vrot.slane %v998_v36, %v15754_v20  ;;  %v564_v36 = vld [vmem:[%s15730_s3 + $0x2c8] sm:$0xf] }
 0x1ea   : > { %v7692_v42 = vrot.slane %v7678_v37, %v15754_v20  ;;  %v7243_v37 = vld [vmem:[%s15730_s3 + $0x2c0] sm:$0xf0] }
 0x1eb   : > { %v1014_v46 = vcombine.high %v1012_v41, %v1012_v41 }
 0x1ee   : > { %3890 = vmatmul.mubr.f32.vlgmr.msra.gmra.mrb[0].mxu0 %v961_v32  ;;  %11050 = vmatmul.mubr.f32.vlgmr.msra.gmra.mrb[0].mxu1 %v7641_v33  ;;  %v8431_v32 = vrot.slane %v7231_v28, 4  ;;  %v551_v33 = vld [vmem:[%s15730_s3 + $0x260] sm:$0xf]  ;;  %v7244_v28 = vld [vmem:[%s15730_s3 + $0x2c8] sm:$0xf0] }
 0x1ef   : > { %11056 = vmatpush1.xpose.msra.mxu1 %v8423_v47  ;;  %3896 = vmatpush1.xpose.msra.mxu0 %v543_v48  ;;  %v7694_v47 = vcombine.high %v7692_v42, %v7692_v42  ;;  %v8436_v48 = vrot.slane %v7236_v43, 4 }
 0x1f0   : > { %3959 = vmatprep.mubr.f32.mxu0 %v979_v49  ;;  %11119 = vmatprep.mubr.f32.mxu1 %v7659_v50  ;;  %v455_v49 = vld [vmem:[%s15716_s7 + $0xa0] sm:$0xff] }
 0x1f1   : > { %11125 = vmatprep.subr.mxu1 %v8426_v53  ;;  %3965 = vmatprep.subr.mxu0 %v546_v54  ;;  %v7135_v50 = vld [vmem:[%s15724_s26 + $0xa0] sm:$0xff]  ;;  %v1022_v53 = vrot.slane %v455_v49, %v15754_v20 }
 0x1f2   : > { %v7702_v54 = vrot.slane %v7135_v50, %v15754_v20 }
 0x1f3   : > { %v1030_v58 = vcombine.high %v1022_v53, %v1022_v53 }
 0x1f6   : > { %3960 = vmatmul.mubr.f32.vlgmr.msra.gmra.mrb[0].mxu0 %v971_v44  ;;  %11120 = vmatmul.mubr.f32.vlgmr.msra.gmra.mrb[0].mxu1 %v7651_v45  ;;  %v8433_v44 = vrot.slane %v7233_v40, 4  ;;  %v553_v45 = vld [vmem:[%s15730_s3 + $0x270] sm:$0xf]  ;;  %v7246_v40 = vld [vmem:[%s15730_s3 + $0x2d8] sm:$0xf0] }
 0x1f7   : > { %11126 = vmatpush1.xpose.msra.mxu1 %v8425_v59  ;;  %3966 = vmatpush1.xpose.msra.mxu0 %v545_v60  ;;  %v7710_v59 = vcombine.high %v7702_v54, %v7702_v54  ;;  %v1015_v60 = vcombine.high %v455_v49, %v455_v49  ;;  %v7245_v49 = vld [vmem:[%s15730_s3 + $0x2d0] sm:$0xf0] }
 0x1f8   : > { %4029 = vmatprep.mubr.f32.mxu0 %v980_v61  ;;  %11189 = vmatprep.mubr.f32.mxu1 %v7660_v62  ;;  %v7695_v61 = vcombine.high %v7135_v50, %v7135_v50  ;;  %v8438_v62 = vrot.slane %v7238_v55, 4 }
 0x1f9   : > { %11195 = vmatprep.subr.mxu1 %v8428_v63  ;;  %4035 = vmatprep.subr.mxu0 %v548_v2  ;;  %v558_v63 = vld [vmem:[%s15730_s3 + $0x298] sm:$0xf]  ;;  %v1029_v1 = vrot.slane %v1015_v60, %v15754_v20  ;;  %v568_v60 = vld [vmem:[%s15730_s3 + $0x2e8] sm:$0xf] }
 0x1fa   : > { %v7709_v2 = vrot.slane %v7695_v61, %v15754_v20  ;;  %v7247_v61 = vld [vmem:[%s15730_s3 + $0x2e0] sm:$0xf0] }
 0x1fb   : > { %v1031_v6 = vcombine.high %v1029_v1, %v1029_v1 }
 0x1fe   : > { %4030 = vmatmul.mubr.f32.vlgmr.msra.gmra.mrb[0].mxu0 %v978_v56  ;;  %11190 = vmatmul.mubr.f32.vlgmr.msra.gmra.mrb[0].mxu1 %v7658_v57  ;;  %v8435_v56 = vrot.slane %v7235_v52, 4  ;;  %v555_v57 = vld [vmem:[%s15730_s3 + $0x280] sm:$0xf]  ;;  %v7248_v52 = vld [vmem:[%s15730_s3 + $0x2e8] sm:$0xf0] }
 0x1ff   : > { %11196 = vmatpush1.xpose.msra.mxu1 %v8427_v7  ;;  %4036 = vmatpush1.xpose.msra.mxu0 %v547_v8  ;;  %v7711_v7 = vcombine.high %v7709_v2, %v7709_v2  ;;  %v8440_v8 = vrot.slane %v7240_v3, 4 }
 0x200   : > { %4099 = vmatprep.mubr.f32.mxu0 %v996_v9  ;;  %11259 = vmatprep.mubr.f32.mxu1 %v7676_v10  ;;  %v456_v9 = vld [vmem:[%s15716_s7 + $0xa8] sm:$0xff] }
 0x201   : > { %11265 = vmatprep.subr.mxu1 %v8430_v13  ;;  %4105 = vmatprep.subr.mxu0 %v550_v14  ;;  %v7136_v10 = vld [vmem:[%s15724_s26 + $0xa8] sm:$0xff]  ;;  %v1039_v13 = vrot.slane %v456_v9, %v15754_v20 }
 0x202   : > { %v7719_v14 = vrot.slane %v7136_v10, %v15754_v20 }
 0x203   : > { %v1047_v18 = vcombine.high %v1039_v13, %v1039_v13 }
 0x206   : > { %4100 = vmatmul.mubr.f32.vlgmr.msra.gmra.mrb[0].mxu0 %v988_v4  ;;  %11260 = vmatmul.mubr.f32.vlgmr.msra.gmra.mrb[0].mxu1 %v7668_v5  ;;  %v8437_v4 = vrot.slane %v7237_v0, 4  ;;  %v557_v5 = vld [vmem:[%s15730_s3 + $0x290] sm:$0xf]  ;;  %v7250_v0 = vld [vmem:[%s15730_s3 + $0x2f8] sm:$0xf0] }
 0x207   : > { %11266 = vmatpush1.xpose.msra.mxu1 %v8429_v19  ;;  %4106 = vmatpush1.xpose.msra.mxu0 %v549_v21  ;;  %v7727_v19 = vcombine.high %v7719_v14, %v7719_v14  ;;  %v1032_v21 = vcombine.high %v456_v9, %v456_v9  ;;  %v7249_v9 = vld [vmem:[%s15730_s3 + $0x2f0] sm:$0xf0] }
 0x208   : > { %4169 = vmatprep.mubr.f32.mxu0 %v997_v22  ;;  %11329 = vmatprep.mubr.f32.mxu1 %v7677_v23  ;;  %v7712_v22 = vcombine.high %v7136_v10, %v7136_v10  ;;  %v8442_v23 = vrot.slane %v7242_v15, 4 }
 0x209   : > { %11335 = vmatprep.subr.mxu1 %v8432_v24  ;;  %4175 = vmatprep.subr.mxu0 %v552_v27  ;;  %v562_v24 = vld [vmem:[%s15730_s3 + $0x2b8] sm:$0xf]  ;;  %v1046_v26 = vrot.slane %v1032_v21, %v15754_v20  ;;  %v572_v21 = vld [vmem:[%s15730_s3 + $0x308] sm:$0xf] }
 0x20a   : > { %v7726_v27 = vrot.slane %v7712_v22, %v15754_v20  ;;  %v7251_v22 = vld [vmem:[%s15730_s3 + $0x300] sm:$0xf0] }
 0x20b   : > { %v1048_v31 = vcombine.high %v1046_v26, %v1046_v26 }
 0x20e   : > { %4170 = vmatmul.mubr.f32.vlgmr.msra.gmra.mrb[0].mxu0 %v995_v16  ;;  %11330 = vmatmul.mubr.f32.vlgmr.msra.gmra.mrb[0].mxu1 %v7675_v17  ;;  %v8439_v16 = vrot.slane %v7239_v12, 4  ;;  %v559_v17 = vld [vmem:[%s15730_s3 + $0x2a0] sm:$0xf]  ;;  %v7252_v12 = vld [vmem:[%s15730_s3 + $0x308] sm:$0xf0] }
 0x20f   : > { %11336 = vmatpush1.xpose.msra.mxu1 %v8431_v32  ;;  %4176 = vmatpush1.xpose.msra.mxu0 %v551_v33  ;;  %v7728_v32 = vcombine.high %v7726_v27, %v7726_v27  ;;  %v8444_v33 = vrot.slane %v7244_v28, 4 }
 0x210   : > { %4239 = vmatprep.mubr.f32.mxu0 %v1013_v34  ;;  %11399 = vmatprep.mubr.f32.mxu1 %v7693_v35  ;;  %v457_v34 = vld [vmem:[%s15716_s7 + $0xb0] sm:$0xff] }
 0x211   : > { %11405 = vmatprep.subr.mxu1 %v8434_v38  ;;  %4245 = vmatprep.subr.mxu0 %v554_v39  ;;  %v7137_v35 = vld [vmem:[%s15724_s26 + $0xb0] sm:$0xff]  ;;  %v1056_v38 = vrot.slane %v457_v34, %v15754_v20 }
 0x212   : > { %v7736_v39 = vrot.slane %v7137_v35, %v15754_v20 }
 0x213   : > { %v1064_v43 = vcombine.high %v1056_v38, %v1056_v38 }
 0x216   : > { %4240 = vmatmul.mubr.f32.vlgmr.msra.gmra.mrb[0].mxu0 %v1005_v29  ;;  %11400 = vmatmul.mubr.f32.vlgmr.msra.gmra.mrb[0].mxu1 %v7685_v30  ;;  %v8441_v29 = vrot.slane %v7241_v25, 4  ;;  %v561_v30 = vld [vmem:[%s15730_s3 + $0x2b0] sm:$0xf]  ;;  %v7254_v25 = vld [vmem:[%s15730_s3 + $0x318] sm:$0xf0] }
 0x217   : > { %11406 = vmatpush1.xpose.msra.mxu1 %v8433_v44  ;;  %4246 = vmatpush1.xpose.msra.mxu0 %v553_v45  ;;  %v7744_v44 = vcombine.high %v7736_v39, %v7736_v39  ;;  %v1049_v45 = vcombine.high %v457_v34, %v457_v34  ;;  %v7253_v34 = vld [vmem:[%s15730_s3 + $0x310] sm:$0xf0] }
 0x218   : > { %4309 = vmatprep.mubr.f32.mxu0 %v1014_v46  ;;  %11469 = vmatprep.mubr.f32.mxu1 %v7694_v47  ;;  %v7729_v46 = vcombine.high %v7137_v35, %v7137_v35  ;;  %v8446_v47 = vrot.slane %v7246_v40, 4 }
 0x219   : > { %11475 = vmatprep.subr.mxu1 %v8436_v48  ;;  %4315 = vmatprep.subr.mxu0 %v556_v51  ;;  %v566_v48 = vld [vmem:[%s15730_s3 + $0x2d8] sm:$0xf]  ;;  %v1063_v50 = vrot.slane %v1049_v45, %v15754_v20  ;;  %v576_v45 = vld [vmem:[%s15730_s3 + $0x328] sm:$0xf] }
 0x21a   : > { %v7743_v51 = vrot.slane %v7729_v46, %v15754_v20  ;;  %v7255_v46 = vld [vmem:[%s15730_s3 + $0x320] sm:$0xf0] }
 0x21b   : > { %v1065_v55 = vcombine.high %v1063_v50, %v1063_v50 }
 0x21e   : > { %4310 = vmatmul.mubr.f32.vlgmr.msra.gmra.mrb[0].mxu0 %v1012_v41  ;;  %11470 = vmatmul.mubr.f32.vlgmr.msra.gmra.mrb[0].mxu1 %v7692_v42  ;;  %v8443_v41 = vrot.slane %v7243_v37, 4  ;;  %v563_v42 = vld [vmem:[%s15730_s3 + $0x2c0] sm:$0xf]  ;;  %v7256_v37 = vld [vmem:[%s15730_s3 + $0x328] sm:$0xf0] }
 0x21f   : > { %11476 = vmatpush1.xpose.msra.mxu1 %v8435_v56  ;;  %4316 = vmatpush1.xpose.msra.mxu0 %v555_v57  ;;  %v7745_v56 = vcombine.high %v7743_v51, %v7743_v51  ;;  %v8448_v57 = vrot.slane %v7248_v52, 4 }
 0x220   : > { %4379 = vmatprep.mubr.f32.mxu0 %v1030_v58  ;;  %11539 = vmatprep.mubr.f32.mxu1 %v7710_v59  ;;  %v458_v58 = vld [vmem:[%s15716_s7 + $0xb8] sm:$0xff] }
 0x221   : > { %11545 = vmatprep.subr.mxu1 %v8438_v62  ;;  %4385 = vmatprep.subr.mxu0 %v558_v63  ;;  %v7138_v59 = vld [vmem:[%s15724_s26 + $0xb8] sm:$0xff]  ;;  %v1073_v62 = vrot.slane %v458_v58, %v15754_v20 }
 0x222   : > { %v7753_v63 = vrot.slane %v7138_v59, %v15754_v20 }
 0x223   : > { %v1081_v3 = vcombine.high %v1073_v62, %v1073_v62 }
 0x226   : > { %4380 = vmatmul.mubr.f32.vlgmr.msra.gmra.mrb[0].mxu0 %v1022_v53  ;;  %11540 = vmatmul.mubr.f32.vlgmr.msra.gmra.mrb[0].mxu1 %v7702_v54  ;;  %v8445_v53 = vrot.slane %v7245_v49, 4  ;;  %v565_v54 = vld [vmem:[%s15730_s3 + $0x2d0] sm:$0xf]  ;;  %v7258_v49 = vld [vmem:[%s15730_s3 + $0x338] sm:$0xf0] }
 0x227   : > { %11546 = vmatpush1.xpose.msra.mxu1 %v8437_v4  ;;  %4386 = vmatpush1.xpose.msra.mxu0 %v557_v5  ;;  %v7761_v4 = vcombine.high %v7753_v63, %v7753_v63  ;;  %v1066_v5 = vcombine.high %v458_v58, %v458_v58  ;;  %v7257_v58 = vld [vmem:[%s15730_s3 + $0x330] sm:$0xf0] }
 0x228   : > { %4449 = vmatprep.mubr.f32.mxu0 %v1031_v6  ;;  %11609 = vmatprep.mubr.f32.mxu1 %v7711_v7  ;;  %v7746_v6 = vcombine.high %v7138_v59, %v7138_v59  ;;  %v8450_v7 = vrot.slane %v7250_v0, 4 }
 0x229   : > { %11615 = vmatprep.subr.mxu1 %v8440_v8  ;;  %4455 = vmatprep.subr.mxu0 %v560_v11  ;;  %v570_v8 = vld [vmem:[%s15730_s3 + $0x2f8] sm:$0xf]  ;;  %v1080_v10 = vrot.slane %v1066_v5, %v15754_v20  ;;  %v580_v5 = vld [vmem:[%s15730_s3 + $0x348] sm:$0xf] }
 0x22a   : > { %v7760_v11 = vrot.slane %v7746_v6, %v15754_v20  ;;  %v7259_v6 = vld [vmem:[%s15730_s3 + $0x340] sm:$0xf0] }
 0x22b   : > { %v1082_v15 = vcombine.high %v1080_v10, %v1080_v10 }
 0x22e   : > { %4450 = vmatmul.mubr.f32.vlgmr.msra.gmra.mrb[0].mxu0 %v1029_v1  ;;  %11610 = vmatmul.mubr.f32.vlgmr.msra.gmra.mrb[0].mxu1 %v7709_v2  ;;  %v8447_v1 = vrot.slane %v7247_v61, 4  ;;  %v567_v2 = vld [vmem:[%s15730_s3 + $0x2e0] sm:$0xf]  ;;  %v7260_v61 = vld [vmem:[%s15730_s3 + $0x348] sm:$0xf0] }
 0x22f   : > { %11616 = vmatpush1.xpose.msra.mxu1 %v8439_v16  ;;  %4456 = vmatpush1.xpose.msra.mxu0 %v559_v17  ;;  %v7762_v16 = vcombine.high %v7760_v11, %v7760_v11  ;;  %v8452_v17 = vrot.slane %v7252_v12, 4 }
 0x230   : > { %4519 = vmatprep.mubr.f32.mxu0 %v1047_v18  ;;  %11679 = vmatprep.mubr.f32.mxu1 %v7727_v19  ;;  %v459_v18 = vld [vmem:[%s15716_s7 + $0xc0] sm:$0xff] }
 0x231   : > { %11685 = vmatprep.subr.mxu1 %v8442_v23  ;;  %4525 = vmatprep.subr.mxu0 %v562_v24  ;;  %v7139_v19 = vld [vmem:[%s15724_s26 + $0xc0] sm:$0xff]  ;;  %v1090_v23 = vrot.slane %v459_v18, %v15754_v20 }
 0x232   : > { %v7770_v24 = vrot.slane %v7139_v19, %v15754_v20 }
 0x233   : > { %v1098_v28 = vcombine.high %v1090_v23, %v1090_v23 }
 0x236   : > { %4520 = vmatmul.mubr.f32.vlgmr.msra.gmra.mrb[0].mxu0 %v1039_v13  ;;  %11680 = vmatmul.mubr.f32.vlgmr.msra.gmra.mrb[0].mxu1 %v7719_v14  ;;  %v8449_v13 = vrot.slane %v7249_v9, 4  ;;  %v569_v14 = vld [vmem:[%s15730_s3 + $0x2f0] sm:$0xf]  ;;  %v7262_v9 = vld [vmem:[%s15730_s3 + $0x358] sm:$0xf0] }
 0x237   : > { %11686 = vmatpush1.xpose.msra.mxu1 %v8441_v29  ;;  %4526 = vmatpush1.xpose.msra.mxu0 %v561_v30  ;;  %v7778_v29 = vcombine.high %v7770_v24, %v7770_v24  ;;  %v1083_v30 = vcombine.high %v459_v18, %v459_v18  ;;  %v7261_v18 = vld [vmem:[%s15730_s3 + $0x350] sm:$0xf0] }
 0x238   : > { %4589 = vmatprep.mubr.f32.mxu0 %v1048_v31  ;;  %11749 = vmatprep.mubr.f32.mxu1 %v7728_v32  ;;  %v7763_v31 = vcombine.high %v7139_v19, %v7139_v19  ;;  %v8454_v32 = vrot.slane %v7254_v25, 4 }
 0x239   : > { %11755 = vmatprep.subr.mxu1 %v8444_v33  ;;  %4595 = vmatprep.subr.mxu0 %v564_v36  ;;  %v574_v33 = vld [vmem:[%s15730_s3 + $0x318] sm:$0xf]  ;;  %v1097_v35 = vrot.slane %v1083_v30, %v15754_v20  ;;  %v584_v30 = vld [vmem:[%s15730_s3 + $0x368] sm:$0xf] }
 0x23a   : > { %v7777_v36 = vrot.slane %v7763_v31, %v15754_v20  ;;  %v7263_v31 = vld [vmem:[%s15730_s3 + $0x360] sm:$0xf0] }
 0x23b   : > { %v1099_v40 = vcombine.high %v1097_v35, %v1097_v35 }
 0x23e   : > { %4590 = vmatmul.mubr.f32.vlgmr.msra.gmra.mrb[0].mxu0 %v1046_v26  ;;  %11750 = vmatmul.mubr.f32.vlgmr.msra.gmra.mrb[0].mxu1 %v7726_v27  ;;  %v8451_v26 = vrot.slane %v7251_v22, 4  ;;  %v571_v27 = vld [vmem:[%s15730_s3 + $0x300] sm:$0xf]  ;;  %v7264_v22 = vld [vmem:[%s15730_s3 + $0x368] sm:$0xf0] }
 0x23f   : > { %11756 = vmatpush1.xpose.msra.mxu1 %v8443_v41  ;;  %4596 = vmatpush1.xpose.msra.mxu0 %v563_v42  ;;  %v7779_v41 = vcombine.high %v7777_v36, %v7777_v36  ;;  %v8456_v42 = vrot.slane %v7256_v37, 4 }
 0x240   : > { %4659 = vmatprep.mubr.f32.mxu0 %v1064_v43  ;;  %11819 = vmatprep.mubr.f32.mxu1 %v7744_v44  ;;  %v460_v43 = vld [vmem:[%s15716_s7 + $0xc8] sm:$0xff] }
 0x241   : > { %11825 = vmatprep.subr.mxu1 %v8446_v47  ;;  %4665 = vmatprep.subr.mxu0 %v566_v48  ;;  %v7140_v44 = vld [vmem:[%s15724_s26 + $0xc8] sm:$0xff]  ;;  %v1107_v47 = vrot.slane %v460_v43, %v15754_v20 }
 0x242   : > { %v7787_v48 = vrot.slane %v7140_v44, %v15754_v20 }
 0x243   : > { %v1115_v52 = vcombine.high %v1107_v47, %v1107_v47 }
 0x246   : > { %4660 = vmatmul.mubr.f32.vlgmr.msra.gmra.mrb[0].mxu0 %v1056_v38  ;;  %11820 = vmatmul.mubr.f32.vlgmr.msra.gmra.mrb[0].mxu1 %v7736_v39  ;;  %v8453_v38 = vrot.slane %v7253_v34, 4  ;;  %v573_v39 = vld [vmem:[%s15730_s3 + $0x310] sm:$0xf]  ;;  %v7266_v34 = vld [vmem:[%s15730_s3 + $0x378] sm:$0xf0] }
 0x247   : > { %11826 = vmatpush1.xpose.msra.mxu1 %v8445_v53  ;;  %4666 = vmatpush1.xpose.msra.mxu0 %v565_v54  ;;  %v7795_v53 = vcombine.high %v7787_v48, %v7787_v48  ;;  %v1100_v54 = vcombine.high %v460_v43, %v460_v43  ;;  %v7265_v43 = vld [vmem:[%s15730_s3 + $0x370] sm:$0xf0] }
 0x248   : > { %4729 = vmatprep.mubr.f32.mxu0 %v1065_v55  ;;  %11889 = vmatprep.mubr.f32.mxu1 %v7745_v56  ;;  %v7780_v55 = vcombine.high %v7140_v44, %v7140_v44  ;;  %v8458_v56 = vrot.slane %v7258_v49, 4 }
 0x249   : > { %11895 = vmatprep.subr.mxu1 %v8448_v57  ;;  %4735 = vmatprep.subr.mxu0 %v568_v60  ;;  %v578_v57 = vld [vmem:[%s15730_s3 + $0x338] sm:$0xf]  ;;  %v1114_v59 = vrot.slane %v1100_v54, %v15754_v20  ;;  %v588_v54 = vld [vmem:[%s15730_s3 + $0x388] sm:$0xf] }
 0x24a   : > { %v7794_v60 = vrot.slane %v7780_v55, %v15754_v20  ;;  %v7267_v55 = vld [vmem:[%s15730_s3 + $0x380] sm:$0xf0] }
 0x24b   : > { %v1116_v0 = vcombine.high %v1114_v59, %v1114_v59 }
 0x24e   : > { %4730 = vmatmul.mubr.f32.vlgmr.msra.gmra.mrb[0].mxu0 %v1063_v50  ;;  %11890 = vmatmul.mubr.f32.vlgmr.msra.gmra.mrb[0].mxu1 %v7743_v51  ;;  %v8455_v50 = vrot.slane %v7255_v46, 4  ;;  %v575_v51 = vld [vmem:[%s15730_s3 + $0x320] sm:$0xf]  ;;  %v7268_v46 = vld [vmem:[%s15730_s3 + $0x388] sm:$0xf0] }
 0x24f   : > { %11896 = vmatpush1.xpose.msra.mxu1 %v8447_v1  ;;  %4736 = vmatpush1.xpose.msra.mxu0 %v567_v2  ;;  %v7796_v1 = vcombine.high %v7794_v60, %v7794_v60  ;;  %v8460_v2 = vrot.slane %v7260_v61, 4 }
 0x250   : > { %4799 = vmatprep.mubr.f32.mxu0 %v1081_v3  ;;  %11959 = vmatprep.mubr.f32.mxu1 %v7761_v4  ;;  %v461_v3 = vld [vmem:[%s15716_s7 + $0xd0] sm:$0xff] }
 0x251   : > { %11965 = vmatprep.subr.mxu1 %v8450_v7  ;;  %4805 = vmatprep.subr.mxu0 %v570_v8  ;;  %v7141_v4 = vld [vmem:[%s15724_s26 + $0xd0] sm:$0xff]  ;;  %v1124_v7 = vrot.slane %v461_v3, %v15754_v20 }
 0x252   : > { %v7804_v8 = vrot.slane %v7141_v4, %v15754_v20 }
 0x253   : > { %v1132_v12 = vcombine.high %v1124_v7, %v1124_v7 }
 0x256   : > { %4800 = vmatmul.mubr.f32.vlgmr.msra.gmra.mrb[0].mxu0 %v1073_v62  ;;  %11960 = vmatmul.mubr.f32.vlgmr.msra.gmra.mrb[0].mxu1 %v7753_v63  ;;  %v8457_v62 = vrot.slane %v7257_v58, 4  ;;  %v577_v63 = vld [vmem:[%s15730_s3 + $0x330] sm:$0xf]  ;;  %v7270_v58 = vld [vmem:[%s15730_s3 + $0x398] sm:$0xf0] }
 0x257   : > { %11966 = vmatpush1.xpose.msra.mxu1 %v8449_v13  ;;  %4806 = vmatpush1.xpose.msra.mxu0 %v569_v14  ;;  %v7812_v13 = vcombine.high %v7804_v8, %v7804_v8  ;;  %v1117_v14 = vcombine.high %v461_v3, %v461_v3  ;;  %v7269_v3 = vld [vmem:[%s15730_s3 + $0x390] sm:$0xf0] }
 0x258   : > { %4869 = vmatprep.mubr.f32.mxu0 %v1082_v15  ;;  %12029 = vmatprep.mubr.f32.mxu1 %v7762_v16  ;;  %v7797_v15 = vcombine.high %v7141_v4, %v7141_v4  ;;  %v8462_v16 = vrot.slane %v7262_v9, 4 }
 0x259   : > { %12035 = vmatprep.subr.mxu1 %v8452_v17  ;;  %4875 = vmatprep.subr.mxu0 %v572_v21  ;;  %v582_v17 = vld [vmem:[%s15730_s3 + $0x358] sm:$0xf]  ;;  %v1131_v19 = vrot.slane %v1117_v14, %v15754_v20  ;;  %v592_v14 = vld [vmem:[%s15730_s3 + $0x3a8] sm:$0xf] }
 0x25a   : > { %v7811_v21 = vrot.slane %v7797_v15, %v15754_v20  ;;  %v7271_v15 = vld [vmem:[%s15730_s3 + $0x3a0] sm:$0xf0] }
 0x25b   : > { %v1133_v25 = vcombine.high %v1131_v19, %v1131_v19 }
 0x25e   : > { %4870 = vmatmul.mubr.f32.vlgmr.msra.gmra.mrb[0].mxu0 %v1080_v10  ;;  %12030 = vmatmul.mubr.f32.vlgmr.msra.gmra.mrb[0].mxu1 %v7760_v11  ;;  %v8459_v10 = vrot.slane %v7259_v6, 4  ;;  %v579_v11 = vld [vmem:[%s15730_s3 + $0x340] sm:$0xf]  ;;  %v7272_v6 = vld [vmem:[%s15730_s3 + $0x3a8] sm:$0xf0] }
 0x25f   : > { %12036 = vmatpush1.xpose.msra.mxu1 %v8451_v26  ;;  %4876 = vmatpush1.xpose.msra.mxu0 %v571_v27  ;;  %v7813_v26 = vcombine.high %v7811_v21, %v7811_v21  ;;  %v8464_v27 = vrot.slane %v7264_v22, 4 }
 0x260   : > { %4939 = vmatprep.mubr.f32.mxu0 %v1098_v28  ;;  %12099 = vmatprep.mubr.f32.mxu1 %v7778_v29  ;;  %v462_v28 = vld [vmem:[%s15716_s7 + $0xd8] sm:$0xff] }
 0x261   : > { %12105 = vmatprep.subr.mxu1 %v8454_v32  ;;  %4945 = vmatprep.subr.mxu0 %v574_v33  ;;  %v7142_v29 = vld [vmem:[%s15724_s26 + $0xd8] sm:$0xff]  ;;  %v1141_v32 = vrot.slane %v462_v28, %v15754_v20 }
 0x262   : > { %v7821_v33 = vrot.slane %v7142_v29, %v15754_v20 }
 0x263   : > { %v1149_v37 = vcombine.high %v1141_v32, %v1141_v32 }
 0x266   : > { %4940 = vmatmul.mubr.f32.vlgmr.msra.gmra.mrb[0].mxu0 %v1090_v23  ;;  %12100 = vmatmul.mubr.f32.vlgmr.msra.gmra.mrb[0].mxu1 %v7770_v24  ;;  %v8461_v23 = vrot.slane %v7261_v18, 4  ;;  %v581_v24 = vld [vmem:[%s15730_s3 + $0x350] sm:$0xf]  ;;  %v7274_v18 = vld [vmem:[%s15730_s3 + $0x3b8] sm:$0xf0] }
 0x267   : > { %12106 = vmatpush1.xpose.msra.mxu1 %v8453_v38  ;;  %4946 = vmatpush1.xpose.msra.mxu0 %v573_v39  ;;  %v7829_v38 = vcombine.high %v7821_v33, %v7821_v33  ;;  %v1134_v39 = vcombine.high %v462_v28, %v462_v28  ;;  %v7273_v28 = vld [vmem:[%s15730_s3 + $0x3b0] sm:$0xf0] }
 0x268   : > { %5009 = vmatprep.mubr.f32.mxu0 %v1099_v40  ;;  %12169 = vmatprep.mubr.f32.mxu1 %v7779_v41  ;;  %v7814_v40 = vcombine.high %v7142_v29, %v7142_v29  ;;  %v8466_v41 = vrot.slane %v7266_v34, 4 }
 0x269   : > { %12175 = vmatprep.subr.mxu1 %v8456_v42  ;;  %5015 = vmatprep.subr.mxu0 %v576_v45  ;;  %v586_v42 = vld [vmem:[%s15730_s3 + $0x378] sm:$0xf]  ;;  %v1148_v44 = vrot.slane %v1134_v39, %v15754_v20  ;;  %v596_v39 = vld [vmem:[%s15730_s3 + $0x3c8] sm:$0xf] }
 0x26a   : > { %v7828_v45 = vrot.slane %v7814_v40, %v15754_v20  ;;  %v7275_v40 = vld [vmem:[%s15730_s3 + $0x3c0] sm:$0xf0] }
 0x26b   : > { %v1150_v49 = vcombine.high %v1148_v44, %v1148_v44 }
 0x26e   : > { %5010 = vmatmul.mubr.f32.vlgmr.msra.gmra.mrb[0].mxu0 %v1097_v35  ;;  %12170 = vmatmul.mubr.f32.vlgmr.msra.gmra.mrb[0].mxu1 %v7777_v36  ;;  %v8463_v35 = vrot.slane %v7263_v31, 4  ;;  %v583_v36 = vld [vmem:[%s15730_s3 + $0x360] sm:$0xf]  ;;  %v7276_v31 = vld [vmem:[%s15730_s3 + $0x3c8] sm:$0xf0] }
 0x26f   : > { %12176 = vmatpush1.xpose.msra.mxu1 %v8455_v50  ;;  %5016 = vmatpush1.xpose.msra.mxu0 %v575_v51  ;;  %v7830_v50 = vcombine.high %v7828_v45, %v7828_v45  ;;  %v8468_v51 = vrot.slane %v7268_v46, 4 }
 0x270   : > { %5079 = vmatprep.mubr.f32.mxu0 %v1115_v52  ;;  %12239 = vmatprep.mubr.f32.mxu1 %v7795_v53  ;;  %v463_v52 = vld [vmem:[%s15716_s7 + $0xe0] sm:$0xff] }
 0x271   : > { %12245 = vmatprep.subr.mxu1 %v8458_v56  ;;  %5085 = vmatprep.subr.mxu0 %v578_v57  ;;  %v7143_v53 = vld [vmem:[%s15724_s26 + $0xe0] sm:$0xff]  ;;  %v1158_v56 = vrot.slane %v463_v52, %v15754_v20 }
 0x272   : > { %v7838_v57 = vrot.slane %v7143_v53, %v15754_v20 }
 0x273   : > { %v1166_v61 = vcombine.high %v1158_v56, %v1158_v56 }
 0x276   : > { %5080 = vmatmul.mubr.f32.vlgmr.msra.gmra.mrb[0].mxu0 %v1107_v47  ;;  %12240 = vmatmul.mubr.f32.vlgmr.msra.gmra.mrb[0].mxu1 %v7787_v48  ;;  %v8465_v47 = vrot.slane %v7265_v43, 4  ;;  %v585_v48 = vld [vmem:[%s15730_s3 + $0x370] sm:$0xf]  ;;  %v7278_v43 = vld [vmem:[%s15730_s3 + $0x3d8] sm:$0xf0] }
 0x277   : > { %12246 = vmatpush1.xpose.msra.mxu1 %v8457_v62  ;;  %5086 = vmatpush1.xpose.msra.mxu0 %v577_v63  ;;  %v7846_v62 = vcombine.high %v7838_v57, %v7838_v57  ;;  %v1151_v63 = vcombine.high %v463_v52, %v463_v52  ;;  %v7277_v52 = vld [vmem:[%s15730_s3 + $0x3d0] sm:$0xf0] }
 0x278   : > { %5149 = vmatprep.mubr.f32.mxu0 %v1116_v0  ;;  %12309 = vmatprep.mubr.f32.mxu1 %v7796_v1  ;;  %v7831_v0 = vcombine.high %v7143_v53, %v7143_v53  ;;  %v8470_v1 = vrot.slane %v7270_v58, 4 }
 0x279   : > { %12315 = vmatprep.subr.mxu1 %v8460_v2  ;;  %5155 = vmatprep.subr.mxu0 %v580_v5  ;;  %v590_v2 = vld [vmem:[%s15730_s3 + $0x398] sm:$0xf]  ;;  %v1165_v4 = vrot.slane %v1151_v63, %v15754_v20  ;;  %v600_v63 = vld [vmem:[%s15730_s3 + $0x3e8] sm:$0xf] }
 0x27a   : > { %v7845_v5 = vrot.slane %v7831_v0, %v15754_v20  ;;  %v7279_v0 = vld [vmem:[%s15730_s3 + $0x3e0] sm:$0xf0] }
 0x27b   : > { %v1167_v9 = vcombine.high %v1165_v4, %v1165_v4 }
 0x27e   : > { %5150 = vmatmul.mubr.f32.vlgmr.msra.gmra.mrb[0].mxu0 %v1114_v59  ;;  %12310 = vmatmul.mubr.f32.vlgmr.msra.gmra.mrb[0].mxu1 %v7794_v60  ;;  %v8467_v59 = vrot.slane %v7267_v55, 4  ;;  %v587_v60 = vld [vmem:[%s15730_s3 + $0x380] sm:$0xf]  ;;  %v7280_v55 = vld [vmem:[%s15730_s3 + $0x3e8] sm:$0xf0] }
 0x27f   : > { %12316 = vmatpush1.xpose.msra.mxu1 %v8459_v10  ;;  %5156 = vmatpush1.xpose.msra.mxu0 %v579_v11  ;;  %v7847_v10 = vcombine.high %v7845_v5, %v7845_v5  ;;  %v8472_v11 = vrot.slane %v7272_v6, 4 }
 0x280   : > { %5219 = vmatprep.mubr.f32.mxu0 %v1132_v12  ;;  %12379 = vmatprep.mubr.f32.mxu1 %v7812_v13  ;;  %v464_v12 = vld [vmem:[%s15716_s7 + $0xe8] sm:$0xff] }
 0x281   : > { %12385 = vmatprep.subr.mxu1 %v8462_v16  ;;  %5225 = vmatprep.subr.mxu0 %v582_v17  ;;  %v7144_v13 = vld [vmem:[%s15724_s26 + $0xe8] sm:$0xff]  ;;  %v1175_v16 = vrot.slane %v464_v12, %v15754_v20 }
 0x282   : > { %v7855_v17 = vrot.slane %v7144_v13, %v15754_v20 }
 0x283   : > { %v1183_v22 = vcombine.high %v1175_v16, %v1175_v16 }
 0x286   : > { %5220 = vmatmul.mubr.f32.vlgmr.msra.gmra.mrb[0].mxu0 %v1124_v7  ;;  %12380 = vmatmul.mubr.f32.vlgmr.msra.gmra.mrb[0].mxu1 %v7804_v8  ;;  %v8469_v7 = vrot.slane %v7269_v3, 4  ;;  %v589_v8 = vld [vmem:[%s15730_s3 + $0x390] sm:$0xf]  ;;  %v7282_v3 = vld [vmem:[%s15730_s3 + $0x3f8] sm:$0xf0] }
 0x287   : > { %12386 = vmatpush1.xpose.msra.mxu1 %v8461_v23  ;;  %5226 = vmatpush1.xpose.msra.mxu0 %v581_v24  ;;  %v7863_v23 = vcombine.high %v7855_v17, %v7855_v17  ;;  %v1168_v24 = vcombine.high %v464_v12, %v464_v12  ;;  %v7281_v12 = vld [vmem:[%s15730_s3 + $0x3f0] sm:$0xf0] }
 0x288   : > { %5289 = vmatprep.mubr.f32.mxu0 %v1133_v25  ;;  %12449 = vmatprep.mubr.f32.mxu1 %v7813_v26  ;;  %v7848_v25 = vcombine.high %v7144_v13, %v7144_v13  ;;  %v8474_v26 = vrot.slane %v7274_v18, 4 }
 0x289   : > { %12455 = vmatprep.subr.mxu1 %v8464_v27  ;;  %5295 = vmatprep.subr.mxu0 %v584_v30  ;;  %v594_v27 = vld [vmem:[%s15730_s3 + $0x3b8] sm:$0xf]  ;;  %v1182_v29 = vrot.slane %v1168_v24, %v15754_v20  ;;  %v604_v24 = vld [vmem:[%s15730_s3 + $0x408] sm:$0xf] }
 0x28a   : > { %v7862_v30 = vrot.slane %v7848_v25, %v15754_v20  ;;  %v7283_v25 = vld [vmem:[%s15730_s3 + $0x400] sm:$0xf0] }
 0x28b   : > { %v1184_v34 = vcombine.high %v1182_v29, %v1182_v29 }
 0x28e   : > { %5290 = vmatmul.mubr.f32.vlgmr.msra.gmra.mrb[0].mxu0 %v1131_v19  ;;  %12450 = vmatmul.mubr.f32.vlgmr.msra.gmra.mrb[0].mxu1 %v7811_v21  ;;  %v8471_v19 = vrot.slane %v7271_v15, 4  ;;  %v591_v21 = vld [vmem:[%s15730_s3 + $0x3a0] sm:$0xf]  ;;  %v7284_v15 = vld [vmem:[%s15730_s3 + $0x408] sm:$0xf0] }
 0x28f   : > { %12456 = vmatpush1.xpose.msra.mxu1 %v8463_v35  ;;  %5296 = vmatpush1.xpose.msra.mxu0 %v583_v36  ;;  %v7864_v35 = vcombine.high %v7862_v30, %v7862_v30  ;;  %v8476_v36 = vrot.slane %v7276_v31, 4 }
 0x290   : > { %5359 = vmatprep.mubr.f32.mxu0 %v1149_v37  ;;  %12519 = vmatprep.mubr.f32.mxu1 %v7829_v38  ;;  %v465_v37 = vld [vmem:[%s15716_s7 + $0xf0] sm:$0xff] }
 0x291   : > { %12525 = vmatprep.subr.mxu1 %v8466_v41  ;;  %5365 = vmatprep.subr.mxu0 %v586_v42  ;;  %v7145_v38 = vld [vmem:[%s15724_s26 + $0xf0] sm:$0xff]  ;;  %v1192_v41 = vrot.slane %v465_v37, %v15754_v20 }
 0x292   : > { %v7872_v42 = vrot.slane %v7145_v38, %v15754_v20 }
 0x293   : > { %v1200_v46 = vcombine.high %v1192_v41, %v1192_v41 }
 0x296   : > { %5360 = vmatmul.mubr.f32.vlgmr.msra.gmra.mrb[0].mxu0 %v1141_v32  ;;  %12520 = vmatmul.mubr.f32.vlgmr.msra.gmra.mrb[0].mxu1 %v7821_v33  ;;  %v8473_v32 = vrot.slane %v7273_v28, 4  ;;  %v593_v33 = vld [vmem:[%s15730_s3 + $0x3b0] sm:$0xf]  ;;  %v7286_v28 = vld [vmem:[%s15730_s3 + $0x418] sm:$0xf0] }
 0x297   : > { %12526 = vmatpush1.xpose.msra.mxu1 %v8465_v47  ;;  %5366 = vmatpush1.xpose.msra.mxu0 %v585_v48  ;;  %v7880_v47 = vcombine.high %v7872_v42, %v7872_v42  ;;  %v1185_v48 = vcombine.high %v465_v37, %v465_v37  ;;  %v7285_v37 = vld [vmem:[%s15730_s3 + $0x410] sm:$0xf0] }
 0x298   : > { %5429 = vmatprep.mubr.f32.mxu0 %v1150_v49  ;;  %12589 = vmatprep.mubr.f32.mxu1 %v7830_v50  ;;  %v7865_v49 = vcombine.high %v7145_v38, %v7145_v38  ;;  %v8478_v50 = vrot.slane %v7278_v43, 4 }
 0x299   : > { %12595 = vmatprep.subr.mxu1 %v8468_v51  ;;  %5435 = vmatprep.subr.mxu0 %v588_v54  ;;  %v598_v51 = vld [vmem:[%s15730_s3 + $0x3d8] sm:$0xf]  ;;  %v1199_v53 = vrot.slane %v1185_v48, %v15754_v20  ;;  %v608_v48 = vld [vmem:[%s15730_s3 + $0x428] sm:$0xf] }
 0x29a   : > { %v7879_v54 = vrot.slane %v7865_v49, %v15754_v20  ;;  %v7287_v49 = vld [vmem:[%s15730_s3 + $0x420] sm:$0xf0] }
 0x29b   : > { %v1201_v58 = vcombine.high %v1199_v53, %v1199_v53 }
 0x29e   : > { %5430 = vmatmul.mubr.f32.vlgmr.msra.gmra.mrb[0].mxu0 %v1148_v44  ;;  %12590 = vmatmul.mubr.f32.vlgmr.msra.gmra.mrb[0].mxu1 %v7828_v45  ;;  %v8475_v44 = vrot.slane %v7275_v40, 4  ;;  %v595_v45 = vld [vmem:[%s15730_s3 + $0x3c0] sm:$0xf]  ;;  %v7288_v40 = vld [vmem:[%s15730_s3 + $0x428] sm:$0xf0] }
 0x29f   : > { %12596 = vmatpush1.xpose.msra.mxu1 %v8467_v59  ;;  %5436 = vmatpush1.xpose.msra.mxu0 %v587_v60  ;;  %v7881_v59 = vcombine.high %v7879_v54, %v7879_v54  ;;  %v8480_v60 = vrot.slane %v7280_v55, 4 }
 0x2a0   : > { %5499 = vmatprep.mubr.f32.mxu0 %v1166_v61  ;;  %12659 = vmatprep.mubr.f32.mxu1 %v7846_v62  ;;  %v466_v61 = vld [vmem:[%s15716_s7 + $0xf8] sm:$0xff] }
 0x2a1   : > { %12665 = vmatprep.subr.mxu1 %v8470_v1  ;;  %5505 = vmatprep.subr.mxu0 %v590_v2  ;;  %v7146_v62 = vld [vmem:[%s15724_s26 + $0xf8] sm:$0xff]  ;;  %v1209_v1 = vrot.slane %v466_v61, %v15754_v20 }
 0x2a2   : > { %v7889_v2 = vrot.slane %v7146_v62, %v15754_v20 }
 0x2a3   : > { %v1217_v6 = vcombine.high %v1209_v1, %v1209_v1 }
 0x2a6   : > { %5500 = vmatmul.mubr.f32.vlgmr.msra.gmra.mrb[0].mxu0 %v1158_v56  ;;  %12660 = vmatmul.mubr.f32.vlgmr.msra.gmra.mrb[0].mxu1 %v7838_v57  ;;  %v8477_v56 = vrot.slane %v7277_v52, 4  ;;  %v597_v57 = vld [vmem:[%s15730_s3 + $0x3d0] sm:$0xf]  ;;  %v7290_v52 = vld [vmem:[%s15730_s3 + $0x438] sm:$0xf0] }
 0x2a7   : > { %12666 = vmatpush1.xpose.msra.mxu1 %v8469_v7  ;;  %5506 = vmatpush1.xpose.msra.mxu0 %v589_v8  ;;  %v7897_v7 = vcombine.high %v7889_v2, %v7889_v2  ;;  %v1202_v8 = vcombine.high %v466_v61, %v466_v61  ;;  %v7289_v61 = vld [vmem:[%s15730_s3 + $0x430] sm:$0xf0] }
 0x2a8   : > { %5569 = vmatprep.mubr.f32.mxu0 %v1167_v9  ;;  %12729 = vmatprep.mubr.f32.mxu1 %v7847_v10  ;;  %v7882_v9 = vcombine.high %v7146_v62, %v7146_v62  ;;  %v8482_v10 = vrot.slane %v7282_v3, 4 }
 0x2a9   : > { %12735 = vmatprep.subr.mxu1 %v8472_v11  ;;  %5575 = vmatprep.subr.mxu0 %v592_v14  ;;  %v602_v11 = vld [vmem:[%s15730_s3 + $0x3f8] sm:$0xf]  ;;  %v1216_v13 = vrot.slane %v1202_v8, %v15754_v20  ;;  %v612_v8 = vld [vmem:[%s15730_s3 + $0x448] sm:$0xf] }
 0x2aa   : > { %v7896_v14 = vrot.slane %v7882_v9, %v15754_v20  ;;  %v7291_v9 = vld [vmem:[%s15730_s3 + $0x440] sm:$0xf0] }
 0x2ab   : > { %v1218_v18 = vcombine.high %v1216_v13, %v1216_v13 }
 0x2ae   : > { %5570 = vmatmul.mubr.f32.vlgmr.msra.gmra.mrb[0].mxu0 %v1165_v4  ;;  %12730 = vmatmul.mubr.f32.vlgmr.msra.gmra.mrb[0].mxu1 %v7845_v5  ;;  %v8479_v4 = vrot.slane %v7279_v0, 4  ;;  %v599_v5 = vld [vmem:[%s15730_s3 + $0x3e0] sm:$0xf]  ;;  %v7292_v0 = vld [vmem:[%s15730_s3 + $0x448] sm:$0xf0] }
 0x2af   : > { %12736 = vmatpush1.xpose.msra.mxu1 %v8471_v19  ;;  %5576 = vmatpush1.xpose.msra.mxu0 %v591_v21  ;;  %v7898_v19 = vcombine.high %v7896_v14, %v7896_v14  ;;  %v8484_v21 = vrot.slane %v7284_v15, 4 }
 0x2b0   : > { %5639 = vmatprep.mubr.f32.mxu0 %v1183_v22  ;;  %12799 = vmatprep.mubr.f32.mxu1 %v7863_v23  ;;  %v467_v22 = vld [vmem:[%s15716_s7 + $0x100] sm:$0xff] }
 0x2b1   : > { %12805 = vmatprep.subr.mxu1 %v8474_v26  ;;  %5645 = vmatprep.subr.mxu0 %v594_v27  ;;  %v7147_v23 = vld [vmem:[%s15724_s26 + $0x100] sm:$0xff]  ;;  %v1226_v26 = vrot.slane %v467_v22, %v15754_v20 }
 0x2b2   : > { %v7906_v27 = vrot.slane %v7147_v23, %v15754_v20 }
 0x2b3   : > { %v1234_v31 = vcombine.high %v1226_v26, %v1226_v26 }
 0x2b6   : > { %5640 = vmatmul.mubr.f32.vlgmr.msra.gmra.mrb[0].mxu0 %v1175_v16  ;;  %12800 = vmatmul.mubr.f32.vlgmr.msra.gmra.mrb[0].mxu1 %v7855_v17  ;;  %v8481_v16 = vrot.slane %v7281_v12, 4  ;;  %v601_v17 = vld [vmem:[%s15730_s3 + $0x3f0] sm:$0xf]  ;;  %v7294_v12 = vld [vmem:[%s15730_s3 + $0x458] sm:$0xf0] }
 0x2b7   : > { %12806 = vmatpush1.xpose.msra.mxu1 %v8473_v32  ;;  %5646 = vmatpush1.xpose.msra.mxu0 %v593_v33  ;;  %v7914_v32 = vcombine.high %v7906_v27, %v7906_v27  ;;  %v1219_v33 = vcombine.high %v467_v22, %v467_v22  ;;  %v7293_v22 = vld [vmem:[%s15730_s3 + $0x450] sm:$0xf0] }
 0x2b8   : > { %5709 = vmatprep.mubr.f32.mxu0 %v1184_v34  ;;  %12869 = vmatprep.mubr.f32.mxu1 %v7864_v35  ;;  %v7899_v34 = vcombine.high %v7147_v23, %v7147_v23  ;;  %v8486_v35 = vrot.slane %v7286_v28, 4 }
 0x2b9   : > { %12875 = vmatprep.subr.mxu1 %v8476_v36  ;;  %5715 = vmatprep.subr.mxu0 %v596_v39  ;;  %v606_v36 = vld [vmem:[%s15730_s3 + $0x418] sm:$0xf]  ;;  %v1233_v38 = vrot.slane %v1219_v33, %v15754_v20  ;;  %v616_v33 = vld [vmem:[%s15730_s3 + $0x468] sm:$0xf] }
 0x2ba   : > { %v7913_v39 = vrot.slane %v7899_v34, %v15754_v20  ;;  %v7295_v34 = vld [vmem:[%s15730_s3 + $0x460] sm:$0xf0] }
 0x2bb   : > { %v1235_v43 = vcombine.high %v1233_v38, %v1233_v38 }
 0x2be   : > { %5710 = vmatmul.mubr.f32.vlgmr.msra.gmra.mrb[0].mxu0 %v1182_v29  ;;  %12870 = vmatmul.mubr.f32.vlgmr.msra.gmra.mrb[0].mxu1 %v7862_v30  ;;  %v8483_v29 = vrot.slane %v7283_v25, 4  ;;  %v603_v30 = vld [vmem:[%s15730_s3 + $0x400] sm:$0xf]  ;;  %v7296_v25 = vld [vmem:[%s15730_s3 + $0x468] sm:$0xf0] }
 0x2bf   : > { %12876 = vmatpush1.xpose.msra.mxu1 %v8475_v44  ;;  %5716 = vmatpush1.xpose.msra.mxu0 %v595_v45  ;;  %v7915_v44 = vcombine.high %v7913_v39, %v7913_v39  ;;  %v8488_v45 = vrot.slane %v7288_v40, 4 }
 0x2c0   : > { %5779 = vmatprep.mubr.f32.mxu0 %v1200_v46  ;;  %12939 = vmatprep.mubr.f32.mxu1 %v7880_v47  ;;  %v468_v46 = vld [vmem:[%s15716_s7 + $0x108] sm:$0xff] }
 0x2c1   : > { %12945 = vmatprep.subr.mxu1 %v8478_v50  ;;  %5785 = vmatprep.subr.mxu0 %v598_v51  ;;  %v7148_v47 = vld [vmem:[%s15724_s26 + $0x108] sm:$0xff]  ;;  %v1243_v50 = vrot.slane %v468_v46, %v15754_v20 }
 0x2c2   : > { %v7923_v51 = vrot.slane %v7148_v47, %v15754_v20 }
 0x2c3   : > { %v1251_v55 = vcombine.high %v1243_v50, %v1243_v50 }
 0x2c6   : > { %5780 = vmatmul.mubr.f32.vlgmr.msra.gmra.mrb[0].mxu0 %v1192_v41  ;;  %12940 = vmatmul.mubr.f32.vlgmr.msra.gmra.mrb[0].mxu1 %v7872_v42  ;;  %v8485_v41 = vrot.slane %v7285_v37, 4  ;;  %v605_v42 = vld [vmem:[%s15730_s3 + $0x410] sm:$0xf]  ;;  %v7298_v37 = vld [vmem:[%s15730_s3 + $0x478] sm:$0xf0] }
 0x2c7   : > { %12946 = vmatpush1.xpose.msra.mxu1 %v8477_v56  ;;  %5786 = vmatpush1.xpose.msra.mxu0 %v597_v57  ;;  %v7931_v56 = vcombine.high %v7923_v51, %v7923_v51  ;;  %v1236_v57 = vcombine.high %v468_v46, %v468_v46  ;;  %v7297_v46 = vld [vmem:[%s15730_s3 + $0x470] sm:$0xf0] }
 0x2c8   : > { %5849 = vmatprep.mubr.f32.mxu0 %v1201_v58  ;;  %13009 = vmatprep.mubr.f32.mxu1 %v7881_v59  ;;  %v7916_v58 = vcombine.high %v7148_v47, %v7148_v47  ;;  %v8490_v59 = vrot.slane %v7290_v52, 4 }
 0x2c9   : > { %13015 = vmatprep.subr.mxu1 %v8480_v60  ;;  %5855 = vmatprep.subr.mxu0 %v600_v63  ;;  %v610_v60 = vld [vmem:[%s15730_s3 + $0x438] sm:$0xf]  ;;  %v1250_v62 = vrot.slane %v1236_v57, %v15754_v20  ;;  %v620_v57 = vld [vmem:[%s15730_s3 + $0x488] sm:$0xf] }
 0x2ca   : > { %v7930_v63 = vrot.slane %v7916_v58, %v15754_v20  ;;  %v7299_v58 = vld [vmem:[%s15730_s3 + $0x480] sm:$0xf0] }
 0x2cb   : > { %v1252_v3 = vcombine.high %v1250_v62, %v1250_v62 }
 0x2ce   : > { %5850 = vmatmul.mubr.f32.vlgmr.msra.gmra.mrb[0].mxu0 %v1199_v53  ;;  %13010 = vmatmul.mubr.f32.vlgmr.msra.gmra.mrb[0].mxu1 %v7879_v54  ;;  %v8487_v53 = vrot.slane %v7287_v49, 4  ;;  %v607_v54 = vld [vmem:[%s15730_s3 + $0x420] sm:$0xf]  ;;  %v7300_v49 = vld [vmem:[%s15730_s3 + $0x488] sm:$0xf0] }
 0x2cf   : > { %13016 = vmatpush1.xpose.msra.mxu1 %v8479_v4  ;;  %5856 = vmatpush1.xpose.msra.mxu0 %v599_v5  ;;  %v7932_v4 = vcombine.high %v7930_v63, %v7930_v63  ;;  %v8492_v5 = vrot.slane %v7292_v0, 4 }
 0x2d0   : > { %5919 = vmatprep.mubr.f32.mxu0 %v1217_v6  ;;  %13079 = vmatprep.mubr.f32.mxu1 %v7897_v7  ;;  %v469_v6 = vld [vmem:[%s15716_s7 + $0x110] sm:$0xff] }
 0x2d1   : > { %13085 = vmatprep.subr.mxu1 %v8482_v10  ;;  %5925 = vmatprep.subr.mxu0 %v602_v11  ;;  %v7149_v7 = vld [vmem:[%s15724_s26 + $0x110] sm:$0xff]  ;;  %v1260_v10 = vrot.slane %v469_v6, %v15754_v20 }
 0x2d2   : > { %v7940_v11 = vrot.slane %v7149_v7, %v15754_v20 }
 0x2d3   : > { %v1268_v15 = vcombine.high %v1260_v10, %v1260_v10 }
 0x2d6   : > { %5920 = vmatmul.mubr.f32.vlgmr.msra.gmra.mrb[0].mxu0 %v1209_v1  ;;  %13080 = vmatmul.mubr.f32.vlgmr.msra.gmra.mrb[0].mxu1 %v7889_v2  ;;  %v8489_v1 = vrot.slane %v7289_v61, 4  ;;  %v609_v2 = vld [vmem:[%s15730_s3 + $0x430] sm:$0xf]  ;;  %v7302_v61 = vld [vmem:[%s15730_s3 + $0x498] sm:$0xf0] }
 0x2d7   : > { %13086 = vmatpush1.xpose.msra.mxu1 %v8481_v16  ;;  %5926 = vmatpush1.xpose.msra.mxu0 %v601_v17  ;;  %v7948_v16 = vcombine.high %v7940_v11, %v7940_v11  ;;  %v1253_v17 = vcombine.high %v469_v6, %v469_v6  ;;  %v7301_v6 = vld [vmem:[%s15730_s3 + $0x490] sm:$0xf0] }
 0x2d8   : > { %5989 = vmatprep.mubr.f32.mxu0 %v1218_v18  ;;  %13149 = vmatprep.mubr.f32.mxu1 %v7898_v19  ;;  %v7933_v18 = vcombine.high %v7149_v7, %v7149_v7  ;;  %v8494_v19 = vrot.slane %v7294_v12, 4 }
 0x2d9   : > { %13155 = vmatprep.subr.mxu1 %v8484_v21  ;;  %5995 = vmatprep.subr.mxu0 %v604_v24  ;;  %v614_v21 = vld [vmem:[%s15730_s3 + $0x458] sm:$0xf]  ;;  %v1267_v23 = vrot.slane %v1253_v17, %v15754_v20  ;;  %v624_v17 = vld [vmem:[%s15730_s3 + $0x4a8] sm:$0xf] }
 0x2da   : > { %v7947_v24 = vrot.slane %v7933_v18, %v15754_v20  ;;  %v7303_v18 = vld [vmem:[%s15730_s3 + $0x4a0] sm:$0xf0] }
 0x2db   : > { %v1269_v28 = vcombine.high %v1267_v23, %v1267_v23 }
 0x2de   : > { %5990 = vmatmul.mubr.f32.vlgmr.msra.gmra.mrb[0].mxu0 %v1216_v13  ;;  %13150 = vmatmul.mubr.f32.vlgmr.msra.gmra.mrb[0].mxu1 %v7896_v14  ;;  %v8491_v13 = vrot.slane %v7291_v9, 4  ;;  %v611_v14 = vld [vmem:[%s15730_s3 + $0x440] sm:$0xf]  ;;  %v7304_v9 = vld [vmem:[%s15730_s3 + $0x4a8] sm:$0xf0] }
 0x2df   : > { %13156 = vmatpush1.xpose.msra.mxu1 %v8483_v29  ;;  %5996 = vmatpush1.xpose.msra.mxu0 %v603_v30  ;;  %v7949_v29 = vcombine.high %v7947_v24, %v7947_v24  ;;  %v8496_v30 = vrot.slane %v7296_v25, 4 }
 0x2e0   : > { %6059 = vmatprep.mubr.f32.mxu0 %v1234_v31  ;;  %13219 = vmatprep.mubr.f32.mxu1 %v7914_v32  ;;  %v470_v31 = vld [vmem:[%s15716_s7 + $0x118] sm:$0xff] }
 0x2e1   : > { %13225 = vmatprep.subr.mxu1 %v8486_v35  ;;  %6065 = vmatprep.subr.mxu0 %v606_v36  ;;  %v7150_v32 = vld [vmem:[%s15724_s26 + $0x118] sm:$0xff]  ;;  %v1277_v35 = vrot.slane %v470_v31, %v15754_v20 }
 0x2e2   : > { %v7957_v36 = vrot.slane %v7150_v32, %v15754_v20 }
 0x2e3   : > { %v1285_v40 = vcombine.high %v1277_v35, %v1277_v35 }
 0x2e6   : > { %6060 = vmatmul.mubr.f32.vlgmr.msra.gmra.mrb[0].mxu0 %v1226_v26  ;;  %13220 = vmatmul.mubr.f32.vlgmr.msra.gmra.mrb[0].mxu1 %v7906_v27  ;;  %v8493_v26 = vrot.slane %v7293_v22, 4  ;;  %v613_v27 = vld [vmem:[%s15730_s3 + $0x450] sm:$0xf]  ;;  %v7306_v22 = vld [vmem:[%s15730_s3 + $0x4b8] sm:$0xf0] }
 0x2e7   : > { %13226 = vmatpush1.xpose.msra.mxu1 %v8485_v41  ;;  %6066 = vmatpush1.xpose.msra.mxu0 %v605_v42  ;;  %v7965_v41 = vcombine.high %v7957_v36, %v7957_v36  ;;  %v1270_v42 = vcombine.high %v470_v31, %v470_v31  ;;  %v7305_v31 = vld [vmem:[%s15730_s3 + $0x4b0] sm:$0xf0] }
 0x2e8   : > { %6129 = vmatprep.mubr.f32.mxu0 %v1235_v43  ;;  %13289 = vmatprep.mubr.f32.mxu1 %v7915_v44  ;;  %v7950_v43 = vcombine.high %v7150_v32, %v7150_v32  ;;  %v8498_v44 = vrot.slane %v7298_v37, 4 }
 0x2e9   : > { %13295 = vmatprep.subr.mxu1 %v8488_v45  ;;  %6135 = vmatprep.subr.mxu0 %v608_v48  ;;  %v618_v45 = vld [vmem:[%s15730_s3 + $0x478] sm:$0xf]  ;;  %v1284_v47 = vrot.slane %v1270_v42, %v15754_v20  ;;  %v628_v42 = vld [vmem:[%s15730_s3 + $0x4c8] sm:$0xf] }
 0x2ea   : > { %v7964_v48 = vrot.slane %v7950_v43, %v15754_v20  ;;  %v7307_v43 = vld [vmem:[%s15730_s3 + $0x4c0] sm:$0xf0] }
 0x2eb   : > { %v1286_v52 = vcombine.high %v1284_v47, %v1284_v47 }
 0x2ee   : > { %6130 = vmatmul.mubr.f32.vlgmr.msra.gmra.mrb[0].mxu0 %v1233_v38  ;;  %13290 = vmatmul.mubr.f32.vlgmr.msra.gmra.mrb[0].mxu1 %v7913_v39  ;;  %v8495_v38 = vrot.slane %v7295_v34, 4  ;;  %v615_v39 = vld [vmem:[%s15730_s3 + $0x460] sm:$0xf]  ;;  %v7308_v34 = vld [vmem:[%s15730_s3 + $0x4c8] sm:$0xf0] }
 0x2ef   : > { %13296 = vmatpush1.xpose.msra.mxu1 %v8487_v53  ;;  %6136 = vmatpush1.xpose.msra.mxu0 %v607_v54  ;;  %v7966_v53 = vcombine.high %v7964_v48, %v7964_v48  ;;  %v8500_v54 = vrot.slane %v7300_v49, 4 }
 0x2f0   : > { %6199 = vmatprep.mubr.f32.mxu0 %v1251_v55  ;;  %13359 = vmatprep.mubr.f32.mxu1 %v7931_v56  ;;  %v471_v55 = vld [vmem:[%s15716_s7 + $0x120] sm:$0xff] }
 0x2f1   : > { %13365 = vmatprep.subr.mxu1 %v8490_v59  ;;  %6205 = vmatprep.subr.mxu0 %v610_v60  ;;  %v7151_v56 = vld [vmem:[%s15724_s26 + $0x120] sm:$0xff]  ;;  %v1294_v59 = vrot.slane %v471_v55, %v15754_v20 }
 0x2f2   : > { %v7974_v60 = vrot.slane %v7151_v56, %v15754_v20 }
 0x2f3   : > { %v1302_v0 = vcombine.high %v1294_v59, %v1294_v59 }
 0x2f6   : > { %6200 = vmatmul.mubr.f32.vlgmr.msra.gmra.mrb[0].mxu0 %v1243_v50  ;;  %13360 = vmatmul.mubr.f32.vlgmr.msra.gmra.mrb[0].mxu1 %v7923_v51  ;;  %v8497_v50 = vrot.slane %v7297_v46, 4  ;;  %v617_v51 = vld [vmem:[%s15730_s3 + $0x470] sm:$0xf]  ;;  %v7310_v46 = vld [vmem:[%s15730_s3 + $0x4d8] sm:$0xf0] }
 0x2f7   : > { %13366 = vmatpush1.xpose.msra.mxu1 %v8489_v1  ;;  %6206 = vmatpush1.xpose.msra.mxu0 %v609_v2  ;;  %v7982_v1 = vcombine.high %v7974_v60, %v7974_v60  ;;  %v1287_v2 = vcombine.high %v471_v55, %v471_v55  ;;  %v7309_v55 = vld [vmem:[%s15730_s3 + $0x4d0] sm:$0xf0] }
 0x2f8   : > { %6269 = vmatprep.mubr.f32.mxu0 %v1252_v3  ;;  %13429 = vmatprep.mubr.f32.mxu1 %v7932_v4  ;;  %v7967_v3 = vcombine.high %v7151_v56, %v7151_v56  ;;  %v8502_v4 = vrot.slane %v7302_v61, 4 }
 0x2f9   : > { %13435 = vmatprep.subr.mxu1 %v8492_v5  ;;  %6275 = vmatprep.subr.mxu0 %v612_v8  ;;  %v622_v5 = vld [vmem:[%s15730_s3 + $0x498] sm:$0xf]  ;;  %v1301_v7 = vrot.slane %v1287_v2, %v15754_v20  ;;  %v632_v2 = vld [vmem:[%s15730_s3 + $0x4e8] sm:$0xf] }
 0x2fa   : > { %v7981_v8 = vrot.slane %v7967_v3, %v15754_v20  ;;  %v7311_v3 = vld [vmem:[%s15730_s3 + $0x4e0] sm:$0xf0] }
 0x2fb   : > { %v1303_v12 = vcombine.high %v1301_v7, %v1301_v7 }
 0x2fe   : > { %6270 = vmatmul.mubr.f32.vlgmr.msra.gmra.mrb[0].mxu0 %v1250_v62  ;;  %13430 = vmatmul.mubr.f32.vlgmr.msra.gmra.mrb[0].mxu1 %v7930_v63  ;;  %v8499_v62 = vrot.slane %v7299_v58, 4  ;;  %v619_v63 = vld [vmem:[%s15730_s3 + $0x480] sm:$0xf]  ;;  %v7312_v58 = vld [vmem:[%s15730_s3 + $0x4e8] sm:$0xf0] }
 0x2ff   : > { %13436 = vmatpush1.xpose.msra.mxu1 %v8491_v13  ;;  %6276 = vmatpush1.xpose.msra.mxu0 %v611_v14  ;;  %v7983_v13 = vcombine.high %v7981_v8, %v7981_v8  ;;  %v8504_v14 = vrot.slane %v7304_v9, 4 }
 0x300   : > { %6339 = vmatprep.mubr.f32.mxu0 %v1268_v15  ;;  %13499 = vmatprep.mubr.f32.mxu1 %v7948_v16  ;;  %v472_v15 = vld [vmem:[%s15716_s7 + $0x128] sm:$0xff] }
 0x301   : > { %13505 = vmatprep.subr.mxu1 %v8494_v19  ;;  %6345 = vmatprep.subr.mxu0 %v614_v21  ;;  %v7152_v16 = vld [vmem:[%s15724_s26 + $0x128] sm:$0xff]  ;;  %v1311_v19 = vrot.slane %v472_v15, %v15754_v20 }
 0x302   : > { %v7991_v21 = vrot.slane %v7152_v16, %v15754_v20 }
 0x303   : > { %v1319_v25 = vcombine.high %v1311_v19, %v1311_v19 }
 0x306   : > { %6340 = vmatmul.mubr.f32.vlgmr.msra.gmra.mrb[0].mxu0 %v1260_v10  ;;  %13500 = vmatmul.mubr.f32.vlgmr.msra.gmra.mrb[0].mxu1 %v7940_v11  ;;  %v8501_v10 = vrot.slane %v7301_v6, 4  ;;  %v621_v11 = vld [vmem:[%s15730_s3 + $0x490] sm:$0xf]  ;;  %v7314_v6 = vld [vmem:[%s15730_s3 + $0x4f8] sm:$0xf0] }
 0x307   : > { %13506 = vmatpush1.xpose.msra.mxu1 %v8493_v26  ;;  %6346 = vmatpush1.xpose.msra.mxu0 %v613_v27  ;;  %v7999_v26 = vcombine.high %v7991_v21, %v7991_v21  ;;  %v1304_v27 = vcombine.high %v472_v15, %v472_v15  ;;  %v7313_v15 = vld [vmem:[%s15730_s3 + $0x4f0] sm:$0xf0] }
 0x308   : > { %6409 = vmatprep.mubr.f32.mxu0 %v1269_v28  ;;  %13569 = vmatprep.mubr.f32.mxu1 %v7949_v29  ;;  %v7984_v28 = vcombine.high %v7152_v16, %v7152_v16  ;;  %v8506_v29 = vrot.slane %v7306_v22, 4 }
 0x309   : > { %13575 = vmatprep.subr.mxu1 %v8496_v30  ;;  %6415 = vmatprep.subr.mxu0 %v616_v33  ;;  %v626_v30 = vld [vmem:[%s15730_s3 + $0x4b8] sm:$0xf]  ;;  %v1318_v32 = vrot.slane %v1304_v27, %v15754_v20 }
 0x30a   : > { %v7998_v33 = vrot.slane %v7984_v28, %v15754_v20 }
 0x30b   : > { %v1320_v37 = vcombine.high %v1318_v32, %v1318_v32 }
 0x30e   : > { %6410 = vmatmul.mubr.f32.vlgmr.msra.gmra.mrb[0].mxu0 %v1267_v23  ;;  %13570 = vmatmul.mubr.f32.vlgmr.msra.gmra.mrb[0].mxu1 %v7947_v24  ;;  %v8503_v23 = vrot.slane %v7303_v18, 4  ;;  %v623_v24 = vld [vmem:[%s15730_s3 + $0x4a0] sm:$0xf]  ;;  %v8513_v18 = vrot.slane %v7313_v15, 4 }
 0x30f   : > { %13576 = vmatpush1.xpose.msra.mxu1 %v8495_v38  ;;  %6416 = vmatpush1.xpose.msra.mxu0 %v615_v39  ;;  %v8000_v38 = vcombine.high %v7998_v33, %v7998_v33  ;;  %v8508_v39 = vrot.slane %v7308_v34, 4 }
 0x310   : > { %6479 = vmatprep.mubr.f32.mxu0 %v1285_v40  ;;  %13639 = vmatprep.mubr.f32.mxu1 %v7965_v41  ;;  %v473_v40 = vld [vmem:[%s15716_s7 + $0x130] sm:$0xff] }
 0x311   : > { %13645 = vmatprep.subr.mxu1 %v8498_v44  ;;  %6485 = vmatprep.subr.mxu0 %v618_v45  ;;  %v7153_v41 = vld [vmem:[%s15724_s26 + $0x130] sm:$0xff]  ;;  %v1328_v44 = vrot.slane %v473_v40, %v15754_v20 }
 0x312   : > { %v8008_v45 = vrot.slane %v7153_v41, %v15754_v20 }
 0x313   : > { %v1336_v49 = vcombine.high %v1328_v44, %v1328_v44 }
 0x316   : > { %6480 = vmatmul.mubr.f32.vlgmr.msra.gmra.mrb[0].mxu0 %v1277_v35  ;;  %13640 = vmatmul.mubr.f32.vlgmr.msra.gmra.mrb[0].mxu1 %v7957_v36  ;;  %v8505_v35 = vrot.slane %v7305_v31, 4  ;;  %v625_v36 = vld [vmem:[%s15730_s3 + $0x4b0] sm:$0xf] }
 0x317   : > { %13646 = vmatpush1.xpose.msra.mxu1 %v8497_v50  ;;  %6486 = vmatpush1.xpose.msra.mxu0 %v617_v51  ;;  %v8016_v50 = vcombine.high %v8008_v45, %v8008_v45  ;;  %v1321_v51 = vcombine.high %v473_v40, %v473_v40 }
 0x318   : > { %6549 = vmatprep.mubr.f32.mxu0 %v1286_v52  ;;  %13709 = vmatprep.mubr.f32.mxu1 %v7966_v53  ;;  %v8001_v52 = vcombine.high %v7153_v41, %v7153_v41  ;;  %v8510_v53 = vrot.slane %v7310_v46, 4 }
 0x319   : > { %13715 = vmatprep.subr.mxu1 %v8500_v54  ;;  %6555 = vmatprep.subr.mxu0 %v620_v57  ;;  %v630_v54 = vld [vmem:[%s15730_s3 + $0x4d8] sm:$0xf]  ;;  %v1335_v56 = vrot.slane %v1321_v51, %v15754_v20 }
 0x31a   : > { %v8015_v57 = vrot.slane %v8001_v52, %v15754_v20 }
 0x31b   : > { %v1337_v61 = vcombine.high %v1335_v56, %v1335_v56 }
 0x31e   : > { %6550 = vmatmul.mubr.f32.vlgmr.msra.gmra.mrb[0].mxu0 %v1284_v47  ;;  %13710 = vmatmul.mubr.f32.vlgmr.msra.gmra.mrb[0].mxu1 %v7964_v48  ;;  %v8507_v47 = vrot.slane %v7307_v43, 4  ;;  %v627_v48 = vld [vmem:[%s15730_s3 + $0x4c0] sm:$0xf] }
 0x31f   : > { %13716 = vmatpush1.xpose.msra.mxu1 %v8499_v62  ;;  %6556 = vmatpush1.xpose.msra.mxu0 %v619_v63  ;;  %v8017_v62 = vcombine.high %v8015_v57, %v8015_v57  ;;  %v8512_v63 = vrot.slane %v7312_v58, 4 }
 0x320   : > { %6619 = vmatprep.mubr.f32.mxu0 %v1302_v0  ;;  %13779 = vmatprep.mubr.f32.mxu1 %v7982_v1  ;;  %v474_v0 = vld [vmem:[%s15716_s7 + $0x138] sm:$0xff] }
 0x321   : > { %13785 = vmatprep.subr.mxu1 %v8502_v4  ;;  %6625 = vmatprep.subr.mxu0 %v622_v5  ;;  %v7154_v1 = vld [vmem:[%s15724_s26 + $0x138] sm:$0xff]  ;;  %v1345_v4 = vrot.slane %v474_v0, %v15754_v20 }
 0x322   : > { %v8025_v5 = vrot.slane %v7154_v1, %v15754_v20 }
 0x323   : > { %v1353_v9 = vcombine.high %v1345_v4, %v1345_v4 }
 0x326   : > { %6620 = vmatmul.mubr.f32.vlgmr.msra.gmra.mrb[0].mxu0 %v1294_v59  ;;  %13780 = vmatmul.mubr.f32.vlgmr.msra.gmra.mrb[0].mxu1 %v7974_v60  ;;  %v8509_v59 = vrot.slane %v7309_v55, 4  ;;  %v629_v60 = vld [vmem:[%s15730_s3 + $0x4d0] sm:$0xf] }
 0x327   : > { %13786 = vmatpush1.xpose.msra.mxu1 %v8501_v10  ;;  %6626 = vmatpush1.xpose.msra.mxu0 %v621_v11  ;;  %v8033_v10 = vcombine.high %v8025_v5, %v8025_v5  ;;  %v1338_v11 = vcombine.high %v474_v0, %v474_v0 }
 0x328   : > { %6689 = vmatprep.mubr.f32.mxu0 %v1303_v12  ;;  %13849 = vmatprep.mubr.f32.mxu1 %v7983_v13  ;;  %v8018_v12 = vcombine.high %v7154_v1, %v7154_v1  ;;  %v8514_v13 = vrot.slane %v7314_v6, 4 }
 0x329   : > { %13855 = vmatprep.subr.mxu1 %v8504_v14  ;;  %6695 = vmatprep.subr.mxu0 %v624_v17  ;;  %v634_v14 = vld [vmem:[%s15730_s3 + $0x4f8] sm:$0xf]  ;;  %v1352_v16 = vrot.slane %v1338_v11, %v15754_v20 }
 0x32a   : > { %v8032_v17 = vrot.slane %v8018_v12, %v15754_v20  ;;  %v14275_v20 = vld [vmem:[#allocation2] sm:$0x3] }
 0x32c   : > { %v8034_v22 = vcombine.high %v8032_v17, %v8032_v17 }
 0x32e   : > { %6690 = vmatmul.mubr.f32.vlgmr.msra.gmra.mrb[0].mxu0 %v1301_v7  ;;  %13850 = vmatmul.mubr.f32.vlgmr.msra.gmra.mrb[0].mxu1 %v7981_v8  ;;  %v8511_v7 = vrot.slane %v7311_v3, 4  ;;  %v631_v8 = vld [vmem:[%s15730_s3 + $0x4e0] sm:$0xf] }
 0x32f   : > { %13856 = vmatpush1.xpose.msra.mxu1 %v8503_v23  ;;  %6696 = vmatpush1.xpose.msra.mxu0 %v623_v24 }
 0x330   : > { %6759 = vmatprep.mubr.f32.mxu0 %v1319_v25  ;;  %13919 = vmatprep.mubr.f32.mxu1 %v7999_v26 }
 0x331   : > { %13925 = vmatprep.subr.mxu1 %v8506_v29  ;;  %6765 = vmatprep.subr.mxu0 %v626_v30  ;;  %v14300_v30 = vld [vmem:[#allocation11] sm:$0xff] (!%p14592_p9) }
 0x336   : > { %6760 = vmatmul.mubr.f32.vlgmr.msra.gmra.mrb[0].mxu0 %v1311_v19  ;;  %13920 = vmatmul.mubr.f32.vlgmr.msra.gmra.mrb[0].mxu1 %v7991_v21  ;;  %v633_v19 = vld [vmem:[%s15730_s3 + $0x4f0] sm:$0xf]  ;;  %v1354_v21 = vcombine.high %v1352_v16, %v1352_v16 }
 0x337   : > { %13926 = vmatpush1.xpose.msra.mxu1 %v8505_v35  ;;  %6766 = vmatpush1.xpose.msra.mxu0 %v625_v36 }
 0x338   : > { %6829 = vmatprep.mubr.f32.mxu0 %v1320_v37  ;;  %13989 = vmatprep.mubr.f32.mxu1 %v8000_v38  ;;  %v14384_v37 = vld [vmem:[%s16343_s6] sm:$0xff] (!%p14592_p9)  ;;  %v14594_v38 = vld [vmem:[#allocation12] ss:$0 sm:$0xff] (!%p14592_p9) }
 0x339   : > { %13995 = vmatprep.subr.mxu1 %v8508_v39  ;;  %6835 = vmatprep.subr.mxu0 %v628_v42 }
 0x33e   : > { %6830 = vmatmul.mubr.f32.vlgmr.msra.gmra.mrb[0].mxu0 %v1318_v32  ;;  %13990 = vmatmul.mubr.f32.vlgmr.msra.gmra.mrb[0].mxu1 %v7998_v33  ;;  %v15387_v32 = vmov (!%p14592_p9), 0.0   ;;  %v14593_v33 = vld [vmem:[#allocation9] ss:$0 sm:$0xff] (!%p14592_p9) }
 0x33f   : > { %13996 = vmatpush1.xpose.msra.mxu1 %v8507_v47  ;;  %6836 = vmatpush1.xpose.msra.mxu0 %v627_v48 }
 0x340   : > { %6899 = vmatprep.mubr.f32.mxu0 %v1336_v49  ;;  %14059 = vmatprep.mubr.f32.mxu1 %v8016_v50 }
 0x341   : > { %14065 = vmatprep.subr.mxu1 %v8510_v53  ;;  %6905 = vmatprep.subr.mxu0 %v630_v54 }
 0x346   : > { %6900 = vmatmul.mubr.f32.vlgmr.msra.gmra.mrb[0].mxu0 %v1328_v44  ;;  %14060 = vmatmul.mubr.f32.vlgmr.msra.gmra.mrb[0].mxu1 %v8008_v45  ;;  %v14596_v44 = vld [vmem:[#allocation3] ss:$0 sm:$0xff] (!%p14592_p9) }
 0x347   : > { %14066 = vmatpush1.xpose.msra.mxu1 %v8509_v59  ;;  %6906 = vmatpush1.xpose.msra.mxu0 %v629_v60 }
 0x348   : > { %6969 = vmatprep.mubr.f32.mxu0 %v1337_v61  ;;  %14129 = vmatprep.mubr.f32.mxu1 %v8017_v62 }
 0x349   : > { %14135 = vmatprep.subr.mxu1 %v8512_v63  ;;  %6975 = vmatprep.subr.mxu0 %v632_v2 }
 0x34e   : > { %6970 = vmatmul.mubr.f32.vlgmr.msra.gmra.mrb[0].mxu0 %v1335_v56  ;;  %14130 = vmatmul.mubr.f32.vlgmr.msra.gmra.mrb[0].mxu1 %v8015_v57 }
 0x34f   : > { %14136 = vmatpush1.xpose.msra.mxu1 %v8511_v7  ;;  %6976 = vmatpush1.xpose.msra.mxu0 %v631_v8 }
 0x350   : > { %7039 = vmatprep.mubr.f32.mxu0 %v1353_v9  ;;  %14199 = vmatprep.mubr.f32.mxu1 %v8033_v10 }
 0x351   : > { %14205 = vmatprep.subr.mxu1 %v8514_v13  ;;  %7045 = vmatprep.subr.mxu0 %v634_v14 }
 0x356   : > { %7040 = vmatmul.mubr.f32.vlgmr.msra.gmra.mrb[0].mxu0 %v1345_v4  ;;  %14200 = vmatmul.mubr.f32.vlgmr.msra.gmra.mrb[0].mxu1 %v8025_v5 }
 0x357   : > { %14206 = vmatpush1.xpose.msra.mxu1 %v8513_v18  ;;  %7046 = vmatpush1.xpose.msra.mxu0 %v633_v19 }
 0x358   : > { %7109 = vmatprep.mubr.f32.mxu0 %v1354_v21  ;;  %14269 = vmatprep.mubr.f32.mxu1 %v8034_v22 }
 0x359   : > { %14606 = vmatprep.subr.mxu0 (!%p14592_p9), %v15387_v32  ;;  %14611 = vmatprep.subr.mxu1 (!%p14592_p9), %v15387_v32 }
 0x35e   : > { %7110 = vmatmul.mubr.f32.vlgmr.msra.gmra.mrb[0].mxu0 %v1352_v16  ;;  %14270 = vmatmul.mubr.f32.vlgmr.msra.gmra.mrb[0].mxu1 %v8032_v17 }
 0x35f   : > { %14608 = vmatprep.mubr.msk.f32.mxu0 (!%p14592_p9), %vm15388_vm3, %v15387_v32  ;;  %14607 = vmatpush3.msra.mxu0 (!%p14592_p9), %v14300_v30 }
 0x360   : > { %14613 = vmatprep.mubr.msk.f32.mxu1 (!%p14592_p9), %vm15388_vm3, %v15387_v32  ;;  %14612 = vmatpush3.msra.mxu1 (!%p14592_p9), %v14384_v37 }
 0x431   : > { %v7111_v23 = vpop.f32.mrb[0].mxu0  ;;  %v14271_v24 = vpop.f32.mrb[0].mxu1 }
 0x432   : > { %v7113_v25 = vpop.f32.mrb[1].mxu0  ;;  %v14273_v26 = vpop.f32.mrb[1].mxu1  ;;  %14277 = vrot.lane.b32.xlu0 %v14271_v24, %s15386_s27 }
 0x4a2   : > { %14288 = sbr.rel (%p14592_p9) target bundleno = 1639 (0x667), region = 84 }
 0x4a4   : > { %v14278_v27 = vpop.permute.xlu0 %14277 }
 0x4a5   : > { %v14281_v28 = vsel %vm14280_vm1, %v7111_v23, %v14278_v27 }
 0x4a6   : > { %v14282_v29 = vadd.f32 %v14281_v28, %v14275_v20 }
 0x4a8   : > { %14284 = vst.msk [vmem:[#allocation2] sm:$0x3] %vm14283_vm2, %v14282_v29 }
 0x4af   : > { %v14289_v31 = vld [vmem:[#allocation2] sm:$0x3] }
 0x4b0   : > { %v14297_v34 = vadd.f32 %v14593_v33, %v14289_v31 }
 0x4b2   : > { %v14298_v35 = vmax.f32 %v14297_v34, 0.0 }
 0x4b4   : > { %v14299_v36 = vmin.f32 %v14298_v35, 1.0 }
 0x4b6   : > { %14609 = vmatmul.mubr.msk.f32.vlgmr.msra.gmra.mrb[0].mxu0 %vm14308_vm4, %v14299_v36 }
 0x589   : > { %v14378_v39 = vpop.f32.mrb[0].mxu0 }
 0x58a   : > { %v14379_v40 = vadd.f32 %v14594_v38, %v14378_v39  ;;  %v14610_v41 = vpop.f32.mrb[1].mxu0 }
 0x58c   : > { %v14382_v42 = vmax.f32 %v14379_v40, 0.0 }
 0x58e   : > { %v14383_v43 = vmin.f32 %v14382_v42, 1.0 }
 0x590   : > { %14614 = vmatmul.mubr.msk.f32.vlgmr.msra.gmra.mrb[0].mxu1 %vm14308_vm4, %v14383_v43 }
 0x663   : > { %v14461_v45 = vpop.f32.mrb[0].mxu1 }
 0x664   : > { %v14462_v46 = vadd.f32 %v14596_v44, %v14461_v45  ;;  %v14615_v47 = vpop.f32.mrb[1].mxu1 }
 0x666   : > { %14466 = vst.msk [vmem:[%s16383_s21] sm:$0x3] %vm14465_vm5, %v14462_v46 }
 0x667 PF: > { %s16384_s25 = sld [smem:[#allocation19_spill]]  ;;  %s16385_s19 = sld [smem:[#allocation20_spill]] }
 0x668   : > { %s16386_s13 = smov %s15627_s9  ;;  %p25_p6 = scmp.ge.s32.totalorder %s15492_s18, 4  }
 0x669   : > { %s16387_s29 = smov %s15356_s30  ;;  %s16390_s10 = smov %s15368_s11 }
 0x66a   : > { %s16391_s11 = smov %s15372_s12  ;;  %s16392_s12 = smov %s16386_s13 }
 0x66b   : > { %s16393_s7 = smov %s15492_s18  ;;  %27 = sbr.rel (!%p25_p6) target bundleno = 12 (0xc), region = 132 }
 0x66d   : > { %s16388_s30 = smov %s16384_s25  ;;  %s16389_s9 = smov %s16385_s19 }
 0x672   :  { %14478 = vsyncpa [#allocation5], 1 }
 0x673   :  { %14480 = vsyncpa [#allocation5 + $0x1], 1 }
 0x674   :  { %14481 = vsyncpa [#allocation7], 1 }
 0x675   :  { %14483 = vsyncpa [#allocation7 + $0x1], 1 }
 0x676   :  { %14484 = vsyncpa [#allocation10], 1 }
 0x677   :  { %14485 = vsyncpa [#allocation13], 1 }

</bundles_post_ra>
